<compile_context>
chip_gen: v7x
topology: tpu7x:2x2x1
jax: 0.10.0
libtpu: 0.0.40
codegen_flags: <defaults>
</compile_context>

<pallas_src>
import functools

import jax
import jax.numpy as jnp
from jax.experimental import pallas as pl
from jax.experimental.pallas import tpu as pltpu

FEA = 128          # stands in for the module's hard-coded 512 (== conf['mid_layer'])
TEXT_KS = (2, 3, 4, 5)
TEXT_CO = 32
TAP_PAD = 128      # each conv tap's Co=32 column slab lane-padded to 128
CLS_PAD = 128      # attr classifier class dim lane-padded to 128


def _vspec():
    return pl.BlockSpec(memory_space=pltpu.MemorySpace.VMEM)


def _round_up(x, m):
    return ((x + m - 1) // m) * m


def _pad_rows(x, m=8):
    pad = (-x.shape[0]) % m
    if pad == 0:
        return x
    widths = [(0, pad)] + [(0, 0)] * (x.ndim - 1)
    return jnp.pad(x, widths)


def _pad_axis(x, axis, m=8):
    pad = (-x.shape[axis]) % m
    if pad == 0:
        return x
    widths = [(0, 0)] * x.ndim
    widths[axis] = (0, pad)
    return jnp.pad(x, widths)


def _ce_rows(logits, labels):
    """Per-row cross entropy (reduction='none'): lse(x) - x[label].  All f32."""
    x = logits
    m = jnp.max(x, axis=-1, keepdims=True)
    lse = m + jnp.log(jnp.sum(jnp.exp(x - m), axis=-1, keepdims=True))
    idx = jax.lax.broadcasted_iota(jnp.int32, x.shape, 1)
    picked = jnp.sum(jnp.where(idx == labels, x, 0.0), axis=-1, keepdims=True)
    return lse - picked


# ----------------------------- Pallas kernels -----------------------------

def _tiled_linear_kernel(x_ref, w_ref, b_ref, o_ref):
    # y = x @ w + b, contraction (K) axis tiled over the grid; o_ref IS the f32
    # accumulator (its block index is constant across the K grid -> VMEM resident).
    @pl.when(pl.program_id(0) == 0)
    def _():
        o_ref[...] = jnp.zeros_like(o_ref)

    o_ref[...] += jnp.dot(x_ref[...], w_ref[...],
                          preferred_element_type=jnp.float32)

    @pl.when(pl.program_id(0) == pl.num_programs(0) - 1)
    def _():
        o_ref[...] += b_ref[...]


def _text_kernel(emb_ref, wall_ref, bconv_ref, wt_ref, bt_ref, o_ref, *, B, L, Ks, Cp):
    # Full text path: all Conv2d(1,Co,(K,D)) branches + ReLU + max-over-time + textW.
    # Conv tap slabs are lane-padded to Cp=128, so every slice is lane-aligned and the
    # K-tap accumulation is done batch-wide (no per-batch Python loop).
    embb = emb_ref[...].astype(jnp.bfloat16)                         # (B*L, D)
    g_all = jnp.dot(embb, wall_ref[...], preferred_element_type=jnp.float32)
    g3 = g_all.reshape(B, L, g_all.shape[-1])                        # (B, L, n_taps*Cp)
    feats = []
    tap = 0
    for bi, K in enumerate(Ks):
        Tlen = L - K + 1
        acc = jnp.zeros((B, Tlen, Cp), jnp.float32)
        for k in range(K):
            col = (tap + k) * Cp
            acc = acc + g3[:, k:k + Tlen, col:col + Cp]              # lane-aligned
        tap += K
        acc = jnp.maximum(acc + bconv_ref[:, bi * Cp:(bi + 1) * Cp], 0.0)   # F.relu
        feats.append(jnp.max(acc, axis=1))                           # max_pool1d over T
    tf = jnp.concatenate(feats, axis=-1)                             # (B, 4*Cp)
    # nn.Dropout(0.4): eval-mode identity, then textW (rows packed to padded layout).
    o_ref[...] = jnp.dot(tf.astype(jnp.bfloat16), wt_ref[...],
                         preferred_element_type=jnp.float32) + bt_ref[...]


def _bigru_kernel(x_ref, h0_ref, wih_ref, bih_ref, whh_ref, bhh_ref, o_ref,
                  gi_scr, *, T, H):
    # One grid step == one DIRECTION of a PyTorch bidirectional GRU; all T timesteps
    # run inside (unrolled).  The input projection for every timestep is hoisted into
    # one MXU dot; only the (Bp,H)x(H,3H) recurrent dot sits on the serial chain.
    d = pl.program_id(0)          # 0 = forward, 1 = backward
    Bp = x_ref.shape[1]
    I = x_ref.shape[2]

    x_flat = x_ref[...].reshape(T * Bp, I).astype(jnp.bfloat16)
    gi = jnp.dot(x_flat, wih_ref[0], preferred_element_type=jnp.float32) + bih_ref[0]
    gi_scr[...] = gi.reshape(T, Bp, 3 * H)

    whh = whh_ref[0]                                                 # (H, 3H) bf16
    bhh = bhh_ref[0]                                                 # (1, 3H) f32

    def step(t, h):
        ti = jnp.where(d == 0, t, T - 1 - t)                         # original time idx
        g_i = gi_scr[ti]                                             # (Bp, 3H)
        g_h = jnp.dot(h.astype(jnp.bfloat16), whh,
                      preferred_element_type=jnp.float32) + bhh
        r = jax.nn.sigmoid(g_i[:, :H] + g_h[:, :H])
        z = jax.nn.sigmoid(g_i[:, H:2 * H] + g_h[:, H:2 * H])
        n = jnp.tanh(g_i[:, 2 * H:] + r * g_h[:, 2 * H:])
        h_new = (1.0 - z) * n + z * h
        o_ref[ti] = h_new
        return h_new

    jax.lax.fori_loop(0, T, step, h0_ref[0], unroll=True)


def _heads_kernel(occ_in_ref, occ_lab_ref,
                  ow_ref, ob_ref, oc1w_ref, oc1b_ref, oc2w_ref, oc2b_ref,
                  cf_ref, cat_lab_ref,
                  cw_ref, cb_ref, cc1w_ref, cc1b_ref, cc2w_ref, cc2b_ref,
                  cnoise_ref, aw_ref, ab_ref,
                  occ_loss_ref, catfea_ref, attrpre_ref, cat_ori_ref, cat_mod_ref,
                  *, n_attr):
    # Fused: occW -> occ_classifier -> occ CE   AND   catW + batched attrWs +
    # cat_classifier + cat CE (ori & noise-forward).  Dropouts = identity.
    h = jnp.dot(occ_in_ref[...].astype(jnp.bfloat16), ow_ref[...],
                preferred_element_type=jnp.float32) + ob_ref[...]
    h = jnp.dot(h.astype(jnp.bfloat16), oc1w_ref[...],
                preferred_element_type=jnp.float32) + oc1b_ref[...]
    ologits = jnp.dot(h.astype(jnp.bfloat16), oc2w_ref[...],
                      preferred_element_type=jnp.float32) + oc2b_ref[...]
    occ_loss_ref[...] = _ce_rows(ologits, occ_lab_ref[...])

    xb = cf_ref[...].astype(jnp.bfloat16)                            # (Rp, 2F)
    cat_fea = jnp.dot(xb, cw_ref[...],
                      preferred_element_type=jnp.float32) + cb_ref[...]
    catfea_ref[...] = cat_fea
    for i in range(n_attr):                                          # attr_pre already
        attrpre_ref[i] = jnp.dot(xb, aw_ref[i],                      # in (n_attr,Rp,F)
                                 preferred_element_type=jnp.float32) + ab_ref[i]
    h = jnp.dot(cat_fea.astype(jnp.bfloat16), cc1w_ref[...],
                preferred_element_type=jnp.float32) + cc1b_ref[...]
    clogits = jnp.dot(h.astype(jnp.bfloat16), cc2w_ref[...],
                      preferred_element_type=jnp.float32) + cc2b_ref[...]
    lab = cat_lab_ref[...]
    cat_ori_ref[...] = _ce_rows(clogits, lab)
    # nn.Linear(bias=False) with weight = cat_noise  =>  logits @ cat_noise.T
    mod_logits = jnp.dot(clogits, cnoise_ref[...], preferred_element_type=jnp.float32)
    cat_mod_ref[...] = _ce_rows(mod_logits, lab)


def _attr_head_kernel(x_ref, w1_ref, b1_ref, wc_ref, bc_ref, noise_ref, lab_ref,
                      ori_ref, mod_ref, *, class_nums):
    # All attribute heads (attrW1 -> attr_classifier -> ori/mod CE) in one kernel.
    # Classifier & noise dots run at the lane-padded CLS_PAD width; padded logit
    # columns are masked to -1e9 before the CE (noise rows/cols are zero-padded).
    for i, C in enumerate(class_nums):
        x = x_ref[i].astype(jnp.bfloat16)                            # (Rp, 2F)
        h = jnp.dot(x, w1_ref[i], preferred_element_type=jnp.float32) + b1_ref[i]
        logits = jnp.dot(h.astype(jnp.bfloat16), wc_ref[i],
                         preferred_element_type=jnp.float32) + bc_ref[i]
        col = jax.lax.broadcasted_iota(jnp.int32, logits.shape, 1)
        valid = col < C
        lab = lab_ref[i]
        ori_ref[i] = _ce_rows(jnp.where(valid, logits, -1e9), lab)
        mod_logits = jnp.dot(logits, noise_ref[i],
                             preferred_element_type=jnp.float32)
        mod_ref[i] = _ce_rows(jnp.where(valid, mod_logits, -1e9), lab)


# ----------------------------- Pallas wrappers -----------------------------

def tiled_linear(x, wt, b, *, tk_max=2048):
    """y = x @ wt + b.  K tiled over the grid; x pre-cast bf16; K padded to the tile."""
    M, K = x.shape
    N = wt.shape[1]
    xb = _pad_rows(x.astype(jnp.bfloat16), 8)
    Mp = xb.shape[0]
    tk = min(tk_max, _round_up(K, 256))
    Kp = _round_up(K, tk)
    if Kp != K:
        xb = jnp.pad(xb, ((0, 0), (0, Kp - K)))
        wt = jnp.pad(wt, ((0, Kp - K), (0, 0)))
    y = pl.pallas_call(
        _tiled_linear_kernel,
        out_shape=jax.ShapeDtypeStruct((Mp, N), jnp.float32),
        grid=(Kp // tk,),
        in_specs=[pl.BlockSpec((Mp, tk), lambda k: (0, k)),
                  pl.BlockSpec((tk, N), lambda k: (k, 0)),
                  pl.BlockSpec((1, N), lambda k: (0, 0))],
        out_specs=pl.BlockSpec((Mp, N), lambda k: (0, 0)),
        compiler_params=pltpu.CompilerParams(
            dimension_semantics=("arbitrary",)),
    )(xb, wt, b)
    return y[:M]


def bi_gru(seq, gp, h0=None):
    """Bidirectional GRU (PyTorch layout).  seq: (T, B, I) f32 -> out (T, B, 2H) f32."""
    T, B, I = seq.shape
    H = gp["whh"].shape[1]
    seq_p = _pad_axis(seq.astype(jnp.float32), 1, 8)
    Bp = seq_p.shape[1]
    if h0 is None:
        h0_p = jnp.zeros((2, Bp, H), jnp.float32)
    else:
        h0_p = _pad_axis(h0.astype(jnp.float32), 1, 8)

    out = pl.pallas_call(
        functools.partial(_bigru_kernel, T=T, H=H),
        out_shape=jax.ShapeDtypeStruct((T, Bp, 2 * H), jnp.float32),
        grid=(2,),                                   # direction axis only
        in_specs=[
            pl.BlockSpec((T, Bp, I), lambda d: (0, 0, 0)),        # full sequence
            pl.BlockSpec((1, Bp, H), lambda d: (d, 0, 0)),        # h0 per direction
            pl.BlockSpec((1, I, 3 * H), lambda d: (d, 0, 0)),     # Wih.T
            pl.BlockSpec((1, 1, 3 * H), lambda d: (d, 0, 0)),     # b_ih
            pl.BlockSpec((1, H, 3 * H), lambda d: (d, 0, 0)),     # Whh.T
            pl.BlockSpec((1, 1, 3 * H), lambda d: (d, 0, 0)),     # b_hh
        ],
        # direct lane-dense write into the concatenated (T, Bp, 2H) output
        out_specs=pl.BlockSpec((T, Bp, H), lambda d: (0, 0, d)),
        scratch_shapes=[pltpu.VMEM((T, Bp, 3 * H), jnp.float32)],  # hoisted x @ Wih
        compiler_params=pltpu.CompilerParams(
            dimension_semantics=("parallel",)),
    )(seq_p, h0_p, gp["wih"], gp["bih"], gp["whh"], gp["bhh"])
    return out[:, :B, :]


def text_path(emb_flat, q, B, L):
    return pl.pallas_call(
        functools.partial(_text_kernel, B=B, L=L, Ks=TEXT_KS, Cp=TAP_PAD),
        out_shape=jax.ShapeDtypeStruct((B, FEA), jnp.float32),
        in_specs=[_vspec()] * 5,
        out_specs=_vspec(),
    )(emb_flat.astype(jnp.float32), q["conv_w"], q["conv_b"],
      q["text_w"], q["text_b"])


def heads(occ_in, occ_lab, cf, cat_lab, q, n_attr):
    B = occ_in.shape[0]
    Rp = cf.shape[0]
    return pl.pallas_call(
        functools.partial(_heads_kernel, n_attr=n_attr),
        out_shape=(jax.ShapeDtypeStruct((B, 1), jnp.float32),
                   jax.ShapeDtypeStruct((Rp, FEA), jnp.float32),
                   jax.ShapeDtypeStruct((n_attr, Rp, FEA), jnp.float32),
                   jax.ShapeDtypeStruct((Rp, 1), jnp.float32),
                   jax.ShapeDtypeStruct((Rp, 1), jnp.float32)),
        in_specs=[_vspec()] * 19,
        out_specs=(_vspec(),) * 5,
    )(occ_in.astype(jnp.float32), occ_lab,
      q["occ_w"], q["occ_b"], q["occ_c1_w"], q["occ_c1_b"], q["occ_c2_w"], q["occ_c2_b"],
      cf.astype(jnp.float32), cat_lab,
      q["cat_w"], q["cat_b"], q["cat_c1_w"], q["cat_c1_b"], q["cat_c2_w"], q["cat_c2_b"],
      q["cat_noise_t"], q["attrW_w"], q["attrW_b"])


def attr_heads(x, lab, q, conf):
    n_attr, R, _ = x.shape
    return pl.pallas_call(
        functools.partial(_attr_head_kernel,
                          class_nums=tuple(conf["attr_class_num"])),
        out_shape=(jax.ShapeDtypeStruct((n_attr, R, 1), jnp.float32),
                   jax.ShapeDtypeStruct((n_attr, R, 1), jnp.float32)),
        in_specs=[_vspec()] * 7,
        out_specs=(_vspec(), _vspec()),
    )(x.astype(jnp.float32), q["attr1_w"], q["attr1_b"],
      q["attr_cls_w"], q["attr_cls_b"], q["attr_noise_t"], lab)


# ----------------------------- parameter init -----------------------------

def _init_linear(key, in_dim, out_dim, bias=True):
    k1, k2 = jax.random.split(key)
    s = 1.0 / jnp.sqrt(jnp.float32(in_dim))
    W = jax.random.uniform(k1, (out_dim, in_dim), jnp.float32, -s, s)
    b = jax.random.uniform(k2, (out_dim,), jnp.float32, -s, s) if bias else None
    return {"w": W, "b": b}


def _init_gru(key, in_dim, hid):
    ks = jax.random.split(key, 8)
    s = 1.0 / jnp.sqrt(jnp.float32(hid))

    def u(k, shape):
        return jax.random.uniform(k, shape, jnp.float32, -s, s)

    def direction(k4):
        return {"w_ih": u(k4[0], (3 * hid, in_dim)), "w_hh": u(k4[1], (3 * hid, hid)),
                "b_ih": u(k4[2], (3 * hid,)), "b_hh": u(k4[3], (3 * hid,))}

    return {"fwd": direction(ks[:4]), "bwd": direction(ks[4:])}


def init_params(key, conf, img_flat_dim):
    D = conf["word_embed_size"]
    Ks = list(TEXT_KS)
    Co = TEXT_CO
    keys = iter(jax.random.split(key, 40))
    p = {}
    # TODO(synk): pretrained ResNet18 imageCNN not translated; flatten+linear stand-in.
    p["img_proj"] = _init_linear(next(keys), img_flat_dim, FEA)
    p["visual_context_rnn"] = _init_gru(next(keys), FEA, conf["mid_layer"])
    p["attr_context_rnn"] = _init_gru(next(keys), FEA, conf["mid_layer"])
    occ_ttl = 3 * FEA      # context in ['all', 'visual_cooc']
    cloth_ttl = 2 * FEA
    ctx = FEA
    p["occW"] = _init_linear(next(keys), occ_ttl + ctx, conf["mid_layer"])  # text == 1
    p["occ_cls1"] = _init_linear(next(keys), FEA, conf["mid_layer"])
    p["occ_cls2"] = _init_linear(next(keys), conf["mid_layer"], conf["num_occasion"])
    p["catW"] = _init_linear(next(keys), cloth_ttl, conf["mid_layer"])
    p["cat_cls1"] = _init_linear(next(keys), FEA, conf["mid_layer"])
    p["cat_cls2"] = _init_linear(next(keys), conf["mid_layer"], conf["num_cat"])
    p["embedding"] = 0.1 * jax.random.normal(next(keys), (conf["token_num"], D),
                                             jnp.float32)
    convs = []
    for K in Ks:
        k1, k2 = jax.random.split(next(keys))
        s = 1.0 / jnp.sqrt(jnp.float32(K * D))
        convs.append({"w": jax.random.uniform(k1, (Co, 1, K, D), jnp.float32, -s, s),
                      "b": jax.random.uniform(k2, (Co,), jnp.float32, -s, s)})
    p["convs"] = convs
    p["textW"] = _init_linear(next(keys), len(Ks) * Co, ctx)
    p["attrWs"] = [_init_linear(next(keys), cloth_ttl, conf["mid_layer"])
                   for _ in conf["attr_class_num"]]
    p["attrW1s"] = [_init_linear(next(keys), 2 * conf["mid_layer"], conf["mid_layer"])
                    for _ in conf["attr_class_num"]]
    p["attr_cls"] = [_init_linear(next(keys), conf["mid_layer"], c)
                     for c in conf["attr_class_num"]]
    # row-stochastic noise-transition matrices (as in the spec's noise estimates)
    p["cat_noise"] = jax.nn.softmax(
        jax.random.normal(next(keys), (conf["num_cat"], conf["num_cat"])), axis=-1)
    p["attr_noise"] = [jax.nn.softmax(jax.random.normal(next(keys), (c, c)), axis=-1)
                       for c in conf["attr_class_num"]]
    return p


def prepare_params(p, conf):
    """One-time conversion: pre-transpose / stack / pad / cast weights for the kernels."""
    f32, bf16 = jnp.float32, jnp.bfloat16

    def lin(lp):
        w = jnp.transpose(lp["w"]).astype(bf16)
        b = (jnp.zeros((1, lp["w"].shape[0]), f32) if lp["b"] is None
             else lp["b"].reshape(1, -1).astype(f32))
        return w, b

    def gru_dir(d):
        return (jnp.transpose(d["w_ih"]).astype(bf16),        # (I, 3H)
                d["b_ih"].reshape(1, -1).astype(f32),          # (1, 3H)
                jnp.transpose(d["w_hh"]).astype(bf16),         # (H, 3H)
                d["b_hh"].reshape(1, -1).astype(f32))          # (1, 3H)

    def gru(g):
        fw, bw = gru_dir(g["fwd"]), gru_dir(g["bwd"])
        return {"wih": jnp.stack([fw[0], bw[0]]), "bih": jnp.stack([fw[1], bw[1]]),
                "whh": jnp.stack([fw[2], bw[2]]), "bhh": jnp.stack([fw[3], bw[3]])}

    q = {}
    q["img_w"], q["img_b"] = lin(p["img_proj"])
    q["vis_gru"] = gru(p["visual_context_rnn"])
    q["attr_gru"] = gru(p["attr_context_rnn"])
    q["occ_w"], q["occ_b"] = lin(p["occW"])
    q["occ_c1_w"], q["occ_c1_b"] = lin(p["occ_cls1"])
    q["occ_c2_w"], q["occ_c2_b"] = lin(p["occ_cls2"])
    q["cat_w"], q["cat_b"] = lin(p["catW"])
    q["cat_c1_w"], q["cat_c1_b"] = lin(p["cat_cls1"])
    q["cat_c2_w"], q["cat_c2_b"] = lin(p["cat_cls2"])
    q["cat_noise_t"] = jnp.transpose(p["cat_noise"]).astype(f32)

    # text conv taps: each (D, Co) slab lane-padded to TAP_PAD columns
    D, Co, Cp = conf["word_embed_size"], TEXT_CO, TAP_PAD
    slabs, bvec = [], []
    for K, c in zip(TEXT_KS, p["convs"]):
        wf = c["w"].reshape(Co, K, D)
        for k in range(K):
            slab = jnp.transpose(wf[:, k, :])                        # (D, Co)
            slabs.append(jnp.pad(slab, ((0, 0), (0, Cp - Co))))
        bvec.append(jnp.pad(c["b"].reshape(1, -1), ((0, 0), (0, Cp - Co))))
    q["conv_w"] = jnp.concatenate(slabs, axis=1).astype(bf16)        # (D, n_taps*Cp)
    q["conv_b"] = jnp.concatenate(bvec, axis=1).astype(f32)          # (1, 4*Cp)
    # textW rows re-packed to the padded branch-feature layout (padded rows = 0)
    tw = jnp.transpose(p["textW"]["w"])                              # (4*Co, FEA)
    rows = [jnp.pad(tw[bi * Co:(bi + 1) * Co, :], ((0, Cp - Co), (0, 0)))
            for bi in range(len(TEXT_KS))]
    q["text_w"] = jnp.concatenate(rows, axis=0).astype(bf16)         # (4*Cp, FEA)
    q["text_b"] = p["textW"]["b"].reshape(1, -1).astype(f32)

    # stacked attrWs -> kernel emits attr_pre directly in (n_attr, Rp, F) layout
    q["attrW_w"] = jnp.stack([jnp.transpose(a["w"]) for a in p["attrWs"]]).astype(bf16)
    q["attrW_b"] = jnp.stack([a["b"].reshape(1, -1) for a in p["attrWs"]]).astype(f32)

    # stacked attribute heads, class dims zero-padded to the lane-aligned CLS_PAD
    q["attr1_w"] = jnp.stack([jnp.transpose(a["w"]) for a in p["attrW1s"]]).astype(bf16)
    q["attr1_b"] = jnp.stack([a["b"].reshape(1, -1) for a in p["attrW1s"]]).astype(f32)
    cls_w, cls_b, noise_t = [], [], []
    for a, Tm, C in zip(p["attr_cls"], p["attr_noise"], conf["attr_class_num"]):
        cls_w.append(jnp.pad(jnp.transpose(a["w"]), ((0, 0), (0, CLS_PAD - C))))
        cls_b.append(jnp.pad(a["b"].reshape(1, -1), ((0, 0), (0, CLS_PAD - C))))
        noise_t.append(jnp.pad(jnp.transpose(Tm),
                               ((0, CLS_PAD - C), (0, CLS_PAD - C))))
    q["attr_cls_w"] = jnp.stack(cls_w).astype(bf16)
    q["attr_cls_b"] = jnp.stack(cls_b).astype(f32)
    q["attr_noise_t"] = jnp.stack(noise_t).astype(f32)
    q["embedding"] = p["embedding"].astype(f32)
    return q


# ----------------------------- model forward -----------------------------

def forward(q, conf, whole_img, imgs, occ, attr_val, cats,
            season, age, gender, country, text):
    del season, age, gender, country  # unused by predict(), same as the PyTorch module
    B, N = imgs.shape[0], imgs.shape[1]
    F_ = FEA
    n_attr = len(conf["attr_class_num"])

    # ---- images: whole_img + all cloth imgs in ONE K-tiled matmul (B + B*N rows)
    img_flat = jnp.concatenate(
        [whole_img.reshape(B, -1), imgs.reshape(B * N, -1)], axis=0)
    img_feas = tiled_linear(img_flat, q["img_w"], q["img_b"])        # (B+BN, F)
    whole_img_fea = img_feas[:B]
    cloth_feas_s = img_feas[B:B + B * N].reshape(B, N, F_)

    # ---- text path (embedding gather is glue; convs + textW fused in one kernel)
    emb = q["embedding"][text]                                       # (B, L, D)
    L = emb.shape[1]
    text_fea = text_path(emb.reshape(B * L, -1), q, B, L)            # (B, F)

    # ---- visual context bi-GRU (context in ['all', 'visual_cooc'])
    h0 = jnp.stack([whole_img_fea, whole_img_fea], axis=0)           # (2, B, F)
    cloth_seq = jnp.transpose(cloth_feas_s, (1, 0, 2))               # (N, B, F)
    vis_out = bi_gru(cloth_seq, q["vis_gru"], h0)                    # (N, B, 2F)
    cloth_feas = jnp.transpose(vis_out, (1, 0, 2))                   # (B, N, 2F)
    ctx_f = vis_out[N - 1, :, :F_]                                   # h_n forward
    ctx_b = vis_out[0, :, F_:]                                       # h_n backward

    # ---- fused occ head + cloth head (catW, attrWs, cat classifier, cat CE)
    occ_in = jnp.concatenate([ctx_f, ctx_b, whole_img_fea, text_fea], axis=-1)
    occ_lab = occ.reshape(B, 1).astype(jnp.int32)
    BN = B * N
    cf = _pad_rows(cloth_feas.reshape(BN, 2 * F_))                   # (Rp, 2F)
    cat_lab = _pad_rows(cats.reshape(BN, 1).astype(jnp.int32))
    occ_row, cat_fea, attr_pre, ori_cat, mod_cat = heads(
        occ_in, occ_lab, cf, cat_lab, q, n_attr)
    occ_loss = jnp.sum(occ_row)                                      # reduction='sum'
    cat_losses = [ori_cat[:BN, 0].reshape(B, N), mod_cat[:BN, 0].reshape(B, N)]

    # ---- attribute context bi-GRU over [attrW_0(cloth), ..., attrW_{n-1}, cat_fea]
    attr_seq = jnp.concatenate([attr_pre, cat_fea[None]], axis=0)    # (n_attr+1, Rp, F)
    attr_out = bi_gru(attr_seq, q["attr_gru"], None)                 # (n_attr+1, Rp, 2F)

    # ---- attribute heads + attr CE (ori/forward) for all heads in one kernel
    attr_lab = jnp.transpose(attr_val, (2, 0, 1)).reshape(n_attr, BN, 1).astype(jnp.int32)
    attr_lab = _pad_axis(attr_lab, 1, 8)
    ori_attr, mod_attr = attr_heads(attr_out[:n_attr], attr_lab, q, conf)
    ori_attr = jnp.transpose(ori_attr[:, :BN, 0].reshape(n_attr, B, N), (1, 2, 0))
    mod_attr = jnp.transpose(mod_attr[:, :BN, 0].reshape(n_attr, B, N), (1, 2, 0))
    attr_losses = [ori_attr, mod_attr]
    return occ_loss, cat_losses, attr_losses


# ----------------------------- demo main -----------------------------

if __name__ == "__main__":
    conf = dict(context="all", text=1, noise_cancel_method="forward",
                mid_layer=FEA, num_occasion=6, num_cat=10,
                attr_class_num=[4, 5], token_num=50, word_embed_size=32)
    B, N, C, H, W, L = 2, 3, 3, 16, 16, 8

    key = jax.random.PRNGKey(0)
    kp, k1, k2, k3, k4, k5a, k5b, k6 = jax.random.split(key, 8)
    params = init_params(kp, conf, C * H * W)
    q = prepare_params(params, conf)

    whole_img = jax.random.normal(k1, (B, C, H, W), jnp.float32)
    imgs = jax.random.normal(k2, (B, N, C, H, W), jnp.float32)
    occ = jax.random.randint(k3, (B,), 0, conf["num_occasion"])
    cats = jax.random.randint(k4, (B, N), 0, conf["num_cat"])
    attr_val = jnp.stack(
        [jax.random.randint(k, (B, N), 0, c)
         for k, c in zip([k5a, k5b], conf["attr_class_num"])], axis=-1)
    text = jax.random.randint(k6, (B, L), 0, conf["token_num"])

    @jax.jit
    def run(qq, wi, im, oc, av, ct, tx):
        return forward(qq, conf, wi, im, oc, av, ct, None, None, None, None, tx)

    out = run(q, whole_img, imgs, occ, attr_val, cats, text)
    jax.block_until_ready(out)
    print("KERNEL_OK")
</pallas_src>

<mosaic_0001>
module attributes {stable_mosaic.version = 11 : i64} {
  func.func @_tiled_linear_kernel(%arg0: i32, %arg1: memref<8x768xbf16, #tpu.memory_space<vmem>>, %arg2: memref<768x128xbf16, #tpu.memory_space<vmem>>, %arg3: memref<1x128xf32, #tpu.memory_space<vmem>>, %arg4: memref<8x128xf32, #tpu.memory_space<vmem>>) attributes {dimension_semantics = [#tpu.dimension_semantics<arbitrary>], iteration_bounds = array<i64: 1>, scalar_prefetch = 0 : i64, scratch_operands = 0 : i64, tpu.core_type = #tpu.core_type<tc>, window_params = [{transform_indices = @transform_0, window_bounds = array<i64: 8, 768>}, {transform_indices = @transform_1, window_bounds = array<i64: 768, 128>}, {pipeline_mode = #tpu.pipeline_mode<synchronous>, transform_indices = @transform_2, window_bounds = array<i64: 1, 128>}, {pipeline_mode = #tpu.pipeline_mode<synchronous>, transform_indices = @transform_3, window_bounds = array<i64: 8, 128>}]} {
    %c0_i32 = arith.constant 0 : i32
    %0 = arith.cmpi eq, %arg0, %c0_i32 : i32
    %1 = arith.extui %0 : i1 to i32
    %c0_i32_0 = arith.constant 0 : i32
    %2 = arith.cmpi ne, %1, %c0_i32_0 : i32
    scf.if %2 {
      %cst_10 = arith.constant 0.000000e+00 : f32
      %12 = vector.broadcast %cst_10 : f32 to vector<8x128xf32>
      %c0_11 = arith.constant 0 : index
      %c0_12 = arith.constant 0 : index
      %13 = vector.load %arg4[%c0_11, %c0_12] : memref<8x128xf32, #tpu.memory_space<vmem>>, vector<8x128xf32>
      tpu.vector_store %arg4[%c0_11, %c0_12], %12 {strides = array<i32>} : memref<8x128xf32, #tpu.memory_space<vmem>>, vector<8x128xf32>,
    } else {
    }
    %c0 = arith.constant 0 : index
    %c0_1 = arith.constant 0 : index
    %3 = vector.load %arg4[%c0, %c0_1] : memref<8x128xf32, #tpu.memory_space<vmem>>, vector<8x128xf32>
    %c0_2 = arith.constant 0 : index
    %c0_3 = arith.constant 0 : index
    %4 = vector.load %arg1[%c0_2, %c0_3] : memref<8x768xbf16, #tpu.memory_space<vmem>>, vector<8x768xbf16>
    %c0_4 = arith.constant 0 : index
    %c0_5 = arith.constant 0 : index
    %5 = vector.load %arg2[%c0_4, %c0_5] : memref<768x128xbf16, #tpu.memory_space<vmem>>, vector<768x128xbf16>
    %cst = arith.constant dense<0.000000e+00> : vector<8x128xf32>
    %6 = tpu.matmul %4, %5, %cst {dimension_numbers = #tpu.dot_dimension_numbers<[1], [0], [0], [1], [0, 0, 1, 1], [], []>} : vector<8x768xbf16>, vector<768x128xbf16>, vector<8x128xf32> -> vector<8x128xf32>
    %7 = arith.addf %3, %6 : vector<8x128xf32>
    %c0_6 = arith.constant 0 : index
    %c0_7 = arith.constant 0 : index
    %8 = vector.load %arg4[%c0_6, %c0_7] : memref<8x128xf32, #tpu.memory_space<vmem>>, vector<8x128xf32>
    tpu.vector_store %arg4[%c0_6, %c0_7], %7 {strides = array<i32>} : memref<8x128xf32, #tpu.memory_space<vmem>>, vector<8x128xf32>,
    %c0_i32_8 = arith.constant 0 : i32
    %9 = arith.cmpi eq, %arg0, %c0_i32_8 : i32
    %10 = arith.extui %9 : i1 to i32
    %c0_i32_9 = arith.constant 0 : i32
    %11 = arith.cmpi ne, %10, %c0_i32_9 : i32
    scf.if %11 {
      %c0_10 = arith.constant 0 : index
      %c0_11 = arith.constant 0 : index
      %12 = vector.load %arg4[%c0_10, %c0_11] : memref<8x128xf32, #tpu.memory_space<vmem>>, vector<8x128xf32>
      %c0_12 = arith.constant 0 : index
      %c0_13 = arith.constant 0 : index
      %13 = vector.load %arg3[%c0_12, %c0_13] : memref<1x128xf32, #tpu.memory_space<vmem>>, vector<1x128xf32>
      %14 = vector.broadcast %13 : vector<1x128xf32> to vector<8x128xf32>
      %15 = arith.addf %12, %14 : vector<8x128xf32>
      %c0_14 = arith.constant 0 : index
      %c0_15 = arith.constant 0 : index
      %16 = vector.load %arg4[%c0_14, %c0_15] : memref<8x128xf32, #tpu.memory_space<vmem>>, vector<8x128xf32>
      tpu.vector_store %arg4[%c0_14, %c0_15], %15 {strides = array<i32>} : memref<8x128xf32, #tpu.memory_space<vmem>>, vector<8x128xf32>,
    } else {
    }
    return
  }
  func.func @transform_0(%arg0: i32) -> (i32, i32) {
    %c0_i32 = arith.constant 0 : i32
    %c0_i32_0 = arith.constant 0 : i32
    return %c0_i32, %arg0 : i32, i32
  }
  func.func @transform_1(%arg0: i32) -> (i32, i32) {
    %c0_i32 = arith.constant 0 : i32
    %c0_i32_0 = arith.constant 0 : i32
    return %arg0, %c0_i32 : i32, i32
  }
  func.func @transform_2(%arg0: i32) -> (i32, i32) {
    %c0_i32 = arith.constant 0 : i32
    %c0_i32_0 = arith.constant 0 : i32
    %c0_i32_1 = arith.constant 0 : i32
    return %c0_i32, %c0_i32_0 : i32, i32
  }
  func.func @transform_3(%arg0: i32) -> (i32, i32) {
    %c0_i32 = arith.constant 0 : i32
    %c0_i32_0 = arith.constant 0 : i32
    %c0_i32_1 = arith.constant 0 : i32
    return %c0_i32, %c0_i32_0 : i32, i32
  }
}

module attributes {stable_mosaic.version = 11 : i64} {
  func.func @_bigru_kernel(%arg0: i32, %arg1: memref<3x8x128xf32, #tpu.memory_space<vmem>>, %arg2: memref<1x8x128xf32, #tpu.memory_space<vmem>>, %arg3: memref<1x128x384xbf16, #tpu.memory_space<vmem>>, %arg4: memref<1x1x384xf32, #tpu.memory_space<vmem>>, %arg5: memref<1x128x384xbf16, #tpu.memory_space<vmem>>, %arg6: memref<1x1x384xf32, #tpu.memory_space<vmem>>, %arg7: memref<3x8x128xf32, #tpu.memory_space<vmem>>, %arg8: memref<3x8x384xf32, #tpu.memory_space<vmem>>) attributes {dimension_semantics = [#tpu.dimension_semantics<parallel>], iteration_bounds = array<i64: 2>, scalar_prefetch = 0 : i64, scratch_operands = 1 : i64, tpu.core_type = #tpu.core_type<tc>, window_params = [{pipeline_mode = #tpu.pipeline_mode<synchronous>, transform_indices = @transform_0, window_bounds = array<i64: 3, 8, 128>}, {transform_indices = @transform_1, window_bounds = array<i64: 1, 8, 128>}, {transform_indices = @transform_2, window_bounds = array<i64: 1, 128, 384>}, {transform_indices = @transform_3, window_bounds = array<i64: 1, 1, 384>}, {transform_indices = @transform_4, window_bounds = array<i64: 1, 128, 384>}, {transform_indices = @transform_5, window_bounds = array<i64: 1, 1, 384>}, {transform_indices = @transform_6, window_bounds = array<i64: 3, 8, 128>}]} {
    %c0 = arith.constant 0 : index
    %c0_0 = arith.constant 0 : index
    %c0_1 = arith.constant 0 : index
    %0 = vector.load %arg1[%c0, %c0_0, %c0_1] : memref<3x8x128xf32, #tpu.memory_space<vmem>>, vector<3x8x128xf32>
    %1 = vector.shape_cast %0 : vector<3x8x128xf32> to vector<24x128xf32>
    %2 = arith.truncf %1 : vector<24x128xf32> to vector<24x128xbf16>
    %c0_2 = arith.constant 0 : index
    %c0_3 = arith.constant 0 : index
    %c0_4 = arith.constant 0 : index
    %3 = vector.load %arg3[%c0_2, %c0_3, %c0_4] : memref<1x128x384xbf16, #tpu.memory_space<vmem>>, vector<1x128x384xbf16>
    %4 = vector.shape_cast %3 : vector<1x128x384xbf16> to vector<128x384xbf16>
    %cst = arith.constant dense<0.000000e+00> : vector<24x384xf32>
    %5 = tpu.matmul %2, %4, %cst {dimension_numbers = #tpu.dot_dimension_numbers<[1], [0], [0], [1], [0, 0, 1, 1], [], []>} : vector<24x128xbf16>, vector<128x384xbf16>, vector<24x384xf32> -> vector<24x384xf32>
    %c0_5 = arith.constant 0 : index
    %c0_6 = arith.constant 0 : index
    %c0_7 = arith.constant 0 : index
    %6 = vector.load %arg4[%c0_5, %c0_6, %c0_7] : memref<1x1x384xf32, #tpu.memory_space<vmem>>, vector<1x1x384xf32>
    %7 = vector.shape_cast %6 : vector<1x1x384xf32> to vector<1x384xf32>
    %8 = vector.broadcast %7 : vector<1x384xf32> to vector<24x384xf32>
    %9 = arith.addf %5, %8 : vector<24x384xf32>
    %10 = vector.shape_cast %9 : vector<24x384xf32> to vector<3x8x384xf32>
    %c0_8 = arith.constant 0 : index
    %c0_9 = arith.constant 0 : index
    %c0_10 = arith.constant 0 : index
    %11 = vector.load %arg8[%c0_8, %c0_9, %c0_10] : memref<3x8x384xf32, #tpu.memory_space<vmem>>, vector<3x8x384xf32>
    tpu.vector_store %arg8[%c0_8, %c0_9, %c0_10], %10 {strides = array<i32>} : memref<3x8x384xf32, #tpu.memory_space<vmem>>, vector<3x8x384xf32>,
    %c0_11 = arith.constant 0 : index
    %c0_12 = arith.constant 0 : index
    %c0_13 = arith.constant 0 : index
    %12 = vector.load %arg5[%c0_11, %c0_12, %c0_13] : memref<1x128x384xbf16, #tpu.memory_space<vmem>>, vector<1x128x384xbf16>
    %13 = vector.shape_cast %12 : vector<1x128x384xbf16> to vector<128x384xbf16>
    %c0_14 = arith.constant 0 : index
    %c0_15 = arith.constant 0 : index
    %c0_16 = arith.constant 0 : index
    %14 = vector.load %arg6[%c0_14, %c0_15, %c0_16] : memref<1x1x384xf32, #tpu.memory_space<vmem>>, vector<1x1x384xf32>
    %15 = vector.shape_cast %14 : vector<1x1x384xf32> to vector<1x384xf32>
    %c0_17 = arith.constant 0 : index
    %c0_18 = arith.constant 0 : index
    %c0_19 = arith.constant 0 : index
    %16 = vector.load %arg2[%c0_17, %c0_18, %c0_19] : memref<1x8x128xf32, #tpu.memory_space<vmem>>, vector<1x8x128xf32>
    %17 = vector.shape_cast %16 : vector<1x8x128xf32> to vector<8x128xf32>
    %c0_i32 = arith.constant 0 : i32
    %c0_i32_20 = arith.constant 0 : i32
    %18 = arith.cmpi eq, %arg0, %c0_i32_20 : i32
    %c2_i32 = arith.constant 2 : i32
    %19 = arith.subi %c2_i32, %c0_i32 : i32
    %20 = arith.select %18, %c0_i32, %19 : i32
    %21 = arith.index_cast %20 : i32 to index
    %c0_21 = arith.constant 0 : index
    %c0_22 = arith.constant 0 : index
    %22 = vector.load %arg8[%21, %c0_21, %c0_22] : memref<3x8x384xf32, #tpu.memory_space<vmem>>, vector<1x8x384xf32>
    %23 = vector.shape_cast %22 : vector<1x8x384xf32> to vector<8x384xf32>
    %24 = arith.truncf %17 : vector<8x128xf32> to vector<8x128xbf16>
    %cst_23 = arith.constant dense<0.000000e+00> : vector<8x384xf32>
    %25 = tpu.matmul %24, %13, %cst_23 {dimension_numbers = #tpu.dot_dimension_numbers<[1], [0], [0], [1], [0, 0, 1, 1], [], []>} : vector<8x128xbf16>, vector<128x384xbf16>, vector<8x384xf32> -> vector<8x384xf32>
    %26 = vector.broadcast %15 : vector<1x384xf32> to vector<8x384xf32>
    %27 = arith.addf %25, %26 : vector<8x384xf32>
    %28 = vector.extract_strided_slice %23 {offsets = [0, 0], sizes = [8, 128], strides = [1, 1]} : vector<8x384xf32> to vector<8x128xf32>
    %29 = vector.extract_strided_slice %27 {offsets = [0, 0], sizes = [8, 128], strides = [1, 1]} : vector<8x384xf32> to vector<8x128xf32>
    %30 = arith.addf %28, %29 : vector<8x128xf32>
    %31 = arith.negf %30 : vector<8x128xf32>
    %32 = math.exp %31 : vector<8x128xf32>
    %cst_24 = arith.constant 1.000000e+00 : f32
    %33 = vector.broadcast %cst_24 : f32 to vector<8x128xf32>
    %34 = arith.addf %33, %32 : vector<8x128xf32>
    %35 = arith.divf %33, %34 : vector<8x128xf32>
    %36 = vector.extract_strided_slice %23 {offsets = [0, 128], sizes = [8, 128], strides = [1, 1]} : vector<8x384xf32> to vector<8x128xf32>
    %37 = vector.extract_strided_slice %27 {offsets = [0, 128], sizes = [8, 128], strides = [1, 1]} : vector<8x384xf32> to vector<8x128xf32>
    %38 = arith.addf %36, %37 : vector<8x128xf32>
    %39 = arith.negf %38 : vector<8x128xf32>
    %40 = math.exp %39 : vector<8x128xf32>
    %cst_25 = arith.constant 1.000000e+00 : f32
    %41 = vector.broadcast %cst_25 : f32 to vector<8x128xf32>
    %42 = arith.addf %41, %40 : vector<8x128xf32>
    %43 = arith.divf %41, %42 : vector<8x128xf32>
    %44 = vector.extract_strided_slice %23 {offsets = [0, 256], sizes = [8, 128], strides = [1, 1]} : vector<8x384xf32> to vector<8x128xf32>
    %45 = vector.extract_strided_slice %27 {offsets = [0, 256], sizes = [8, 128], strides = [1, 1]} : vector<8x384xf32> to vector<8x128xf32>
    %46 = arith.mulf %35, %45 : vector<8x128xf32>
    %47 = arith.addf %44, %46 : vector<8x128xf32>
    %48 = math.tanh %47 : vector<8x128xf32>
    %cst_26 = arith.constant 1.000000e+00 : f32
    %49 = vector.broadcast %cst_26 : f32 to vector<8x128xf32>
    %50 = arith.subf %49, %43 : vector<8x128xf32>
    %51 = arith.mulf %50, %48 : vector<8x128xf32>
    %52 = arith.mulf %43, %17 : vector<8x128xf32>
    %53 = arith.addf %51, %52 : vector<8x128xf32>
    %54 = arith.index_cast %20 : i32 to index
    %c0_27 = arith.constant 0 : index
    %c0_28 = arith.constant 0 : index
    %55 = vector.load %arg7[%54, %c0_27, %c0_28] : memref<3x8x128xf32, #tpu.memory_space<vmem>>, vector<1x8x128xf32>
    %56 = vector.shape_cast %55 : vector<1x8x128xf32> to vector<8x128xf32>
    %57 = vector.shape_cast %53 : vector<8x128xf32> to vector<1x8x128xf32>
    tpu.vector_store %arg7[%54, %c0_27, %c0_28], %57 {strides = array<i32>} : memref<3x8x128xf32, #tpu.memory_space<vmem>>, vector<1x8x128xf32>,
    %c1_i32 = arith.constant 1 : i32
    %c0_i32_29 = arith.constant 0 : i32
    %58 = arith.cmpi eq, %arg0, %c0_i32_29 : i32
    %c2_i32_30 = arith.constant 2 : i32
    %59 = arith.subi %c2_i32_30, %c1_i32 : i32
    %60 = arith.select %58, %c1_i32, %59 : i32
    %61 = arith.index_cast %60 : i32 to index
    %c0_31 = arith.constant 0 : index
    %c0_32 = arith.constant 0 : index
    %62 = vector.load %arg8[%61, %c0_31, %c0_32] : memref<3x8x384xf32, #tpu.memory_space<vmem>>, vector<1x8x384xf32>
    %63 = vector.shape_cast %62 : vector<1x8x384xf32> to vector<8x384xf32>
    %64 = arith.truncf %53 : vector<8x128xf32> to vector<8x128xbf16>
    %cst_33 = arith.constant dense<0.000000e+00> : vector<8x384xf32>
    %65 = tpu.matmul %64, %13, %cst_33 {dimension_numbers = #tpu.dot_dimension_numbers<[1], [0], [0], [1], [0, 0, 1, 1], [], []>} : vector<8x128xbf16>, vector<128x384xbf16>, vector<8x384xf32> -> vector<8x384xf32>
    %66 = vector.broadcast %15 : vector<1x384xf32> to vector<8x384xf32>
    %67 = arith.addf %65, %66 : vector<8x384xf32>
    %68 = vector.extract_strided_slice %63 {offsets = [0, 0], sizes = [8, 128], strides = [1, 1]} : vector<8x384xf32> to vector<8x128xf32>
    %69 = vector.extract_strided_slice %67 {offsets = [0, 0], sizes = [8, 128], strides = [1, 1]} : vector<8x384xf32> to vector<8x128xf32>
    %70 = arith.addf %68, %69 : vector<8x128xf32>
    %71 = arith.negf %70 : vector<8x128xf32>
    %72 = math.exp %71 : vector<8x128xf32>
    %cst_34 = arith.constant 1.000000e+00 : f32
    %73 = vector.broadcast %cst_34 : f32 to vector<8x128xf32>
    %74 = arith.addf %73, %72 : vector<8x128xf32>
    %75 = arith.divf %73, %74 : vector<8x128xf32>
    %76 = vector.extract_strided_slice %63 {offsets = [0, 128], sizes = [8, 128], strides = [1, 1]} : vector<8x384xf32> to vector<8x128xf32>
    %77 = vector.extract_strided_slice %67 {offsets = [0, 128], sizes = [8, 128], strides = [1, 1]} : vector<8x384xf32> to vector<8x128xf32>
    %78 = arith.addf %76, %77 : vector<8x128xf32>
    %79 = arith.negf %78 : vector<8x128xf32>
    %80 = math.exp %79 : vector<8x128xf32>
    %cst_35 = arith.constant 1.000000e+00 : f32
    %81 = vector.broadcast %cst_35 : f32 to vector<8x128xf32>
    %82 = arith.addf %81, %80 : vector<8x128xf32>
    %83 = arith.divf %81, %82 : vector<8x128xf32>
    %84 = vector.extract_strided_slice %63 {offsets = [0, 256], sizes = [8, 128], strides = [1, 1]} : vector<8x384xf32> to vector<8x128xf32>
    %85 = vector.extract_strided_slice %67 {offsets = [0, 256], sizes = [8, 128], strides = [1, 1]} : vector<8x384xf32> to vector<8x128xf32>
    %86 = arith.mulf %75, %85 : vector<8x128xf32>
    %87 = arith.addf %84, %86 : vector<8x128xf32>
    %88 = math.tanh %87 : vector<8x128xf32>
    %cst_36 = arith.constant 1.000000e+00 : f32
    %89 = vector.broadcast %cst_36 : f32 to vector<8x128xf32>
    %90 = arith.subf %89, %83 : vector<8x128xf32>
    %91 = arith.mulf %90, %88 : vector<8x128xf32>
    %92 = arith.mulf %83, %53 : vector<8x128xf32>
    %93 = arith.addf %91, %92 : vector<8x128xf32>
    %94 = arith.index_cast %60 : i32 to index
    %c0_37 = arith.constant 0 : index
    %c0_38 = arith.constant 0 : index
    %95 = vector.load %arg7[%94, %c0_37, %c0_38] : memref<3x8x128xf32, #tpu.memory_space<vmem>>, vector<1x8x128xf32>
    %96 = vector.shape_cast %95 : vector<1x8x128xf32> to vector<8x128xf32>
    %97 = vector.shape_cast %93 : vector<8x128xf32> to vector<1x8x128xf32>
    tpu.vector_store %arg7[%94, %c0_37, %c0_38], %97 {strides = array<i32>} : memref<3x8x128xf32, #tpu.memory_space<vmem>>, vector<1x8x128xf32>,
    %c2_i32_39 = arith.constant 2 : i32
    %c0_i32_40 = arith.constant 0 : i32
    %98 = arith.cmpi eq, %arg0, %c0_i32_40 : i32
    %c2_i32_41 = arith.constant 2 : i32
    %99 = arith.subi %c2_i32_41, %c2_i32_39 : i32
    %100 = arith.select %98, %c2_i32_39, %99 : i32
    %101 = arith.index_cast %100 : i32 to index
    %c0_42 = arith.constant 0 : index
    %c0_43 = arith.constant 0 : index
    %102 = vector.load %arg8[%101, %c0_42, %c0_43] : memref<3x8x384xf32, #tpu.memory_space<vmem>>, vector<1x8x384xf32>
    %103 = vector.shape_cast %102 : vector<1x8x384xf32> to vector<8x384xf32>
    %104 = arith.truncf %93 : vector<8x128xf32> to vector<8x128xbf16>
    %cst_44 = arith.constant dense<0.000000e+00> : vector<8x384xf32>
    %105 = tpu.matmul %104, %13, %cst_44 {dimension_numbers = #tpu.dot_dimension_numbers<[1], [0], [0], [1], [0, 0, 1, 1], [], []>} : vector<8x128xbf16>, vector<128x384xbf16>, vector<8x384xf32> -> vector<8x384xf32>
    %106 = vector.broadcast %15 : vector<1x384xf32> to vector<8x384xf32>
    %107 = arith.addf %105, %106 : vector<8x384xf32>
    %108 = vector.extract_strided_slice %103 {offsets = [0, 0], sizes = [8, 128], strides = [1, 1]} : vector<8x384xf32> to vector<8x128xf32>
    %109 = vector.extract_strided_slice %107 {offsets = [0, 0], sizes = [8, 128], strides = [1, 1]} : vector<8x384xf32> to vector<8x128xf32>
    %110 = arith.addf %108, %109 : vector<8x128xf32>
    %111 = arith.negf %110 : vector<8x128xf32>
    %112 = math.exp %111 : vector<8x128xf32>
    %cst_45 = arith.constant 1.000000e+00 : f32
    %113 = vector.broadcast %cst_45 : f32 to vector<8x128xf32>
    %114 = arith.addf %113, %112 : vector<8x128xf32>
    %115 = arith.divf %113, %114 : vector<8x128xf32>
    %116 = vector.extract_strided_slice %103 {offsets = [0, 128], sizes = [8, 128], strides = [1, 1]} : vector<8x384xf32> to vector<8x128xf32>
    %117 = vector.extract_strided_slice %107 {offsets = [0, 128], sizes = [8, 128], strides = [1, 1]} : vector<8x384xf32> to vector<8x128xf32>
    %118 = arith.addf %116, %117 : vector<8x128xf32>
    %119 = arith.negf %118 : vector<8x128xf32>
    %120 = math.exp %119 : vector<8x128xf32>
    %cst_46 = arith.constant 1.000000e+00 : f32
    %121 = vector.broadcast %cst_46 : f32 to vector<8x128xf32>
    %122 = arith.addf %121, %120 : vector<8x128xf32>
    %123 = arith.divf %121, %122 : vector<8x128xf32>
    %124 = vector.extract_strided_slice %103 {offsets = [0, 256], sizes = [8, 128], strides = [1, 1]} : vector<8x384xf32> to vector<8x128xf32>
    %125 = vector.extract_strided_slice %107 {offsets = [0, 256], sizes = [8, 128], strides = [1, 1]} : vector<8x384xf32> to vector<8x128xf32>
    %126 = arith.mulf %115, %125 : vector<8x128xf32>
    %127 = arith.addf %124, %126 : vector<8x128xf32>
    %128 = math.tanh %127 : vector<8x128xf32>
    %cst_47 = arith.constant 1.000000e+00 : f32
    %129 = vector.broadcast %cst_47 : f32 to vector<8x128xf32>
    %130 = arith.subf %129, %123 : vector<8x128xf32>
    %131 = arith.mulf %130, %128 : vector<8x128xf32>
    %132 = arith.mulf %123, %93 : vector<8x128xf32>
    %133 = arith.addf %131, %132 : vector<8x128xf32>
    %134 = arith.index_cast %100 : i32 to index
    %c0_48 = arith.constant 0 : index
    %c0_49 = arith.constant 0 : index
    %135 = vector.load %arg7[%134, %c0_48, %c0_49] : memref<3x8x128xf32, #tpu.memory_space<vmem>>, vector<1x8x128xf32>
    %136 = vector.shape_cast %135 : vector<1x8x128xf32> to vector<8x128xf32>
    %137 = vector.shape_cast %133 : vector<8x128xf32> to vector<1x8x128xf32>
    tpu.vector_store %arg7[%134, %c0_48, %c0_49], %137 {strides = array<i32>} : memref<3x8x128xf32, #tpu.memory_space<vmem>>, vector<1x8x128xf32>,
    %c3_i32 = arith.constant 3 : i32
    return
  }
  func.func @transform_0(%arg0: i32) -> (i32, i32, i32) {
    %c0_i32 = arith.constant 0 : i32
    %c0_i32_0 = arith.constant 0 : i32
    %c0_i32_1 = arith.constant 0 : i32
    %c0_i32_2 = arith.constant 0 : i32
    return %c0_i32, %c0_i32_0, %c0_i32_1 : i32, i32, i32
  }
  func.func @transform_1(%arg0: i32) -> (i32, i32, i32) {
    %c0_i32 = arith.constant 0 : i32
    %c0_i32_0 = arith.constant 0 : i32
    %c0_i32_1 = arith.constant 0 : i32
    return %arg0, %c0_i32, %c0_i32_0 : i32, i32, i32
  }
  func.func @transform_2(%arg0: i32) -> (i32, i32, i32) {
    %c0_i32 = arith.constant 0 : i32
    %c0_i32_0 = arith.constant 0 : i32
    %c0_i32_1 = arith.constant 0 : i32
    return %arg0, %c0_i32, %c0_i32_0 : i32, i32, i32
  }
  func.func @transform_3(%arg0: i32) -> (i32, i32, i32) {
    %c0_i32 = arith.constant 0 : i32
    %c0_i32_0 = arith.constant 0 : i32
    %c0_i32_1 = arith.constant 0 : i32
    return %arg0, %c0_i32, %c0_i32_0 : i32, i32, i32
  }
  func.func @transform_4(%arg0: i32) -> (i32, i32, i32) {
    %c0_i32 = arith.constant 0 : i32
    %c0_i32_0 = arith.constant 0 : i32
    %c0_i32_1 = arith.constant 0 : i32
    return %arg0, %c0_i32, %c0_i32_0 : i32, i32, i32
  }
  func.func @transform_5(%arg0: i32) -> (i32, i32, i32) {
    %c0_i32 = arith.constant 0 : i32
    %c0_i32_0 = arith.constant 0 : i32
    %c0_i32_1 = arith.constant 0 : i32
    return %arg0, %c0_i32, %c0_i32_0 : i32, i32, i32
  }
  func.func @transform_6(%arg0: i32) -> (i32, i32, i32) {
    %c0_i32 = arith.constant 0 : i32
    %c0_i32_0 = arith.constant 0 : i32
    %c0_i32_1 = arith.constant 0 : i32
    return %c0_i32, %c0_i32_0, %arg0 : i32, i32, i32
  }
}

module attributes {stable_mosaic.version = 11 : i64} {
  func.func @_text_kernel(%arg0: memref<16x32xf32, #tpu.memory_space<vmem>>, %arg1: memref<32x1792xbf16, #tpu.memory_space<vmem>>, %arg2: memref<1x512xf32, #tpu.memory_space<vmem>>, %arg3: memref<512x128xbf16, #tpu.memory_space<vmem>>, %arg4: memref<1x128xf32, #tpu.memory_space<vmem>>, %arg5: memref<2x128xf32, #tpu.memory_space<vmem>>) attributes {dimension_semantics = [], scalar_prefetch = 0 : i64, scratch_operands = 0 : i64, tpu.core_type = #tpu.core_type<tc>} {
    %c0 = arith.constant 0 : index
    %c0_0 = arith.constant 0 : index
    %0 = vector.load %arg0[%c0, %c0_0] : memref<16x32xf32, #tpu.memory_space<vmem>>, vector<16x32xf32>
    %1 = arith.truncf %0 : vector<16x32xf32> to vector<16x32xbf16>
    %c0_1 = arith.constant 0 : index
    %c0_2 = arith.constant 0 : index
    %2 = vector.load %arg1[%c0_1, %c0_2] : memref<32x1792xbf16, #tpu.memory_space<vmem>>, vector<32x1792xbf16>
    %cst = arith.constant dense<0.000000e+00> : vector<16x1792xf32>
    %3 = tpu.matmul %1, %2, %cst {dimension_numbers = #tpu.dot_dimension_numbers<[1], [0], [0], [1], [0, 0, 1, 1], [], []>} : vector<16x32xbf16>, vector<32x1792xbf16>, vector<16x1792xf32> -> vector<16x1792xf32>
    %4 = vector.shape_cast %3 : vector<16x1792xf32> to vector<2x8x1792xf32>
    %cst_3 = arith.constant 0.000000e+00 : f32
    %5 = vector.broadcast %cst_3 : f32 to vector<2x7x128xf32>
    %6 = vector.extract_strided_slice %4 {offsets = [0, 0, 0], sizes = [2, 7, 128], strides = [1, 1, 1]} : vector<2x8x1792xf32> to vector<2x7x128xf32>
    %7 = arith.addf %5, %6 : vector<2x7x128xf32>
    %8 = vector.extract_strided_slice %4 {offsets = [0, 1, 128], sizes = [2, 7, 128], strides = [1, 1, 1]} : vector<2x8x1792xf32> to vector<2x7x128xf32>
    %9 = arith.addf %7, %8 : vector<2x7x128xf32>
    %c0_4 = arith.constant 0 : index
    %c0_5 = arith.constant 0 : index
    %10 = vector.load %arg2[%c0_4, %c0_5] : memref<1x512xf32, #tpu.memory_space<vmem>>, vector<1x128xf32>
    %11 = vector.shape_cast %10 : vector<1x128xf32> to vector<1x1x128xf32>
    %12 = vector.broadcast %11 : vector<1x1x128xf32> to vector<2x7x128xf32>
    %13 = arith.addf %9, %12 : vector<2x7x128xf32>
    %cst_6 = arith.constant 0.000000e+00 : f32
    %14 = vector.broadcast %cst_6 : f32 to vector<2x7x128xf32>
    %15 = arith.maximumf %13, %14 : vector<2x7x128xf32>
    %cst_7 = arith.constant dense<0xFF800000> : vector<2x128xf32>
    %16 = vector.multi_reduction <maximumf>, %15, %cst_7 [1] : vector<2x7x128xf32> to vector<2x128xf32>
    %cst_8 = arith.constant 0.000000e+00 : f32
    %17 = vector.broadcast %cst_8 : f32 to vector<2x6x128xf32>
    %18 = vector.extract_strided_slice %4 {offsets = [0, 0, 256], sizes = [2, 6, 128], strides = [1, 1, 1]} : vector<2x8x1792xf32> to vector<2x6x128xf32>
    %19 = arith.addf %17, %18 : vector<2x6x128xf32>
    %20 = vector.extract_strided_slice %4 {offsets = [0, 1, 384], sizes = [2, 6, 128], strides = [1, 1, 1]} : vector<2x8x1792xf32> to vector<2x6x128xf32>
    %21 = arith.addf %19, %20 : vector<2x6x128xf32>
    %22 = vector.extract_strided_slice %4 {offsets = [0, 2, 512], sizes = [2, 6, 128], strides = [1, 1, 1]} : vector<2x8x1792xf32> to vector<2x6x128xf32>
    %23 = arith.addf %21, %22 : vector<2x6x128xf32>
    %c0_9 = arith.constant 0 : index
    %c128 = arith.constant 128 : index
    %24 = vector.load %arg2[%c0_9, %c128] : memref<1x512xf32, #tpu.memory_space<vmem>>, vector<1x128xf32>
    %25 = vector.shape_cast %24 : vector<1x128xf32> to vector<1x1x128xf32>
    %26 = vector.broadcast %25 : vector<1x1x128xf32> to vector<2x6x128xf32>
    %27 = arith.addf %23, %26 : vector<2x6x128xf32>
    %cst_10 = arith.constant 0.000000e+00 : f32
    %28 = vector.broadcast %cst_10 : f32 to vector<2x6x128xf32>
    %29 = arith.maximumf %27, %28 : vector<2x6x128xf32>
    %cst_11 = arith.constant dense<0xFF800000> : vector<2x128xf32>
    %30 = vector.multi_reduction <maximumf>, %29, %cst_11 [1] : vector<2x6x128xf32> to vector<2x128xf32>
    %cst_12 = arith.constant 0.000000e+00 : f32
    %31 = vector.broadcast %cst_12 : f32 to vector<2x5x128xf32>
    %32 = vector.extract_strided_slice %4 {offsets = [0, 0, 640], sizes = [2, 5, 128], strides = [1, 1, 1]} : vector<2x8x1792xf32> to vector<2x5x128xf32>
    %33 = arith.addf %31, %32 : vector<2x5x128xf32>
    %34 = vector.extract_strided_slice %4 {offsets = [0, 1, 768], sizes = [2, 5, 128], strides = [1, 1, 1]} : vector<2x8x1792xf32> to vector<2x5x128xf32>
    %35 = arith.addf %33, %34 : vector<2x5x128xf32>
    %36 = vector.extract_strided_slice %4 {offsets = [0, 2, 896], sizes = [2, 5, 128], strides = [1, 1, 1]} : vector<2x8x1792xf32> to vector<2x5x128xf32>
    %37 = arith.addf %35, %36 : vector<2x5x128xf32>
    %38 = vector.extract_strided_slice %4 {offsets = [0, 3, 1024], sizes = [2, 5, 128], strides = [1, 1, 1]} : vector<2x8x1792xf32> to vector<2x5x128xf32>
    %39 = arith.addf %37, %38 : vector<2x5x128xf32>
    %c0_13 = arith.constant 0 : index
    %c256 = arith.constant 256 : index
    %40 = vector.load %arg2[%c0_13, %c256] : memref<1x512xf32, #tpu.memory_space<vmem>>, vector<1x128xf32>
    %41 = vector.shape_cast %40 : vector<1x128xf32> to vector<1x1x128xf32>
    %42 = vector.broadcast %41 : vector<1x1x128xf32> to vector<2x5x128xf32>
    %43 = arith.addf %39, %42 : vector<2x5x128xf32>
    %cst_14 = arith.constant 0.000000e+00 : f32
    %44 = vector.broadcast %cst_14 : f32 to vector<2x5x128xf32>
    %45 = arith.maximumf %43, %44 : vector<2x5x128xf32>
    %cst_15 = arith.constant dense<0xFF800000> : vector<2x128xf32>
    %46 = vector.multi_reduction <maximumf>, %45, %cst_15 [1] : vector<2x5x128xf32> to vector<2x128xf32>
    %cst_16 = arith.constant 0.000000e+00 : f32
    %47 = vector.broadcast %cst_16 : f32 to vector<2x4x128xf32>
    %48 = vector.extract_strided_slice %4 {offsets = [0, 0, 1152], sizes = [2, 4, 128], strides = [1, 1, 1]} : vector<2x8x1792xf32> to vector<2x4x128xf32>
    %49 = arith.addf %47, %48 : vector<2x4x128xf32>
    %50 = vector.extract_strided_slice %4 {offsets = [0, 1, 1280], sizes = [2, 4, 128], strides = [1, 1, 1]} : vector<2x8x1792xf32> to vector<2x4x128xf32>
    %51 = arith.addf %49, %50 : vector<2x4x128xf32>
    %52 = vector.extract_strided_slice %4 {offsets = [0, 2, 1408], sizes = [2, 4, 128], strides = [1, 1, 1]} : vector<2x8x1792xf32> to vector<2x4x128xf32>
    %53 = arith.addf %51, %52 : vector<2x4x128xf32>
    %54 = vector.extract_strided_slice %4 {offsets = [0, 3, 1536], sizes = [2, 4, 128], strides = [1, 1, 1]} : vector<2x8x1792xf32> to vector<2x4x128xf32>
    %55 = arith.addf %53, %54 : vector<2x4x128xf32>
    %56 = vector.extract_strided_slice %4 {offsets = [0, 4, 1664], sizes = [2, 4, 128], strides = [1, 1, 1]} : vector<2x8x1792xf32> to vector<2x4x128xf32>
    %57 = arith.addf %55, %56 : vector<2x4x128xf32>
    %c0_17 = arith.constant 0 : index
    %c384 = arith.constant 384 : index
    %58 = vector.load %arg2[%c0_17, %c384] : memref<1x512xf32, #tpu.memory_space<vmem>>, vector<1x128xf32>
    %59 = vector.shape_cast %58 : vector<1x128xf32> to vector<1x1x128xf32>
    %60 = vector.broadcast %59 : vector<1x1x128xf32> to vector<2x4x128xf32>
    %61 = arith.addf %57, %60 : vector<2x4x128xf32>
    %cst_18 = arith.constant 0.000000e+00 : f32
    %62 = vector.broadcast %cst_18 : f32 to vector<2x4x128xf32>
    %63 = arith.maximumf %61, %62 : vector<2x4x128xf32>
    %cst_19 = arith.constant dense<0xFF800000> : vector<2x128xf32>
    %64 = vector.multi_reduction <maximumf>, %63, %cst_19 [1] : vector<2x4x128xf32> to vector<2x128xf32>
    %65 = tpu.concatenate %16, %30, %46, %64 in 1 : vector<2x128xf32>, vector<2x128xf32>, vector<2x128xf32>, vector<2x128xf32> -> vector<2x512xf32>
    %66 = arith.truncf %65 : vector<2x512xf32> to vector<2x512xbf16>
    %c0_20 = arith.constant 0 : index
    %c0_21 = arith.constant 0 : index
    %67 = vector.load %arg3[%c0_20, %c0_21] : memref<512x128xbf16, #tpu.memory_space<vmem>>, vector<512x128xbf16>
    %cst_22 = arith.constant dense<0.000000e+00> : vector<2x128xf32>
    %68 = tpu.matmul %66, %67, %cst_22 {dimension_numbers = #tpu.dot_dimension_numbers<[1], [0], [0], [1], [0, 0, 1, 1], [], []>} : vector<2x512xbf16>, vector<512x128xbf16>, vector<2x128xf32> -> vector<2x128xf32>
    %c0_23 = arith.constant 0 : index
    %c0_24 = arith.constant 0 : index
    %69 = vector.load %arg4[%c0_23, %c0_24] : memref<1x128xf32, #tpu.memory_space<vmem>>, vector<1x128xf32>
    %70 = vector.broadcast %69 : vector<1x128xf32> to vector<2x128xf32>
    %71 = arith.addf %68, %70 : vector<2x128xf32>
    %c0_25 = arith.constant 0 : index
    %c0_26 = arith.constant 0 : index
    %72 = vector.load %arg5[%c0_25, %c0_26] : memref<2x128xf32, #tpu.memory_space<vmem>>, vector<2x128xf32>
    tpu.vector_store %arg5[%c0_25, %c0_26], %71 {strides = array<i32>} : memref<2x128xf32, #tpu.memory_space<vmem>>, vector<2x128xf32>,
    return
  }
}

module attributes {stable_mosaic.version = 11 : i64} {
  func.func @_heads_kernel(%arg0: memref<2x512xf32, #tpu.memory_space<vmem>>, %arg1: memref<2x1xi32, #tpu.memory_space<vmem>>, %arg2: memref<512x128xbf16, #tpu.memory_space<vmem>>, %arg3: memref<1x128xf32, #tpu.memory_space<vmem>>, %arg4: memref<128x128xbf16, #tpu.memory_space<vmem>>, %arg5: memref<1x128xf32, #tpu.memory_space<vmem>>, %arg6: memref<128x6xbf16, #tpu.memory_space<vmem>>, %arg7: memref<1x6xf32, #tpu.memory_space<vmem>>, %arg8: memref<8x256xf32, #tpu.memory_space<vmem>>, %arg9: memref<8x1xi32, #tpu.memory_space<vmem>>, %arg10: memref<256x128xbf16, #tpu.memory_space<vmem>>, %arg11: memref<1x128xf32, #tpu.memory_space<vmem>>, %arg12: memref<128x128xbf16, #tpu.memory_space<vmem>>, %arg13: memref<1x128xf32, #tpu.memory_space<vmem>>, %arg14: memref<128x10xbf16, #tpu.memory_space<vmem>>, %arg15: memref<1x10xf32, #tpu.memory_space<vmem>>, %arg16: memref<10x10xf32, #tpu.memory_space<vmem>>, %arg17: memref<2x256x128xbf16, #tpu.memory_space<vmem>>, %arg18: memref<2x1x128xf32, #tpu.memory_space<vmem>>, %arg19: memref<2x1xf32, #tpu.memory_space<vmem>>, %arg20: memref<8x128xf32, #tpu.memory_space<vmem>>, %arg21: memref<2x8x128xf32, #tpu.memory_space<vmem>>, %arg22: memref<8x1xf32, #tpu.memory_space<vmem>>, %arg23: memref<8x1xf32, #tpu.memory_space<vmem>>) attributes {dimension_semantics = [], scalar_prefetch = 0 : i64, scratch_operands = 0 : i64, tpu.core_type = #tpu.core_type<tc>} {
    %c0 = arith.constant 0 : index
    %c0_0 = arith.constant 0 : index
    %0 = vector.load %arg0[%c0, %c0_0] : memref<2x512xf32, #tpu.memory_space<vmem>>, vector<2x512xf32>
    %1 = arith.truncf %0 : vector<2x512xf32> to vector<2x512xbf16>
    %c0_1 = arith.constant 0 : index
    %c0_2 = arith.constant 0 : index
    %2 = vector.load %arg2[%c0_1, %c0_2] : memref<512x128xbf16, #tpu.memory_space<vmem>>, vector<512x128xbf16>
    %cst = arith.constant dense<0.000000e+00> : vector<2x128xf32>
    %3 = tpu.matmul %1, %2, %cst {dimension_numbers = #tpu.dot_dimension_numbers<[1], [0], [0], [1], [0, 0, 1, 1], [], []>} : vector<2x512xbf16>, vector<512x128xbf16>, vector<2x128xf32> -> vector<2x128xf32>
    %c0_3 = arith.constant 0 : index
    %c0_4 = arith.constant 0 : index
    %4 = vector.load %arg3[%c0_3, %c0_4] : memref<1x128xf32, #tpu.memory_space<vmem>>, vector<1x128xf32>
    %5 = vector.broadcast %4 : vector<1x128xf32> to vector<2x128xf32>
    %6 = arith.addf %3, %5 : vector<2x128xf32>
    %7 = arith.truncf %6 : vector<2x128xf32> to vector<2x128xbf16>
    %c0_5 = arith.constant 0 : index
    %c0_6 = arith.constant 0 : index
    %8 = vector.load %arg4[%c0_5, %c0_6] : memref<128x128xbf16, #tpu.memory_space<vmem>>, vector<128x128xbf16>
    %cst_7 = arith.constant dense<0.000000e+00> : vector<2x128xf32>
    %9 = tpu.matmul %7, %8, %cst_7 {dimension_numbers = #tpu.dot_dimension_numbers<[1], [0], [0], [1], [0, 0, 1, 1], [], []>} : vector<2x128xbf16>, vector<128x128xbf16>, vector<2x128xf32> -> vector<2x128xf32>
    %c0_8 = arith.constant 0 : index
    %c0_9 = arith.constant 0 : index
    %10 = vector.load %arg5[%c0_8, %c0_9] : memref<1x128xf32, #tpu.memory_space<vmem>>, vector<1x128xf32>
    %11 = vector.broadcast %10 : vector<1x128xf32> to vector<2x128xf32>
    %12 = arith.addf %9, %11 : vector<2x128xf32>
    %13 = arith.truncf %12 : vector<2x128xf32> to vector<2x128xbf16>
    %c0_10 = arith.constant 0 : index
    %c0_11 = arith.constant 0 : index
    %14 = vector.load %arg6[%c0_10, %c0_11] : memref<128x6xbf16, #tpu.memory_space<vmem>>, vector<128x6xbf16>
    %cst_12 = arith.constant dense<0.000000e+00> : vector<2x6xf32>
    %15 = tpu.matmul %13, %14, %cst_12 {dimension_numbers = #tpu.dot_dimension_numbers<[1], [0], [0], [1], [0, 0, 1, 1], [], []>} : vector<2x128xbf16>, vector<128x6xbf16>, vector<2x6xf32> -> vector<2x6xf32>
    %c0_13 = arith.constant 0 : index
    %c0_14 = arith.constant 0 : index
    %16 = vector.load %arg7[%c0_13, %c0_14] : memref<1x6xf32, #tpu.memory_space<vmem>>, vector<1x6xf32>
    %17 = vector.broadcast %16 : vector<1x6xf32> to vector<2x6xf32>
    %18 = arith.addf %15, %17 : vector<2x6xf32>
    %c0_15 = arith.constant 0 : index
    %c0_16 = arith.constant 0 : index
    %19 = vector.load %arg1[%c0_15, %c0_16] : memref<2x1xi32, #tpu.memory_space<vmem>>, vector<2x1xi32>
    %cst_17 = arith.constant dense<0xFF800000> : vector<2xf32>
    %20 = vector.multi_reduction <maximumf>, %18, %cst_17 [1] : vector<2x6xf32> to vector<2xf32>
    %21 = vector.shape_cast %20 : vector<2xf32> to vector<2x1xf32>
    %22 = vector.broadcast %21 : vector<2x1xf32> to vector<2x6xf32>
    %23 = arith.subf %18, %22 : vector<2x6xf32>
    %24 = math.exp %23 : vector<2x6xf32>
    %cst_18 = arith.constant dense<0.000000e+00> : vector<2xf32>
    %25 = vector.multi_reduction <add>, %24, %cst_18 [1] : vector<2x6xf32> to vector<2xf32>
    %26 = vector.shape_cast %25 : vector<2xf32> to vector<2x1xf32>
    %27 = math.log %26 : vector<2x1xf32>
    %28 = arith.addf %21, %27 : vector<2x1xf32>
    %29 = tpu.iota {dimensions = array<i32: 1>} : vector<2x6xi32>
    %30 = vector.broadcast %19 : vector<2x1xi32> to vector<2x6xi32>
    %31 = arith.cmpi eq, %29, %30 : vector<2x6xi32>
    %cst_19 = arith.constant 0.000000e+00 : f32
    %32 = vector.broadcast %cst_19 : f32 to vector<2x6xf32>
    %33 = arith.select %31, %18, %32 : vector<2x6xi1>, vector<2x6xf32>
    %cst_20 = arith.constant dense<0.000000e+00> : vector<2xf32>
    %34 = vector.multi_reduction <add>, %33, %cst_20 [1] : vector<2x6xf32> to vector<2xf32>
    %35 = vector.shape_cast %34 : vector<2xf32> to vector<2x1xf32>
    %36 = arith.subf %28, %35 : vector<2x1xf32>
    %c0_21 = arith.constant 0 : index
    %c0_22 = arith.constant 0 : index
    %37 = vector.load %arg19[%c0_21, %c0_22] : memref<2x1xf32, #tpu.memory_space<vmem>>, vector<2x1xf32>
    tpu.vector_store %arg19[%c0_21, %c0_22], %36 {strides = array<i32>} : memref<2x1xf32, #tpu.memory_space<vmem>>, vector<2x1xf32>,
    %c0_23 = arith.constant 0 : index
    %c0_24 = arith.constant 0 : index
    %38 = vector.load %arg8[%c0_23, %c0_24] : memref<8x256xf32, #tpu.memory_space<vmem>>, vector<8x256xf32>
    %39 = arith.truncf %38 : vector<8x256xf32> to vector<8x256xbf16>
    %c0_25 = arith.constant 0 : index
    %c0_26 = arith.constant 0 : index
    %40 = vector.load %arg10[%c0_25, %c0_26] : memref<256x128xbf16, #tpu.memory_space<vmem>>, vector<256x128xbf16>
    %cst_27 = arith.constant dense<0.000000e+00> : vector<8x128xf32>
    %41 = tpu.matmul %39, %40, %cst_27 {dimension_numbers = #tpu.dot_dimension_numbers<[1], [0], [0], [1], [0, 0, 1, 1], [], []>} : vector<8x256xbf16>, vector<256x128xbf16>, vector<8x128xf32> -> vector<8x128xf32>
    %c0_28 = arith.constant 0 : index
    %c0_29 = arith.constant 0 : index
    %42 = vector.load %arg11[%c0_28, %c0_29] : memref<1x128xf32, #tpu.memory_space<vmem>>, vector<1x128xf32>
    %43 = vector.broadcast %42 : vector<1x128xf32> to vector<8x128xf32>
    %44 = arith.addf %41, %43 : vector<8x128xf32>
    %c0_30 = arith.constant 0 : index
    %c0_31 = arith.constant 0 : index
    %45 = vector.load %arg20[%c0_30, %c0_31] : memref<8x128xf32, #tpu.memory_space<vmem>>, vector<8x128xf32>
    tpu.vector_store %arg20[%c0_30, %c0_31], %44 {strides = array<i32>} : memref<8x128xf32, #tpu.memory_space<vmem>>, vector<8x128xf32>,
    %c0_32 = arith.constant 0 : index
    %c0_33 = arith.constant 0 : index
    %c0_34 = arith.constant 0 : index
    %46 = vector.load %arg17[%c0_32, %c0_33, %c0_34] : memref<2x256x128xbf16, #tpu.memory_space<vmem>>, vector<1x256x128xbf16>
    %47 = vector.shape_cast %46 : vector<1x256x128xbf16> to vector<256x128xbf16>
    %cst_35 = arith.constant dense<0.000000e+00> : vector<8x128xf32>
    %48 = tpu.matmul %39, %47, %cst_35 {dimension_numbers = #tpu.dot_dimension_numbers<[1], [0], [0], [1], [0, 0, 1, 1], [], []>} : vector<8x256xbf16>, vector<256x128xbf16>, vector<8x128xf32> -> vector<8x128xf32>
    %c0_36 = arith.constant 0 : index
    %c0_37 = arith.constant 0 : index
    %c0_38 = arith.constant 0 : index
    %49 = vector.load %arg18[%c0_36, %c0_37, %c0_38] : memref<2x1x128xf32, #tpu.memory_space<vmem>>, vector<1x1x128xf32>
    %50 = vector.shape_cast %49 : vector<1x1x128xf32> to vector<1x128xf32>
    %51 = vector.broadcast %50 : vector<1x128xf32> to vector<8x128xf32>
    %52 = arith.addf %48, %51 : vector<8x128xf32>
    %c0_39 = arith.constant 0 : index
    %c0_40 = arith.constant 0 : index
    %c0_41 = arith.constant 0 : index
    %53 = vector.load %arg21[%c0_39, %c0_40, %c0_41] : memref<2x8x128xf32, #tpu.memory_space<vmem>>, vector<1x8x128xf32>
    %54 = vector.shape_cast %53 : vector<1x8x128xf32> to vector<8x128xf32>
    %55 = vector.shape_cast %52 : vector<8x128xf32> to vector<1x8x128xf32>
    tpu.vector_store %arg21[%c0_39, %c0_40, %c0_41], %55 {strides = array<i32>} : memref<2x8x128xf32, #tpu.memory_space<vmem>>, vector<1x8x128xf32>,
    %c1 = arith.constant 1 : index
    %c0_42 = arith.constant 0 : index
    %c0_43 = arith.constant 0 : index
    %56 = vector.load %arg17[%c1, %c0_42, %c0_43] : memref<2x256x128xbf16, #tpu.memory_space<vmem>>, vector<1x256x128xbf16>
    %57 = vector.shape_cast %56 : vector<1x256x128xbf16> to vector<256x128xbf16>
    %cst_44 = arith.constant dense<0.000000e+00> : vector<8x128xf32>
    %58 = tpu.matmul %39, %57, %cst_44 {dimension_numbers = #tpu.dot_dimension_numbers<[1], [0], [0], [1], [0, 0, 1, 1], [], []>} : vector<8x256xbf16>, vector<256x128xbf16>, vector<8x128xf32> -> vector<8x128xf32>
    %c1_45 = arith.constant 1 : index
    %c0_46 = arith.constant 0 : index
    %c0_47 = arith.constant 0 : index
    %59 = vector.load %arg18[%c1_45, %c0_46, %c0_47] : memref<2x1x128xf32, #tpu.memory_space<vmem>>, vector<1x1x128xf32>
    %60 = vector.shape_cast %59 : vector<1x1x128xf32> to vector<1x128xf32>
    %61 = vector.broadcast %60 : vector<1x128xf32> to vector<8x128xf32>
    %62 = arith.addf %58, %61 : vector<8x128xf32>
    %c1_48 = arith.constant 1 : index
    %c0_49 = arith.constant 0 : index
    %c0_50 = arith.constant 0 : index
    %63 = vector.load %arg21[%c1_48, %c0_49, %c0_50] : memref<2x8x128xf32, #tpu.memory_space<vmem>>, vector<1x8x128xf32>
    %64 = vector.shape_cast %63 : vector<1x8x128xf32> to vector<8x128xf32>
    %65 = vector.shape_cast %62 : vector<8x128xf32> to vector<1x8x128xf32>
    tpu.vector_store %arg21[%c1_48, %c0_49, %c0_50], %65 {strides = array<i32>} : memref<2x8x128xf32, #tpu.memory_space<vmem>>, vector<1x8x128xf32>,
    %66 = arith.truncf %44 : vector<8x128xf32> to vector<8x128xbf16>
    %c0_51 = arith.constant 0 : index
    %c0_52 = arith.constant 0 : index
    %67 = vector.load %arg12[%c0_51, %c0_52] : memref<128x128xbf16, #tpu.memory_space<vmem>>, vector<128x128xbf16>
    %cst_53 = arith.constant dense<0.000000e+00> : vector<8x128xf32>
    %68 = tpu.matmul %66, %67, %cst_53 {dimension_numbers = #tpu.dot_dimension_numbers<[1], [0], [0], [1], [0, 0, 1, 1], [], []>} : vector<8x128xbf16>, vector<128x128xbf16>, vector<8x128xf32> -> vector<8x128xf32>
    %c0_54 = arith.constant 0 : index
    %c0_55 = arith.constant 0 : index
    %69 = vector.load %arg13[%c0_54, %c0_55] : memref<1x128xf32, #tpu.memory_space<vmem>>, vector<1x128xf32>
    %70 = vector.broadcast %69 : vector<1x128xf32> to vector<8x128xf32>
    %71 = arith.addf %68, %70 : vector<8x128xf32>
    %72 = arith.truncf %71 : vector<8x128xf32> to vector<8x128xbf16>
    %c0_56 = arith.constant 0 : index
    %c0_57 = arith.constant 0 : index
    %73 = vector.load %arg14[%c0_56, %c0_57] : memref<128x10xbf16, #tpu.memory_space<vmem>>, vector<128x10xbf16>
    %cst_58 = arith.constant dense<0.000000e+00> : vector<8x10xf32>
    %74 = tpu.matmul %72, %73, %cst_58 {dimension_numbers = #tpu.dot_dimension_numbers<[1], [0], [0], [1], [0, 0, 1, 1], [], []>} : vector<8x128xbf16>, vector<128x10xbf16>, vector<8x10xf32> -> vector<8x10xf32>
    %c0_59 = arith.constant 0 : index
    %c0_60 = arith.constant 0 : index
    %75 = vector.load %arg15[%c0_59, %c0_60] : memref<1x10xf32, #tpu.memory_space<vmem>>, vector<1x10xf32>
    %76 = vector.broadcast %75 : vector<1x10xf32> to vector<8x10xf32>
    %77 = arith.addf %74, %76 : vector<8x10xf32>
    %c0_61 = arith.constant 0 : index
    %c0_62 = arith.constant 0 : index
    %78 = vector.load %arg9[%c0_61, %c0_62] : memref<8x1xi32, #tpu.memory_space<vmem>>, vector<8x1xi32>
    %cst_63 = arith.constant dense<0xFF800000> : vector<8xf32>
    %79 = vector.multi_reduction <maximumf>, %77, %cst_63 [1] : vector<8x10xf32> to vector<8xf32>
    %80 = vector.shape_cast %79 : vector<8xf32> to vector<8x1xf32>
    %81 = vector.broadcast %80 : vector<8x1xf32> to vector<8x10xf32>
    %82 = arith.subf %77, %81 : vector<8x10xf32>
    %83 = math.exp %82 : vector<8x10xf32>
    %cst_64 = arith.constant dense<0.000000e+00> : vector<8xf32>
    %84 = vector.multi_reduction <add>, %83, %cst_64 [1] : vector<8x10xf32> to vector<8xf32>
    %85 = vector.shape_cast %84 : vector<8xf32> to vector<8x1xf32>
    %86 = math.log %85 : vector<8x1xf32>
    %87 = arith.addf %80, %86 : vector<8x1xf32>
    %88 = tpu.iota {dimensions = array<i32: 1>} : vector<8x10xi32>
    %89 = vector.broadcast %78 : vector<8x1xi32> to vector<8x10xi32>
    %90 = arith.cmpi eq, %88, %89 : vector<8x10xi32>
    %cst_65 = arith.constant 0.000000e+00 : f32
    %91 = vector.broadcast %cst_65 : f32 to vector<8x10xf32>
    %92 = arith.select %90, %77, %91 : vector<8x10xi1>, vector<8x10xf32>
    %cst_66 = arith.constant dense<0.000000e+00> : vector<8xf32>
    %93 = vector.multi_reduction <add>, %92, %cst_66 [1] : vector<8x10xf32> to vector<8xf32>
    %94 = vector.shape_cast %93 : vector<8xf32> to vector<8x1xf32>
    %95 = arith.subf %87, %94 : vector<8x1xf32>
    %c0_67 = arith.constant 0 : index
    %c0_68 = arith.constant 0 : index
    %96 = vector.load %arg22[%c0_67, %c0_68] : memref<8x1xf32, #tpu.memory_space<vmem>>, vector<8x1xf32>
    tpu.vector_store %arg22[%c0_67, %c0_68], %95 {strides = array<i32>} : memref<8x1xf32, #tpu.memory_space<vmem>>, vector<8x1xf32>,
    %c0_69 = arith.constant 0 : index
    %c0_70 = arith.constant 0 : index
    %97 = vector.load %arg16[%c0_69, %c0_70] : memref<10x10xf32, #tpu.memory_space<vmem>>, vector<10x10xf32>
    %cst_71 = arith.constant dense<0.000000e+00> : vector<8x10xf32>
    %98 = tpu.matmul %77, %97, %cst_71 {dimension_numbers = #tpu.dot_dimension_numbers<[1], [0], [0], [1], [0, 0, 1, 1], [], []>} : vector<8x10xf32>, vector<10x10xf32>, vector<8x10xf32> -> vector<8x10xf32>
    %cst_72 = arith.constant dense<0xFF800000> : vector<8xf32>
    %99 = vector.multi_reduction <maximumf>, %98, %cst_72 [1] : vector<8x10xf32> to vector<8xf32>
    %100 = vector.shape_cast %99 : vector<8xf32> to vector<8x1xf32>
    %101 = vector.broadcast %100 : vector<8x1xf32> to vector<8x10xf32>
    %102 = arith.subf %98, %101 : vector<8x10xf32>
    %103 = math.exp %102 : vector<8x10xf32>
    %cst_73 = arith.constant dense<0.000000e+00> : vector<8xf32>
    %104 = vector.multi_reduction <add>, %103, %cst_73 [1] : vector<8x10xf32> to vector<8xf32>
    %105 = vector.shape_cast %104 : vector<8xf32> to vector<8x1xf32>
    %106 = math.log %105 : vector<8x1xf32>
    %107 = arith.addf %100, %106 : vector<8x1xf32>
    %108 = tpu.iota {dimensions = array<i32: 1>} : vector<8x10xi32>
    %109 = vector.broadcast %78 : vector<8x1xi32> to vector<8x10xi32>
    %110 = arith.cmpi eq, %108, %109 : vector<8x10xi32>
    %cst_74 = arith.constant 0.000000e+00 : f32
    %111 = vector.broadcast %cst_74 : f32 to vector<8x10xf32>
    %112 = arith.select %110, %98, %111 : vector<8x10xi1>, vector<8x10xf32>
    %cst_75 = arith.constant dense<0.000000e+00> : vector<8xf32>
    %113 = vector.multi_reduction <add>, %112, %cst_75 [1] : vector<8x10xf32> to vector<8xf32>
    %114 = vector.shape_cast %113 : vector<8xf32> to vector<8x1xf32>
    %115 = arith.subf %107, %114 : vector<8x1xf32>
    %c0_76 = arith.constant 0 : index
    %c0_77 = arith.constant 0 : index
    %116 = vector.load %arg23[%c0_76, %c0_77] : memref<8x1xf32, #tpu.memory_space<vmem>>, vector<8x1xf32>
    tpu.vector_store %arg23[%c0_76, %c0_77], %115 {strides = array<i32>} : memref<8x1xf32, #tpu.memory_space<vmem>>, vector<8x1xf32>,
    return
  }
}

module attributes {stable_mosaic.version = 11 : i64} {
  func.func @_attr_head_kernel(%arg0: memref<2x8x256xf32, #tpu.memory_space<vmem>>, %arg1: memref<2x256x128xbf16, #tpu.memory_space<vmem>>, %arg2: memref<2x1x128xf32, #tpu.memory_space<vmem>>, %arg3: memref<2x128x128xbf16, #tpu.memory_space<vmem>>, %arg4: memref<2x1x128xf32, #tpu.memory_space<vmem>>, %arg5: memref<2x128x128xf32, #tpu.memory_space<vmem>>, %arg6: memref<2x8x1xi32, #tpu.memory_space<vmem>>, %arg7: memref<2x8x1xf32, #tpu.memory_space<vmem>>, %arg8: memref<2x8x1xf32, #tpu.memory_space<vmem>>) attributes {dimension_semantics = [], scalar_prefetch = 0 : i64, scratch_operands = 0 : i64, tpu.core_type = #tpu.core_type<tc>} {
    %c0 = arith.constant 0 : index
    %c0_0 = arith.constant 0 : index
    %c0_1 = arith.constant 0 : index
    %0 = vector.load %arg0[%c0, %c0_0, %c0_1] : memref<2x8x256xf32, #tpu.memory_space<vmem>>, vector<1x8x256xf32>
    %1 = vector.shape_cast %0 : vector<1x8x256xf32> to vector<8x256xf32>
    %2 = arith.truncf %1 : vector<8x256xf32> to vector<8x256xbf16>
    %c0_2 = arith.constant 0 : index
    %c0_3 = arith.constant 0 : index
    %c0_4 = arith.constant 0 : index
    %3 = vector.load %arg1[%c0_2, %c0_3, %c0_4] : memref<2x256x128xbf16, #tpu.memory_space<vmem>>, vector<1x256x128xbf16>
    %4 = vector.shape_cast %3 : vector<1x256x128xbf16> to vector<256x128xbf16>
    %cst = arith.constant dense<0.000000e+00> : vector<8x128xf32>
    %5 = tpu.matmul %2, %4, %cst {dimension_numbers = #tpu.dot_dimension_numbers<[1], [0], [0], [1], [0, 0, 1, 1], [], []>} : vector<8x256xbf16>, vector<256x128xbf16>, vector<8x128xf32> -> vector<8x128xf32>
    %c0_5 = arith.constant 0 : index
    %c0_6 = arith.constant 0 : index
    %c0_7 = arith.constant 0 : index
    %6 = vector.load %arg2[%c0_5, %c0_6, %c0_7] : memref<2x1x128xf32, #tpu.memory_space<vmem>>, vector<1x1x128xf32>
    %7 = vector.shape_cast %6 : vector<1x1x128xf32> to vector<1x128xf32>
    %8 = vector.broadcast %7 : vector<1x128xf32> to vector<8x128xf32>
    %9 = arith.addf %5, %8 : vector<8x128xf32>
    %10 = arith.truncf %9 : vector<8x128xf32> to vector<8x128xbf16>
    %c0_8 = arith.constant 0 : index
    %c0_9 = arith.constant 0 : index
    %c0_10 = arith.constant 0 : index
    %11 = vector.load %arg3[%c0_8, %c0_9, %c0_10] : memref<2x128x128xbf16, #tpu.memory_space<vmem>>, vector<1x128x128xbf16>
    %12 = vector.shape_cast %11 : vector<1x128x128xbf16> to vector<128x128xbf16>
    %cst_11 = arith.constant dense<0.000000e+00> : vector<8x128xf32>
    %13 = tpu.matmul %10, %12, %cst_11 {dimension_numbers = #tpu.dot_dimension_numbers<[1], [0], [0], [1], [0, 0, 1, 1], [], []>} : vector<8x128xbf16>, vector<128x128xbf16>, vector<8x128xf32> -> vector<8x128xf32>
    %c0_12 = arith.constant 0 : index
    %c0_13 = arith.constant 0 : index
    %c0_14 = arith.constant 0 : index
    %14 = vector.load %arg4[%c0_12, %c0_13, %c0_14] : memref<2x1x128xf32, #tpu.memory_space<vmem>>, vector<1x1x128xf32>
    %15 = vector.shape_cast %14 : vector<1x1x128xf32> to vector<1x128xf32>
    %16 = vector.broadcast %15 : vector<1x128xf32> to vector<8x128xf32>
    %17 = arith.addf %13, %16 : vector<8x128xf32>
    %18 = tpu.iota {dimensions = array<i32: 1>} : vector<8x128xi32>
    %c4_i32 = arith.constant 4 : i32
    %19 = vector.broadcast %c4_i32 : i32 to vector<8x128xi32>
    %20 = arith.cmpi slt, %18, %19 : vector<8x128xi32>
    %c0_15 = arith.constant 0 : index
    %c0_16 = arith.constant 0 : index
    %c0_17 = arith.constant 0 : index
    %21 = vector.load %arg6[%c0_15, %c0_16, %c0_17] : memref<2x8x1xi32, #tpu.memory_space<vmem>>, vector<1x8x1xi32>
    %22 = vector.shape_cast %21 : vector<1x8x1xi32> to vector<8x1xi32>
    %cst_18 = arith.constant -1.000000e+09 : f32
    %23 = vector.broadcast %cst_18 : f32 to vector<8x128xf32>
    %24 = arith.select %20, %17, %23 : vector<8x128xi1>, vector<8x128xf32>
    %cst_19 = arith.constant dense<0xFF800000> : vector<8xf32>
    %25 = vector.multi_reduction <maximumf>, %24, %cst_19 [1] : vector<8x128xf32> to vector<8xf32>
    %26 = vector.shape_cast %25 : vector<8xf32> to vector<8x1xf32>
    %27 = vector.broadcast %26 : vector<8x1xf32> to vector<8x128xf32>
    %28 = arith.subf %24, %27 : vector<8x128xf32>
    %29 = math.exp %28 : vector<8x128xf32>
    %cst_20 = arith.constant dense<0.000000e+00> : vector<8xf32>
    %30 = vector.multi_reduction <add>, %29, %cst_20 [1] : vector<8x128xf32> to vector<8xf32>
    %31 = vector.shape_cast %30 : vector<8xf32> to vector<8x1xf32>
    %32 = math.log %31 : vector<8x1xf32>
    %33 = arith.addf %26, %32 : vector<8x1xf32>
    %34 = tpu.iota {dimensions = array<i32: 1>} : vector<8x128xi32>
    %35 = vector.broadcast %22 : vector<8x1xi32> to vector<8x128xi32>
    %36 = arith.cmpi eq, %34, %35 : vector<8x128xi32>
    %cst_21 = arith.constant 0.000000e+00 : f32
    %37 = vector.broadcast %cst_21 : f32 to vector<8x128xf32>
    %38 = arith.select %36, %24, %37 : vector<8x128xi1>, vector<8x128xf32>
    %cst_22 = arith.constant dense<0.000000e+00> : vector<8xf32>
    %39 = vector.multi_reduction <add>, %38, %cst_22 [1] : vector<8x128xf32> to vector<8xf32>
    %40 = vector.shape_cast %39 : vector<8xf32> to vector<8x1xf32>
    %41 = arith.subf %33, %40 : vector<8x1xf32>
    %c0_23 = arith.constant 0 : index
    %c0_24 = arith.constant 0 : index
    %c0_25 = arith.constant 0 : index
    %42 = vector.load %arg7[%c0_23, %c0_24, %c0_25] : memref<2x8x1xf32, #tpu.memory_space<vmem>>, vector<1x8x1xf32>
    %43 = vector.shape_cast %42 : vector<1x8x1xf32> to vector<8x1xf32>
    %44 = vector.shape_cast %41 : vector<8x1xf32> to vector<1x8x1xf32>
    tpu.vector_store %arg7[%c0_23, %c0_24, %c0_25], %44 {strides = array<i32>} : memref<2x8x1xf32, #tpu.memory_space<vmem>>, vector<1x8x1xf32>,
    %c0_26 = arith.constant 0 : index
    %c0_27 = arith.constant 0 : index
    %c0_28 = arith.constant 0 : index
    %45 = vector.load %arg5[%c0_26, %c0_27, %c0_28] : memref<2x128x128xf32, #tpu.memory_space<vmem>>, vector<1x128x128xf32>
    %46 = vector.shape_cast %45 : vector<1x128x128xf32> to vector<128x128xf32>
    %cst_29 = arith.constant dense<0.000000e+00> : vector<8x128xf32>
    %47 = tpu.matmul %17, %46, %cst_29 {dimension_numbers = #tpu.dot_dimension_numbers<[1], [0], [0], [1], [0, 0, 1, 1], [], []>} : vector<8x128xf32>, vector<128x128xf32>, vector<8x128xf32> -> vector<8x128xf32>
    %cst_30 = arith.constant -1.000000e+09 : f32
    %48 = vector.broadcast %cst_30 : f32 to vector<8x128xf32>
    %49 = arith.select %20, %47, %48 : vector<8x128xi1>, vector<8x128xf32>
    %cst_31 = arith.constant dense<0xFF800000> : vector<8xf32>
    %50 = vector.multi_reduction <maximumf>, %49, %cst_31 [1] : vector<8x128xf32> to vector<8xf32>
    %51 = vector.shape_cast %50 : vector<8xf32> to vector<8x1xf32>
    %52 = vector.broadcast %51 : vector<8x1xf32> to vector<8x128xf32>
    %53 = arith.subf %49, %52 : vector<8x128xf32>
    %54 = math.exp %53 : vector<8x128xf32>
    %cst_32 = arith.constant dense<0.000000e+00> : vector<8xf32>
    %55 = vector.multi_reduction <add>, %54, %cst_32 [1] : vector<8x128xf32> to vector<8xf32>
    %56 = vector.shape_cast %55 : vector<8xf32> to vector<8x1xf32>
    %57 = math.log %56 : vector<8x1xf32>
    %58 = arith.addf %51, %57 : vector<8x1xf32>
    %59 = tpu.iota {dimensions = array<i32: 1>} : vector<8x128xi32>
    %60 = vector.broadcast %22 : vector<8x1xi32> to vector<8x128xi32>
    %61 = arith.cmpi eq, %59, %60 : vector<8x128xi32>
    %cst_33 = arith.constant 0.000000e+00 : f32
    %62 = vector.broadcast %cst_33 : f32 to vector<8x128xf32>
    %63 = arith.select %61, %49, %62 : vector<8x128xi1>, vector<8x128xf32>
    %cst_34 = arith.constant dense<0.000000e+00> : vector<8xf32>
    %64 = vector.multi_reduction <add>, %63, %cst_34 [1] : vector<8x128xf32> to vector<8xf32>
    %65 = vector.shape_cast %64 : vector<8xf32> to vector<8x1xf32>
    %66 = arith.subf %58, %65 : vector<8x1xf32>
    %c0_35 = arith.constant 0 : index
    %c0_36 = arith.constant 0 : index
    %c0_37 = arith.constant 0 : index
    %67 = vector.load %arg8[%c0_35, %c0_36, %c0_37] : memref<2x8x1xf32, #tpu.memory_space<vmem>>, vector<1x8x1xf32>
    %68 = vector.shape_cast %67 : vector<1x8x1xf32> to vector<8x1xf32>
    %69 = vector.shape_cast %66 : vector<8x1xf32> to vector<1x8x1xf32>
    tpu.vector_store %arg8[%c0_35, %c0_36, %c0_37], %69 {strides = array<i32>} : memref<2x8x1xf32, #tpu.memory_space<vmem>>, vector<1x8x1xf32>,
    %c1 = arith.constant 1 : index
    %c0_38 = arith.constant 0 : index
    %c0_39 = arith.constant 0 : index
    %70 = vector.load %arg0[%c1, %c0_38, %c0_39] : memref<2x8x256xf32, #tpu.memory_space<vmem>>, vector<1x8x256xf32>
    %71 = vector.shape_cast %70 : vector<1x8x256xf32> to vector<8x256xf32>
    %72 = arith.truncf %71 : vector<8x256xf32> to vector<8x256xbf16>
    %c1_40 = arith.constant 1 : index
    %c0_41 = arith.constant 0 : index
    %c0_42 = arith.constant 0 : index
    %73 = vector.load %arg1[%c1_40, %c0_41, %c0_42] : memref<2x256x128xbf16, #tpu.memory_space<vmem>>, vector<1x256x128xbf16>
    %74 = vector.shape_cast %73 : vector<1x256x128xbf16> to vector<256x128xbf16>
    %cst_43 = arith.constant dense<0.000000e+00> : vector<8x128xf32>
    %75 = tpu.matmul %72, %74, %cst_43 {dimension_numbers = #tpu.dot_dimension_numbers<[1], [0], [0], [1], [0, 0, 1, 1], [], []>} : vector<8x256xbf16>, vector<256x128xbf16>, vector<8x128xf32> -> vector<8x128xf32>
    %c1_44 = arith.constant 1 : index
    %c0_45 = arith.constant 0 : index
    %c0_46 = arith.constant 0 : index
    %76 = vector.load %arg2[%c1_44, %c0_45, %c0_46] : memref<2x1x128xf32, #tpu.memory_space<vmem>>, vector<1x1x128xf32>
    %77 = vector.shape_cast %76 : vector<1x1x128xf32> to vector<1x128xf32>
    %78 = vector.broadcast %77 : vector<1x128xf32> to vector<8x128xf32>
    %79 = arith.addf %75, %78 : vector<8x128xf32>
    %80 = arith.truncf %79 : vector<8x128xf32> to vector<8x128xbf16>
    %c1_47 = arith.constant 1 : index
    %c0_48 = arith.constant 0 : index
    %c0_49 = arith.constant 0 : index
    %81 = vector.load %arg3[%c1_47, %c0_48, %c0_49] : memref<2x128x128xbf16, #tpu.memory_space<vmem>>, vector<1x128x128xbf16>
    %82 = vector.shape_cast %81 : vector<1x128x128xbf16> to vector<128x128xbf16>
    %cst_50 = arith.constant dense<0.000000e+00> : vector<8x128xf32>
    %83 = tpu.matmul %80, %82, %cst_50 {dimension_numbers = #tpu.dot_dimension_numbers<[1], [0], [0], [1], [0, 0, 1, 1], [], []>} : vector<8x128xbf16>, vector<128x128xbf16>, vector<8x128xf32> -> vector<8x128xf32>
    %c1_51 = arith.constant 1 : index
    %c0_52 = arith.constant 0 : index
    %c0_53 = arith.constant 0 : index
    %84 = vector.load %arg4[%c1_51, %c0_52, %c0_53] : memref<2x1x128xf32, #tpu.memory_space<vmem>>, vector<1x1x128xf32>
    %85 = vector.shape_cast %84 : vector<1x1x128xf32> to vector<1x128xf32>
    %86 = vector.broadcast %85 : vector<1x128xf32> to vector<8x128xf32>
    %87 = arith.addf %83, %86 : vector<8x128xf32>
    %88 = tpu.iota {dimensions = array<i32: 1>} : vector<8x128xi32>
    %c5_i32 = arith.constant 5 : i32
    %89 = vector.broadcast %c5_i32 : i32 to vector<8x128xi32>
    %90 = arith.cmpi slt, %88, %89 : vector<8x128xi32>
    %c1_54 = arith.constant 1 : index
    %c0_55 = arith.constant 0 : index
    %c0_56 = arith.constant 0 : index
    %91 = vector.load %arg6[%c1_54, %c0_55, %c0_56] : memref<2x8x1xi32, #tpu.memory_space<vmem>>, vector<1x8x1xi32>
    %92 = vector.shape_cast %91 : vector<1x8x1xi32> to vector<8x1xi32>
    %cst_57 = arith.constant -1.000000e+09 : f32
    %93 = vector.broadcast %cst_57 : f32 to vector<8x128xf32>
    %94 = arith.select %90, %87, %93 : vector<8x128xi1>, vector<8x128xf32>
    %cst_58 = arith.constant dense<0xFF800000> : vector<8xf32>
    %95 = vector.multi_reduction <maximumf>, %94, %cst_58 [1] : vector<8x128xf32> to vector<8xf32>
    %96 = vector.shape_cast %95 : vector<8xf32> to vector<8x1xf32>
    %97 = vector.broadcast %96 : vector<8x1xf32> to vector<8x128xf32>
    %98 = arith.subf %94, %97 : vector<8x128xf32>
    %99 = math.exp %98 : vector<8x128xf32>
    %cst_59 = arith.constant dense<0.000000e+00> : vector<8xf32>
    %100 = vector.multi_reduction <add>, %99, %cst_59 [1] : vector<8x128xf32> to vector<8xf32>
    %101 = vector.shape_cast %100 : vector<8xf32> to vector<8x1xf32>
    %102 = math.log %101 : vector<8x1xf32>
    %103 = arith.addf %96, %102 : vector<8x1xf32>
    %104 = tpu.iota {dimensions = array<i32: 1>} : vector<8x128xi32>
    %105 = vector.broadcast %92 : vector<8x1xi32> to vector<8x128xi32>
    %106 = arith.cmpi eq, %104, %105 : vector<8x128xi32>
    %cst_60 = arith.constant 0.000000e+00 : f32
    %107 = vector.broadcast %cst_60 : f32 to vector<8x128xf32>
    %108 = arith.select %106, %94, %107 : vector<8x128xi1>, vector<8x128xf32>
    %cst_61 = arith.constant dense<0.000000e+00> : vector<8xf32>
    %109 = vector.multi_reduction <add>, %108, %cst_61 [1] : vector<8x128xf32> to vector<8xf32>
    %110 = vector.shape_cast %109 : vector<8xf32> to vector<8x1xf32>
    %111 = arith.subf %103, %110 : vector<8x1xf32>
    %c1_62 = arith.constant 1 : index
    %c0_63 = arith.constant 0 : index
    %c0_64 = arith.constant 0 : index
    %112 = vector.load %arg7[%c1_62, %c0_63, %c0_64] : memref<2x8x1xf32, #tpu.memory_space<vmem>>, vector<1x8x1xf32>
    %113 = vector.shape_cast %112 : vector<1x8x1xf32> to vector<8x1xf32>
    %114 = vector.shape_cast %111 : vector<8x1xf32> to vector<1x8x1xf32>
    tpu.vector_store %arg7[%c1_62, %c0_63, %c0_64], %114 {strides = array<i32>} : memref<2x8x1xf32, #tpu.memory_space<vmem>>, vector<1x8x1xf32>,
    %c1_65 = arith.constant 1 : index
    %c0_66 = arith.constant 0 : index
    %c0_67 = arith.constant 0 : index
    %115 = vector.load %arg5[%c1_65, %c0_66, %c0_67] : memref<2x128x128xf32, #tpu.memory_space<vmem>>, vector<1x128x128xf32>
    %116 = vector.shape_cast %115 : vector<1x128x128xf32> to vector<128x128xf32>
    %cst_68 = arith.constant dense<0.000000e+00> : vector<8x128xf32>
    %117 = tpu.matmul %87, %116, %cst_68 {dimension_numbers = #tpu.dot_dimension_numbers<[1], [0], [0], [1], [0, 0, 1, 1], [], []>} : vector<8x128xf32>, vector<128x128xf32>, vector<8x128xf32> -> vector<8x128xf32>
    %cst_69 = arith.constant -1.000000e+09 : f32
    %118 = vector.broadcast %cst_69 : f32 to vector<8x128xf32>
    %119 = arith.select %90, %117, %118 : vector<8x128xi1>, vector<8x128xf32>
    %cst_70 = arith.constant dense<0xFF800000> : vector<8xf32>
    %120 = vector.multi_reduction <maximumf>, %119, %cst_70 [1] : vector<8x128xf32> to vector<8xf32>
    %121 = vector.shape_cast %120 : vector<8xf32> to vector<8x1xf32>
    %122 = vector.broadcast %121 : vector<8x1xf32> to vector<8x128xf32>
    %123 = arith.subf %119, %122 : vector<8x128xf32>
    %124 = math.exp %123 : vector<8x128xf32>
    %cst_71 = arith.constant dense<0.000000e+00> : vector<8xf32>
    %125 = vector.multi_reduction <add>, %124, %cst_71 [1] : vector<8x128xf32> to vector<8xf32>
    %126 = vector.shape_cast %125 : vector<8xf32> to vector<8x1xf32>
    %127 = math.log %126 : vector<8x1xf32>
    %128 = arith.addf %121, %127 : vector<8x1xf32>
    %129 = tpu.iota {dimensions = array<i32: 1>} : vector<8x128xi32>
    %130 = vector.broadcast %92 : vector<8x1xi32> to vector<8x128xi32>
    %131 = arith.cmpi eq, %129, %130 : vector<8x128xi32>
    %cst_72 = arith.constant 0.000000e+00 : f32
    %132 = vector.broadcast %cst_72 : f32 to vector<8x128xf32>
    %133 = arith.select %131, %119, %132 : vector<8x128xi1>, vector<8x128xf32>
    %cst_73 = arith.constant dense<0.000000e+00> : vector<8xf32>
    %134 = vector.multi_reduction <add>, %133, %cst_73 [1] : vector<8x128xf32> to vector<8xf32>
    %135 = vector.shape_cast %134 : vector<8xf32> to vector<8x1xf32>
    %136 = arith.subf %128, %135 : vector<8x1xf32>
    %c1_74 = arith.constant 1 : index
    %c0_75 = arith.constant 0 : index
    %c0_76 = arith.constant 0 : index
    %137 = vector.load %arg8[%c1_74, %c0_75, %c0_76] : memref<2x8x1xf32, #tpu.memory_space<vmem>>, vector<1x8x1xf32>
    %138 = vector.shape_cast %137 : vector<1x8x1xf32> to vector<8x1xf32>
    %139 = vector.shape_cast %136 : vector<8x1xf32> to vector<1x8x1xf32>
    tpu.vector_store %arg8[%c1_74, %c0_75, %c0_76], %139 {strides = array<i32>} : memref<2x8x1xf32, #tpu.memory_space<vmem>>, vector<1x8x1xf32>,
    return
  }
}

</mosaic_0001>

<bundles_post_ra>
// kernel: run.8
= control target key start
LH: loop header
LB: loop body
LE: loop exit
PB: predicated region body
PF: predicated region fallthrough
CT: control target
= control target key end

     0   :  { %s1652_s21 = smov 0   ;;  %s1654_s22 = smov 0   ;;  %s2004_s0 = inlined_call_operand.vmem [shape: f32[3,8,128], index: 0, kind: input, shape index: {}]   ;;  %s2005_s1 = inlined_call_operand.vmem [shape: f32[2,8,128], index: 1, kind: input, shape index: {}]   ;;  %s2006_s2 = inlined_call_operand.vmem [shape: bf16[2,128,384], index: 2, kind: input, shape index: {}]   ;;  %s2007_s3 = inlined_call_operand.vmem [shape: f32[2,1,384], index: 3, kind: input, shape index: {}]   ;;  %s2008_s4 = inlined_call_operand.vmem [shape: bf16[2,128,384], index: 4, kind: input, shape index: {}]   ;;  %s2009_s5 = inlined_call_operand.vmem [shape: f32[2,1,384], index: 5, kind: input, shape index: {}]   ;;  %s2010_s6 = inlined_call_operand.vmem [shape: f32[3,8,256], index: 6, kind: output, shape index: {}]  }
   0x1   :  { %s1656_s23 = smov 0  }
   0x2 LB: > { %s1665_s24 = sadd.s32 4294967295, %s1612_s23   ;;  %s1667_s25 = sadd.s32 1, %s1612_s23   ;;  %s1612_s23 = sphi %s1656_s23, %s2014_s23   ;;  %s1608_s22 = sphi %s1654_s22, %s2013_s22   ;;  %s1604_s21 = sphi %s1652_s21, %s2012_s21  }
   0x3   : > { %s171_s26 = ssub.s32 %s1612_s23, %s1667_s25  ;;  %s174_s27 = sadd.s32 1, %s1608_s22 }
   0x4   : > { %p172_p0 = scmp.eq.s32.totalorder %s171_s26, 0  ;;  %p184_p1 = scmp.ne.s32.totalorder %s1608_s22, %s1604_s21 }
   0x5   : > { %p185_p2 = scmp.eq.s32.totalorder %s1665_s24, 1  ;;  %p1281_p3 = scmp.ge.s32.totalorder %s1612_s23, 1 }
   0x6   : > { %s1675_s28 = scalar_select %p172_p0, %s1608_s22, %s174_s27  }
   0x7   : > { %p1677_p4 = por %p185_p2, %p184_p1  ;;  %p249_p5 = scmp.lt.s32.totalorder %s1612_s23, 3 }
   0x9   : > { %p250_p6 = pnand %p1281_p3, %p249_p5 }
   0xa   : > { %p295_p7 = scmp.lt.s32.totalorder (!%p250_p6), %s1665_s24, 1  ;;  %v318_v0 = vld [vmem:[%s2004_s0] sm:$0xff] (!%p250_p6)  ;;  %v319_v1 = vld [vmem:[%s2004_s0 + $0x8] sm:$0xff] (!%p250_p6)  ;;  %v1614_v2 = vmov (!%p250_p6), 0   ;;  %v320_v30 = vld [vmem:[%s2004_s0 + $0x10] sm:$0xff] (!%p250_p6)  ;;  %v1615_v38 = vmov (!%p250_p6), 0.0   ;;  %v357_v57 = vlaneseq (!%p250_p6) }
   0xb   : > { %253 = sbr.rel (%p250_p6) target bundleno = 885 (0x375), region = 44  ;;  %532 = vmatprep.mubr.bf16.mxu0 (!%p250_p6), %v1614_v2  ;;  %v321_v3 = vpack.c.bf16 (!%p250_p6), %v319_v1, %v318_v0  ;;  %v322_v34 = vpack.c.bf16 (!%p250_p6), %v320_v30, %v320_v30  ;;  %vm1616_vm0 = vmmov (!%p250_p6), 0   ;;  %p642_p8 = scmp.eq.s32.totalorder (!%p250_p6), %s1665_s24, 0 }
   0xc   : > { %v1884_v58 = vshrl.u32 (!%p250_p6), %v357_v57, 7 }
   0xd   : > { %1402 = vmatprep.mubr.bf16.mxu1 (!%p250_p6), %v321_v3 }
   0xe   : > { %v359_v59 = vsub.s32 (!%p250_p6), 0, %v1884_v58  ;;  %v363_v61 = vsub.s32 (!%p250_p6), 1, %v1884_v58 }
  0x12   : > { %s1690_s10 = scalar_select %p295_p7, %s1665_s24, 1 }
  0x13   : > { %s1344_s7 = sshll.u32 (%p1677_p4), %s1665_s24, 3 }
  0x14   : > { %s1467_s11 = smul.u32 192, %s1690_s10  ;;  %s1282_s20 = sshll.u32 %s1690_s10, 3 }
  0x15   : > { %s298_s27 = scalar_lea.vmem %s2005_s1, %s1282_s20  ;;  %s1468_s30 = smul.u32 3, %s1690_s10 }
  0x16   : > { %s1696_s14 = scalar_lea.vmem %s2006_s2, %s1467_s11  ;;  %s1711_s17 = scalar_lea.vmem %s2008_s4, %s1467_s11  ;;  %v1824_v52 = vld [vmem:[%s298_s27] sm:$0xff] }
  0x17   : > { %v1496_v4 = vld [vmem:[%s1696_s14 + $0x4] ss:$12 sps:$4 sm:$0xff]   ;;  %v1498_v5 = vld [vmem:[%s1696_s14] ss:$12 sps:$4 sm:$0xff]   ;;  %v1499_v6 = vld [vmem:[%s1696_s14 + $0x1c] ss:$12 sps:$4 sm:$0xff]   ;;  %v650_v54 = vpack.c.bf16 %v1824_v52, %v1824_v52  ;;  %s307_s9 = scalar_lea.vmem %s2007_s3, %s1468_s30 }
  0x18   : > { %500 = vmatprep.subr.bf16.mxu0 %v1496_v4  ;;  %v1501_v7 = vld [vmem:[%s1696_s14 + $0x18] ss:$12 sps:$4 sm:$0xff]   ;;  %v1502_v8 = vld [vmem:[%s1696_s14 + $0x34] ss:$12 sps:$4 sm:$0xff]   ;;  %v1504_v9 = vld [vmem:[%s1696_s14 + $0x30] ss:$12 sps:$4 sm:$0xff]  }
  0x19   : > { %501 = vmatpush1.bf16.msra.mxu0 %v1498_v5  ;;  %v1505_v10 = vld [vmem:[%s1696_s14 + $0x4c] ss:$12 sps:$4 sm:$0xff]   ;;  %v1517_v11 = vld [vmem:[%s1696_s14 + $0x8] ss:$12 sps:$4 sm:$0xff]   ;;  %v1508_v13 = vld [vmem:[%s1696_s14 + $0x64] ss:$12 sps:$4 sm:$0xff]  }
  0x1a   : > { %502 = vmatprep.subr.bf16.mxu0 %v1499_v6  ;;  %v1507_v12 = vld [vmem:[%s1696_s14 + $0x48] ss:$12 sps:$4 sm:$0xff]   ;;  %1386 = vmatprep.subr.bf16.mxu1 %v1517_v11  ;;  %v1521_v14 = vld [vmem:[%s1696_s14 + $0x20] ss:$12 sps:$4 sm:$0xff]   ;;  %v1525_v15 = vld [vmem:[%s1696_s14 + $0x38] ss:$12 sps:$4 sm:$0xff]  }
  0x1b   : > { %1387 = vmatpush3.bf16.msra.mxu1 %v1517_v11  ;;  %v1510_v16 = vld [vmem:[%s1696_s14 + $0x60] ss:$12 sps:$4 sm:$0xff]   ;;  %v1511_v17 = vld [vmem:[%s1696_s14 + $0x7c] ss:$12 sps:$4 sm:$0xff]   ;;  %v1513_v19 = vld [vmem:[%s1696_s14 + $0x78] ss:$12 sps:$4 sm:$0xff]  }
  0x1c   : > { %1388 = vmatprep.subr.bf16.mxu1 %v1521_v14  ;;  %v1529_v18 = vld [vmem:[%s1696_s14 + $0x50] ss:$12 sps:$4 sm:$0xff]   ;;  %v1514_v20 = vld [vmem:[%s1696_s14 + $0x94] ss:$12 sps:$4 sm:$0xff]   ;;  %v1518_v23 = vld [vmem:[%s1696_s14 + $0xac] ss:$12 sps:$4 sm:$0xff]  }
  0x1d   : > { %503 = vmatpush1.bf16.msra.mxu0 %v1501_v7  ;;  %v1533_v21 = vld [vmem:[%s1696_s14 + $0x68] ss:$12 sps:$4 sm:$0xff]   ;;  %v1516_v22 = vld [vmem:[%s1696_s14 + $0x90] ss:$12 sps:$4 sm:$0xff]   ;;  %v1537_v24 = vld [vmem:[%s1696_s14 + $0x80] ss:$12 sps:$4 sm:$0xff]  }
  0x1e   : > { %504 = vmatprep.subr.bf16.mxu0 %v1502_v8  ;;  %v1520_v25 = vld [vmem:[%s1696_s14 + $0xa8] ss:$12 sps:$4 sm:$0xff]   ;;  %v1726_v26 = vld [vmem:[%s1711_s17 + $0x4] ss:$12 sps:$4 sm:$0xff]   ;;  %v1730_v28 = vld [vmem:[%s1711_s17] ss:$12 sps:$4 sm:$0xff]  }
  0x1f   : > { %1389 = vmatpush3.bf16.msra.mxu1 %v1521_v14  ;;  %v1541_v27 = vld [vmem:[%s1696_s14 + $0x98] ss:$12 sps:$4 sm:$0xff]   ;;  %v1734_v29 = vld [vmem:[%s1711_s17 + $0x1c] ss:$12 sps:$4 sm:$0xff]   ;;  %v1747_v33 = vld [vmem:[%s1711_s17 + $0x34] ss:$12 sps:$4 sm:$0xff]  }
  0x20   : > { %1390 = vmatprep.subr.bf16.mxu1 %v1525_v15  ;;  %v1545_v31 = vld [vmem:[%s1696_s14 + $0xb0] ss:$12 sps:$4 sm:$0xff]   ;;  %v1742_v32 = vld [vmem:[%s1711_s17 + $0x18] ss:$12 sps:$4 sm:$0xff]   ;;  %v1758_v37 = vld [vmem:[%s1711_s17 + $0x8] ss:$12 sps:$4 sm:$0xff]   ;;  %s316_s14 = scalar_lea.vmem %s2009_s5, %s1468_s30 }
  0x21   : > { %505 = vmatpush1.bf16.msra.mxu0 %v1504_v9  ;;  %v1751_v35 = vld [vmem:[%s1711_s17 + $0x30] ss:$12 sps:$4 sm:$0xff]   ;;  %v1755_v36 = vld [vmem:[%s1711_s17 + $0x4c] ss:$12 sps:$4 sm:$0xff]   ;;  %v1763_v39 = vld [vmem:[%s1711_s17 + $0x48] ss:$12 sps:$4 sm:$0xff]  }
  0x22   : > { %506 = vmatprep.subr.bf16.mxu0 %v1505_v10  ;;  %v1768_v40 = vld [vmem:[%s1711_s17 + $0x64] ss:$12 sps:$4 sm:$0xff]   ;;  %v1772_v41 = vld [vmem:[%s1711_s17 + $0x20] ss:$12 sps:$4 sm:$0xff]   ;;  %v1783_v43 = vld [vmem:[%s1711_s17 + $0x7c] ss:$12 sps:$4 sm:$0xff]  }
  0x23   : > { %1391 = vmatpush3.bf16.msra.mxu1 %v1525_v15  ;;  %v1779_v42 = vld [vmem:[%s1711_s17 + $0x60] ss:$12 sps:$4 sm:$0xff]   ;;  %v1787_v44 = vld [vmem:[%s1711_s17 + $0x38] ss:$12 sps:$4 sm:$0xff]   ;;  %v1801_v47 = vld [vmem:[%s1711_s17 + $0x50] ss:$12 sps:$4 sm:$0xff]  }
  0x24   : > { %1392 = vmatprep.subr.bf16.mxu1 %v1529_v18  ;;  %v1792_v45 = vld [vmem:[%s1711_s17 + $0x78] ss:$12 sps:$4 sm:$0xff]   ;;  %v1796_v46 = vld [vmem:[%s1711_s17 + $0x94] ss:$12 sps:$4 sm:$0xff]   ;;  %v1806_v48 = vld [vmem:[%s1711_s17 + $0x90] ss:$12 sps:$4 sm:$0xff]  }
  0x25   : > { %507 = vmatpush1.bf16.msra.mxu0 %v1507_v12  ;;  %v1810_v49 = vld [vmem:[%s1711_s17 + $0xac] ss:$12 sps:$4 sm:$0xff]   ;;  %v1817_v50 = vld [vmem:[%s1711_s17 + $0x68] ss:$12 sps:$4 sm:$0xff]   ;;  %v1846_v56 = vld [vmem:[%s1711_s17 + $0xb0] ss:$12 sps:$4 sm:$0xff]  }
  0x26   : > { %508 = vmatprep.subr.bf16.mxu0 %v1508_v13  ;;  %v1822_v51 = vld [vmem:[%s1711_s17 + $0xa8] ss:$12 sps:$4 sm:$0xff]   ;;  %v1829_v53 = vld [vmem:[%s1711_s17 + $0x80] ss:$12 sps:$4 sm:$0xff]   ;;  %v1838_v55 = vld [vmem:[%s1711_s17 + $0x98] ss:$12 sps:$4 sm:$0xff]  }
  0x27   : > { %1393 = vmatpush3.bf16.msra.mxu1 %v1529_v18  ;;  %v355_v60 = vld [vmem:[%s307_s9] sm:$0x7]  ;;  %v367_v8 = vsub.s32 2, %v1884_v58  ;;  %s1906_s11 = scalar_select %p642_p8, 0, 2 }
  0x28   : > { %1394 = vmatprep.subr.bf16.mxu1 %v1533_v21  ;;  %v360_v62 = vrot.slane %v355_v60, %v359_v59  ;;  %v364_v63 = vrot.slane %v355_v60, %v363_v61  ;;  %s292_s10 = sand.u32 1, %s1604_s21  }
  0x29   : > { %509 = vmatpush1.bf16.msra.mxu0 %v1510_v16  ;;  %v368_v10 = vrot.slane %v355_v60, %v367_v8  ;;  %s1347_s15 = smul.u32 24, %s1906_s11  ;;  %s1336_s18 = sshll.u32 %s1906_s11, 3 }
  0x2a   : > { %510 = vmatprep.subr.bf16.mxu0 %v1511_v17  ;;  %s1466_s17 = smul.u32 24, %s292_s10  ;;  %s1130_s11 = scalar_lea.vmem (%p1677_p4), %s2010_s6, %s1344_s7 }
  0x2b   : > { %1395 = vmatpush3.bf16.msra.mxu1 %v1533_v21  ;;  %s646_s16 = scalar_lea.vmem [#allocation2], %s1347_s15 }
  0x2c   : > { %1396 = vmatprep.subr.bf16.mxu1 %v1537_v24  ;;  %s1926_s19 = scalar_lea.vmem [#allocation3], %s1466_s17 }
  0x2d   : > { %511 = vmatpush1.bf16.msra.mxu0 %v1513_v19  ;;  %s898_s20 = scalar_lea.vmem %s1926_s19, %s1336_s18 [#allocation3] }
  0x2e   : > { %512 = vmatprep.subr.bf16.mxu0 %v1514_v20  ;;  %s1977_s21 = scalar_select %p642_p8, 2, 0 }
  0x2f   : > { %1397 = vmatpush3.bf16.msra.mxu1 %v1537_v24  ;;  %v640_v24 = vld [vmem:[%s316_s14] sm:$0x7] }
  0x30   : > { %1398 = vmatprep.subr.bf16.mxu1 %v1541_v27  ;;  %s1348_s23 = smul.u32 24, %s1977_s21  ;;  %s1343_s27 = sshll.u32 %s1977_s21, 3 }
  0x31   : > { %513 = vmatpush1.bf16.msra.mxu0 %v1516_v22  ;;  %s1120_s30 = scalar_lea.vmem %s1926_s19, %s1343_s27 [#allocation3] }
  0x32   : > { %514 = vmatprep.subr.bf16.mxu0 %v1518_v23  ;;  %s1012_s26 = scalar_lea.vmem [#allocation2], %s1348_s23 }
  0x33   : > { %1399 = vmatpush3.bf16.msra.mxu1 %v1541_v27 }
  0x34   : > { %1400 = vmatprep.subr.bf16.mxu1 %v1545_v31 }
  0x35   : > { %515 = vmatpush1.bf16.msra.mxu0 %v1520_v25  ;;  %v1914_v25 = vrot.slane %v640_v24, %v359_v59 }
  0x36   : > { %795 = vmatprep.subr.bf16.mxu0 %v1726_v26 }
  0x37   : > { %1401 = vmatpush3.bf16.msra.mxu1 %v1545_v31 }
  0x38   : > { %533 = vmatmul.mubr.bf16.vlgmr.msra.gmra.mrb[0].mxu0 %v321_v3  ;;  %1406 = vmatprep.subr.bf16.mxu1 %v1615_v38 }
  0x39   : > { %796 = vmatpush1.bf16.msra.mxu0 %v1730_v28  ;;  %542 = vmatprep.mubr.bf16.mxu0 %v1614_v2 }
  0x3a   : > { %797 = vmatprep.subr.bf16.mxu0 %v1734_v29  ;;  %1403 = vmatmul.mubr.bf16.vlgmr.msra.gmra.mrb[0].mxu1 %v322_v34 }
  0x3b   : > { %1407 = vmatpush3.bf16.msra.mxu1 %v1758_v37  ;;  %1422 = vmatprep.mubr.msk.bf16.mxu1 %vm1616_vm0, %v1615_v38 }
  0x3c   : > { %1408 = vmatprep.subr.bf16.mxu1 %v1615_v38 }
  0x3d   : > { %798 = vmatpush1.bf16.msra.mxu0 %v1742_v32 }
  0x3e   : > { %799 = vmatprep.subr.bf16.mxu0 %v1747_v33 }
  0x3f   : > { %1409 = vmatpush3.bf16.msra.mxu1 %v1772_v41 }
  0x40   : > { %543 = vmatmul.mubr.bf16.gmra.mrb[4].mxu0 %v322_v34  ;;  %1410 = vmatprep.subr.bf16.mxu1 %v1615_v38 }
  0x41   : > { %800 = vmatpush1.bf16.msra.mxu0 %v1751_v35  ;;  %827 = vmatprep.mubr.bf16.mxu0 %v1614_v2 }
  0x42   : > { %801 = vmatprep.subr.bf16.mxu0 %v1755_v36 }
  0x43   : > { %1411 = vmatpush3.bf16.msra.mxu1 %v1787_v44 }
  0x44   : > { %1412 = vmatprep.subr.bf16.mxu1 %v1615_v38 }
  0x45   : > { %802 = vmatpush1.bf16.msra.mxu0 %v1763_v39 }
  0x46   : > { %803 = vmatprep.subr.bf16.mxu0 %v1768_v40 }
  0x47   : > { %1413 = vmatpush3.bf16.msra.mxu1 %v1801_v47 }
  0x48   : > { %1414 = vmatprep.subr.bf16.mxu1 %v1615_v38 }
  0x49   : > { %804 = vmatpush1.bf16.msra.mxu0 %v1779_v42 }
  0x4a   : > { %805 = vmatprep.subr.bf16.mxu0 %v1783_v43 }
  0x4b   : > { %1415 = vmatpush3.bf16.msra.mxu1 %v1817_v50 }
  0x4c   : > { %1416 = vmatprep.subr.bf16.mxu1 %v1615_v38 }
  0x4d   : > { %806 = vmatpush1.bf16.msra.mxu0 %v1792_v45 }
  0x4e   : > { %807 = vmatprep.subr.bf16.mxu0 %v1796_v46 }
  0x4f   : > { %1417 = vmatpush3.bf16.msra.mxu1 %v1829_v53 }
  0x50   : > { %1418 = vmatprep.subr.bf16.mxu1 %v1615_v38 }
  0x51   : > { %808 = vmatpush1.bf16.msra.mxu0 %v1806_v48 }
  0x52   : > { %809 = vmatprep.subr.bf16.mxu0 %v1810_v49 }
  0x53   : > { %1419 = vmatpush3.bf16.msra.mxu1 %v1838_v55 }
  0x54   : > { %1420 = vmatprep.subr.bf16.mxu1 %v1615_v38 }
  0x55   : > { %810 = vmatpush1.bf16.msra.mxu0 %v1822_v51 }
  0x56   : > { %905 = vmatprep.subr.bf16.mxu0 %v1726_v26 }
  0x57   : > { %1421 = vmatpush3.bf16.msra.mxu1 %v1846_v56 }
  0x58   : > { %828 = vmatmul.mubr.bf16.vlgmr.msra.gmra.mrb[8].mxu0 %v650_v54  ;;  %1426 = vmatprep.subr.bf16.mxu1 %v1615_v38 }
  0x59   : > { %906 = vmatpush1.bf16.msra.mxu0 %v1730_v28  ;;  %937 = vmatprep.mubr.bf16.mxu0 %v1614_v2 }
  0x5a   : > { %907 = vmatprep.subr.bf16.mxu0 %v1734_v29  ;;  %1423 = vmatmul.mubr.bf16.vlgmr.msra.gmra.mrb[4].mxu1 %v650_v54 }
  0x5b   : > { %1427 = vmatpush3.bf16.msra.mxu1 %v1758_v37  ;;  %1442 = vmatprep.mubr.msk.bf16.mxu1 %vm1616_vm0, %v1615_v38 }
  0x5c   : > { %1428 = vmatprep.subr.bf16.mxu1 %v1615_v38 }
  0x5d   : > { %908 = vmatpush1.bf16.msra.mxu0 %v1742_v32 }
  0x5e   : > { %909 = vmatprep.subr.bf16.mxu0 %v1747_v33 }
  0x5f   : > { %1429 = vmatpush3.bf16.msra.mxu1 %v1772_v41 }
  0x60   : > { %1430 = vmatprep.subr.bf16.mxu1 %v1615_v38 }
  0x61   : > { %910 = vmatpush1.bf16.msra.mxu0 %v1751_v35 }
  0x62   : > { %911 = vmatprep.subr.bf16.mxu0 %v1755_v36 }
  0x63   : > { %1431 = vmatpush3.bf16.msra.mxu1 %v1787_v44 }
  0x64   : > { %1432 = vmatprep.subr.bf16.mxu1 %v1615_v38 }
  0x65   : > { %912 = vmatpush1.bf16.msra.mxu0 %v1763_v39 }
  0x66   : > { %913 = vmatprep.subr.bf16.mxu0 %v1768_v40 }
  0x67   : > { %1433 = vmatpush3.bf16.msra.mxu1 %v1801_v47 }
  0x68   : > { %1434 = vmatprep.subr.bf16.mxu1 %v1615_v38 }
  0x69   : > { %914 = vmatpush1.bf16.msra.mxu0 %v1779_v42 }
  0x6a   : > { %915 = vmatprep.subr.bf16.mxu0 %v1783_v43 }
  0x6b   : > { %1435 = vmatpush3.bf16.msra.mxu1 %v1817_v50 }
  0x6c   : > { %1436 = vmatprep.subr.bf16.mxu1 %v1615_v38 }
  0x6d   : > { %916 = vmatpush1.bf16.msra.mxu0 %v1792_v45 }
  0x6e   : > { %917 = vmatprep.subr.bf16.mxu0 %v1796_v46 }
  0x6f   : > { %1437 = vmatpush3.bf16.msra.mxu1 %v1829_v53 }
  0x70   : > { %1438 = vmatprep.subr.bf16.mxu1 %v1615_v38 }
  0x71   : > { %918 = vmatpush1.bf16.msra.mxu0 %v1806_v48 }
  0x72   : > { %919 = vmatprep.subr.bf16.mxu0 %v1810_v49 }
  0x73   : > { %1439 = vmatpush3.bf16.msra.mxu1 %v1838_v55 }
  0x74   : > { %1440 = vmatprep.subr.bf16.mxu1 %v1615_v38 }
  0x75   : > { %920 = vmatpush1.bf16.msra.mxu0 %v1822_v51 }
  0x76   : > { %1017 = vmatprep.subr.bf16.mxu0 %v1726_v26  ;;  %v1916_v26 = vrot.slane %v640_v24, %v363_v61 }
  0x77   : > { %1441 = vmatpush3.bf16.msra.mxu1 %v1846_v56 }
  0x78   : > { %1446 = vmatprep.subr.bf16.mxu1 %v1615_v38 }
 0x10b   : > { %v534_v0 = vpop.f32.mrb[0].mxu0 }
 0x10c   : > { %v535_v1 = vadd.f32 %v534_v0, %v360_v62  ;;  %v536_v3 = vpop.f32.mrb[1].mxu0 }
 0x10d   : > { %v537_v4 = vadd.f32 %v536_v3, %v364_v63  ;;  %v538_v5 = vpop.f32.mrb[2].mxu0  ;;  %v1404_v16 = vpop.f32.mrb[0].mxu1 }
 0x10e   : > { %599 = vst [vmem:[#allocation2] sm:$0xff] %v535_v1  ;;  %v1893_v6 = vadd.f32 %v538_v5, %v360_v62  ;;  %v540_v7 = vpop.f32.mrb[3].mxu0  ;;  %v594_v18 = vadd.f32 %v1404_v16, %v368_v10  ;;  %v585_v19 = vpop.f32.mrb[1].mxu1 }
 0x10f   : > { %600 = vst [vmem:[#allocation2 + $0x8] sm:$0xff] %v537_v4  ;;  %v1896_v9 = vadd.f32 %v540_v7, %v364_v63  ;;  %v586_v20 = vadd.f32 %v585_v19, %v368_v10  ;;  %v1405_v21 = vpop.f32.mrb[2].mxu1 }
 0x110   : > { %602 = vst [vmem:[#allocation2 + $0x18] sm:$0xff] %v1893_v6  ;;  %607 = vst [vmem:[#allocation2 + $0x40] sm:$0xff] %v594_v18  ;;  %v588_v22 = vpop.f32.mrb[3].mxu1 }
 0x111   : > { %603 = vst [vmem:[#allocation2 + $0x20] sm:$0xff] %v1896_v9  ;;  %601 = vst [vmem:[#allocation2 + $0x10] sm:$0xff] %v586_v20  ;;  %v1900_v23 = vadd.f32 %v588_v22, %v368_v10  ;;  %v1920_v10 = vrot.slane %v640_v24, %v367_v8 }
 0x113   : > { %v544_v11 = vpop.f32.mrb[4].mxu0  ;;  %604 = vst [vmem:[#allocation2 + $0x28] sm:$0xff] %v1900_v23 }
 0x114   : > { %v545_v12 = vadd.f32 %v544_v11, %v360_v62  ;;  %v546_v13 = vpop.f32.mrb[5].mxu0 }
 0x115   : > { %v547_v14 = vadd.f32 %v546_v13, %v364_v63  ;;  %v548_v15 = vpop.f32.mrb[6].mxu0 }
 0x116   : > { %605 = vst [vmem:[#allocation2 + $0x30] sm:$0xff] %v545_v12  ;;  %v549_v17 = vpop.f32.mrb[7].mxu0 }
 0x117   : > { %606 = vst [vmem:[#allocation2 + $0x38] sm:$0xff] %v547_v14 }
 0x11e   : > { %v647_v34 = vld [vmem:[%s646_s16] sm:$0xff]  ;;  %v648_v63 = vld [vmem:[%s646_s16 + $0x8] sm:$0xff]  ;;  %v649_v16 = vld [vmem:[%s646_s16 + $0x10] sm:$0xff] }
 0x12b   : > { %v829_v27 = vpop.f32.mrb[8].mxu0 }
 0x12c   : > { %v830_v30 = vadd.f32 %v829_v27, %v1914_v25  ;;  %v831_v31 = vpop.f32.mrb[9].mxu0 }
 0x12d   : > { %v832_v54 = vadd.f32 %v831_v31, %v1916_v26  ;;  %v833_v57 = vpop.f32.mrb[10].mxu0  ;;  %v870_v59 = vpop.f32.mrb[4].mxu1 }
 0x12e   : > { %v876_v58 = vadd.f32 %v830_v30, %v647_v34  ;;  %v834_v60 = vpop.f32.mrb[11].mxu0  ;;  %v1424_v3 = vpop.f32.mrb[5].mxu1  ;;  %v871_v13 = vadd.f32 %v870_v59, %v1920_v10  ;;  %v1013_v57 = vld [vmem:[%s1012_s26] sm:$0xff] }
 0x12f   : > { %v883_v0 = vadd.f32 %v832_v54, %v648_v63  ;;  %v873_v61 = vpop.f32.mrb[6].mxu1 }
 0x130   : > { %v1334_v62 = vmul.f32 -1.442695, %v876_v58  ;;  %v1425_v4 = vpop.f32.mrb[7].mxu1 }
 0x131   : > { %v1335_v1 = vmul.f32 -1.442695, %v883_v0  ;;  %v1014_v0 = vld [vmem:[%s1012_s26 + $0x8] sm:$0xff] }
 0x132   : > { %1560 = vpow2.f32 %v1334_v62 }
 0x133   : > { %1562 = vpow2.f32 %v1335_v1 }
 0x13c   : > { %v1561_v5 = vpop.eup %1560 }
 0x13d   : > { %v880_v7 = vadd.f32 1.0, %v1561_v5  ;;  %v1563_v11 = vpop.eup %1562 }
 0x13e   : > { %v887_v12 = vadd.f32 1.0, %v1563_v11 }
 0x13f   : > { %1564 = vrcp.f32 %v880_v7 }
 0x140   : > { %1566 = vrcp.f32 %v887_v12 }
 0x149   : > { %v1565_v14 = vpop.eup %1564 }
 0x14a   : > { %v890_v15 = vmul.f32 %v1565_v14, %v871_v13  ;;  %v1567_v18 = vpop.eup %1566  ;;  %v1015_v14 = vld [vmem:[%s1012_s26 + $0x10] sm:$0xff] }
 0x14b   : > { %v893_v19 = vsub.f32 1.0, %v1567_v18  ;;  %v895_v8 = vmul.f32 %v1567_v18, %v1824_v52 }
 0x14c   : > { %v891_v17 = vadd.f32 %v890_v15, %v649_v16 }
 0x14e   : > { %1568 = vtanh.f32 %v891_v17 }
 0x158   : > { %v1569_v20 = vpop.eup %1568 }
 0x159   : > { %v894_v21 = vmul.f32 %v1569_v20, %v893_v19 }
 0x15b   : > { %v1929_v22 = vadd.f32 %v895_v8, %v894_v21 }
 0x15d   : > { %899 = vst [vmem:[%s898_s20] sm:$0xff] %v1929_v22  ;;  %v904_v24 = vpack.c.bf16 %v1929_v22, %v1929_v22 }
 0x15f   : > { %938 = vmatmul.mubr.bf16.vlgmr.msra.gmra.mrb[12].mxu0 %v904_v24  ;;  %1443 = vmatmul.mubr.bf16.vlgmr.msra.gmra.mrb[8].mxu1 %v904_v24 }
 0x160   : > { %1018 = vmatpush1.bf16.msra.mxu0 %v1730_v28  ;;  %1447 = vmatpush3.bf16.msra.mxu1 %v1758_v37 }
 0x161   : > { %1019 = vmatprep.subr.bf16.mxu0 %v1734_v29  ;;  %1448 = vmatprep.subr.bf16.mxu1 %v1615_v38 }
 0x162   : > { %1049 = vmatprep.mubr.bf16.mxu0 %v1614_v2  ;;  %1462 = vmatprep.mubr.msk.bf16.mxu1 %vm1616_vm0, %v1615_v38 }
 0x164   : > { %1020 = vmatpush1.bf16.msra.mxu0 %v1742_v32  ;;  %1449 = vmatpush3.bf16.msra.mxu1 %v1772_v41 }
 0x165   : > { %1021 = vmatprep.subr.bf16.mxu0 %v1747_v33  ;;  %1450 = vmatprep.subr.bf16.mxu1 %v1615_v38 }
 0x168   : > { %1022 = vmatpush1.bf16.msra.mxu0 %v1751_v35  ;;  %1451 = vmatpush3.bf16.msra.mxu1 %v1787_v44 }
 0x169   : > { %1023 = vmatprep.subr.bf16.mxu0 %v1755_v36  ;;  %1452 = vmatprep.subr.bf16.mxu1 %v1615_v38 }
 0x16c   : > { %1024 = vmatpush1.bf16.msra.mxu0 %v1763_v39  ;;  %1453 = vmatpush3.bf16.msra.mxu1 %v1801_v47 }
 0x16d   : > { %1025 = vmatprep.subr.bf16.mxu0 %v1768_v40  ;;  %1454 = vmatprep.subr.bf16.mxu1 %v1615_v38 }
 0x170   : > { %1026 = vmatpush1.bf16.msra.mxu0 %v1779_v42  ;;  %1455 = vmatpush3.bf16.msra.mxu1 %v1817_v50 }
 0x171   : > { %1027 = vmatprep.subr.bf16.mxu0 %v1783_v43  ;;  %1456 = vmatprep.subr.bf16.mxu1 %v1615_v38 }
 0x174   : > { %1028 = vmatpush1.bf16.msra.mxu0 %v1792_v45  ;;  %1457 = vmatpush3.bf16.msra.mxu1 %v1829_v53 }
 0x175   : > { %1029 = vmatprep.subr.bf16.mxu0 %v1796_v46  ;;  %1458 = vmatprep.subr.bf16.mxu1 %v1615_v38 }
 0x178   : > { %1030 = vmatpush1.bf16.msra.mxu0 %v1806_v48  ;;  %1459 = vmatpush3.bf16.msra.mxu1 %v1838_v55 }
 0x179   : > { %1031 = vmatprep.subr.bf16.mxu0 %v1810_v49  ;;  %1460 = vmatprep.subr.bf16.mxu1 %v1615_v38 }
 0x17c   : > { %1032 = vmatpush1.bf16.msra.mxu0 %v1822_v51  ;;  %1461 = vmatpush3.bf16.msra.mxu1 %v1846_v56 }
 0x232   : > { %v939_v2 = vpop.f32.mrb[12].mxu0  ;;  %v980_v28 = vpop.f32.mrb[8].mxu1 }
 0x233   : > { %v940_v29 = vadd.f32 %v939_v2, %v1914_v25  ;;  %v941_v32 = vpop.f32.mrb[13].mxu0  ;;  %v1444_v33 = vpop.f32.mrb[9].mxu1  ;;  %v981_v48 = vadd.f32 %v980_v28, %v1920_v10 }
 0x234   : > { %v942_v35 = vadd.f32 %v941_v32, %v1916_v26  ;;  %v943_v36 = vpop.f32.mrb[14].mxu0  ;;  %v983_v37 = vpop.f32.mrb[10].mxu1 }
 0x235   : > { %v986_v39 = vadd.f32 %v940_v29, %v1893_v6  ;;  %v944_v40 = vpop.f32.mrb[15].mxu0  ;;  %v1445_v41 = vpop.f32.mrb[11].mxu1 }
 0x236   : > { %v993_v38 = vadd.f32 %v942_v35, %v1896_v9 }
 0x237   : > { %v1337_v42 = vmul.f32 -1.442695, %v986_v39 }
 0x238   : > { %v1338_v43 = vmul.f32 -1.442695, %v993_v38 }
 0x239   : > { %1570 = vpow2.f32 %v1337_v42 }
 0x23a   : > { %1572 = vpow2.f32 %v1338_v43 }
 0x243   : > { %v1571_v44 = vpop.eup %1570 }
 0x244   : > { %v990_v45 = vadd.f32 1.0, %v1571_v44  ;;  %v1573_v46 = vpop.eup %1572 }
 0x245   : > { %v997_v47 = vadd.f32 1.0, %v1573_v46 }
 0x246   : > { %1574 = vrcp.f32 %v990_v45 }
 0x247   : > { %1576 = vrcp.f32 %v997_v47 }
 0x250   : > { %v1575_v49 = vpop.eup %1574 }
 0x251   : > { %v1000_v50 = vmul.f32 %v1575_v49, %v981_v48  ;;  %v1577_v52 = vpop.eup %1576 }
 0x252   : > { %v1003_v53 = vsub.f32 1.0, %v1577_v52  ;;  %v1005_v6 = vmul.f32 %v1577_v52, %v1929_v22 }
 0x253   : > { %v1001_v51 = vadd.f32 %v1000_v50, %v1900_v23 }
 0x255   : > { %1578 = vtanh.f32 %v1001_v51 }
 0x25f   : > { %v1579_v55 = vpop.eup %1578 }
 0x260   : > { %v1004_v56 = vmul.f32 %v1579_v55, %v1003_v53 }
 0x262   : > { %v1006_v9 = vadd.f32 %v1005_v6, %v1004_v56 }
 0x264   : > { %1339 = vst [vmem:[%s1926_s19 + $0x8] sm:$0xff] %v1006_v9  ;;  %v1016_v27 = vpack.c.bf16 %v1006_v9, %v1006_v9 }
 0x266   : > { %1050 = vmatmul.mubr.bf16.vlgmr.msra.gmra.mrb[16].mxu0 %v1016_v27  ;;  %1463 = vmatmul.mubr.bf16.vlgmr.msra.gmra.mrb[12].mxu1 %v1016_v27 }
 0x339   : > { %v1051_v30 = vpop.f32.mrb[16].mxu0  ;;  %v1092_v31 = vpop.f32.mrb[12].mxu1 }
 0x33a   : > { %v1052_v23 = vadd.f32 %v1051_v30, %v1914_v25  ;;  %v1053_v34 = vpop.f32.mrb[17].mxu0  ;;  %v1464_v54 = vpop.f32.mrb[13].mxu1 }
 0x33b   : > { %v1054_v58 = vadd.f32 %v1053_v34, %v1916_v26  ;;  %v1055_v60 = vpop.f32.mrb[18].mxu0  ;;  %v1095_v62 = vpop.f32.mrb[14].mxu1  ;;  %v1093_v26 = vadd.f32 %v1092_v31, %v1920_v10 }
 0x33c   : > { %v1098_v63 = vadd.f32 %v1052_v23, %v1013_v57  ;;  %v1056_v1 = vpop.f32.mrb[19].mxu0  ;;  %v1465_v59 = vpop.f32.mrb[15].mxu1 }
 0x33d   : > { %v1105_v3 = vadd.f32 %v1054_v58, %v1014_v0 }
 0x33e   : > { %v1341_v61 = vmul.f32 -1.442695, %v1098_v63 }
 0x33f   : > { %v1342_v4 = vmul.f32 -1.442695, %v1105_v3 }
 0x340   : > { %1580 = vpow2.f32 %v1341_v61 }
 0x341   : > { %1582 = vpow2.f32 %v1342_v4 }
 0x34a   : > { %v1581_v5 = vpop.eup %1580 }
 0x34b   : > { %v1102_v25 = vadd.f32 1.0, %v1581_v5  ;;  %v1583_v7 = vpop.eup %1582 }
 0x34c   : > { %v1109_v11 = vadd.f32 1.0, %v1583_v7 }
 0x34d   : > { %1584 = vrcp.f32 %v1102_v25 }
 0x34e   : > { %1586 = vrcp.f32 %v1109_v11 }
 0x357   : > { %v1585_v12 = vpop.eup %1584 }
 0x358   : > { %v1112_v13 = vmul.f32 %v1585_v12, %v1093_v26  ;;  %v1587_v16 = vpop.eup %1586 }
 0x359   : > { %v1115_v17 = vsub.f32 1.0, %v1587_v16  ;;  %v1117_v20 = vmul.f32 %v1587_v16, %v1006_v9 }
 0x35a   : > { %v1113_v15 = vadd.f32 %v1112_v13, %v1015_v14 }
 0x35c   : > { %1588 = vtanh.f32 %v1113_v15 }
 0x365   : > { %1128 = sbr.rel (!%p1677_p4) target bundleno = 885 (0x375), region = 48 }
 0x366   : > { %v1589_v18 = vpop.eup %1588 }
 0x367   : > { %v1116_v19 = vmul.f32 %v1589_v18, %v1115_v17 }
 0x369   : > { %v1118_v21 = vadd.f32 %v1117_v20, %v1116_v19 }
 0x36b   : > { %1121 = vst [vmem:[%s1120_s30] sm:$0xff] %v1118_v21 }
 0x372   : > { %v1162_v10 = vld [vmem:[%s1926_s19] sm:$0xff]  ;;  %v1164_v8 = vld [vmem:[%s1926_s19 + $0x8] sm:$0xff]  ;;  %v1166_v22 = vld [vmem:[%s1926_s19 + $0x10] sm:$0xff] }
 0x373   : > { %1163 = vst [vmem:[%s1130_s11] sm:$0xff] %v1162_v10  ;;  %1165 = vst [vmem:[%s1130_s11 + $0x10] sm:$0xff] %v1164_v8 }
 0x374   : > { %1167 = vst [vmem:[%s1130_s11 + $0x20] sm:$0xff] %v1166_v22 }
 0x375 PF: > { %p13_p9 = scmp.ge.s32.totalorder %s1667_s25, 4   ;;  %s2012_s21 = smov %s1608_s22 }
 0x376   : > { %s2013_s22 = smov %s1675_s28  ;;  %s2014_s23 = smov %s1667_s25 }
 0x377   :  { %15 = sbr.rel (!%p13_p9) target bundleno = 2 (0x2), region = 130 }

// kernel: run.6
= control target key start
LH: loop header
LB: loop body
LE: loop exit
PB: predicated region body
PF: predicated region fallthrough
CT: control target
= control target key end

     0   :  { %s923_s1 = inlined_call_operand.vmem [shape: bf16[768,128], index: 1, kind: input, shape index: {}]   ;;  %s924_s0 = inlined_call_operand.vmem [shape: bf16[8,768], index: 0, kind: input, shape index: {}]   ;;  %s925_s2 = inlined_call_operand.vmem [shape: f32[1,128], index: 2, kind: input, shape index: {}]   ;;  %s926_s3 = inlined_call_operand.vmem [shape: f32[8,128], index: 3, kind: output, shape index: {}]  }
   0x1   :  { %v690_v0 = vld [vmem:[%s923_s1 + $0x40] sm:$0xff]   ;;  %v694_v4 = vld [vmem:[%s923_s1 + $0x48] sm:$0xff]   ;;  %v698_v8 = vld [vmem:[%s923_s1 + $0x50] sm:$0xff]  }
   0x2   :  { %v691_v1 = vld [vmem:[%s923_s1 + $0xc0] sm:$0xff]   ;;  %623 = vmatprep.subr.bf16.mxu0 %v690_v0  ;;  %v695_v5 = vld [vmem:[%s923_s1 + $0xc8] sm:$0xff]   ;;  %v699_v9 = vld [vmem:[%s923_s1 + $0xd0] sm:$0xff]  }
   0x3   :  { %v692_v2 = vld [vmem:[%s923_s1] sm:$0xff]   ;;  %645 = vmatprep.subr.bf16.mxu1 %v691_v1  ;;  %v696_v6 = vld [vmem:[%s923_s1 + $0x8] sm:$0xff]   ;;  %v700_v10 = vld [vmem:[%s923_s1 + $0x10] sm:$0xff]  }
   0x4   :  { %v693_v3 = vld [vmem:[%s923_s1 + $0x80] sm:$0xff]   ;;  %624 = vmatpush3.bf16.msra.mxu0 %v692_v2  ;;  %v697_v7 = vld [vmem:[%s923_s1 + $0x88] sm:$0xff]   ;;  %v701_v11 = vld [vmem:[%s923_s1 + $0x90] sm:$0xff]  }
   0x5   :  { %646 = vmatpush3.bf16.msra.mxu1 %v693_v3  ;;  %625 = vmatprep.subr.bf16.mxu0 %v694_v4  ;;  %v702_v12 = vld [vmem:[%s923_s1 + $0x58] sm:$0xff]   ;;  %v706_v16 = vld [vmem:[%s923_s1 + $0x60] sm:$0xff]   ;;  %v710_v20 = vld [vmem:[%s923_s1 + $0x68] sm:$0xff]  }
   0x6   :  { %647 = vmatprep.subr.bf16.mxu1 %v695_v5  ;;  %v703_v13 = vld [vmem:[%s923_s1 + $0xd8] sm:$0xff]   ;;  %v707_v17 = vld [vmem:[%s923_s1 + $0xe0] sm:$0xff]   ;;  %v711_v21 = vld [vmem:[%s923_s1 + $0xe8] sm:$0xff]  }
   0x7   :  { %v704_v14 = vld [vmem:[%s923_s1 + $0x18] sm:$0xff]   ;;  %v708_v18 = vld [vmem:[%s923_s1 + $0x20] sm:$0xff]   ;;  %v712_v22 = vld [vmem:[%s923_s1 + $0x28] sm:$0xff]  }
   0x8   :  { %626 = vmatpush3.bf16.msra.mxu0 %v696_v6  ;;  %v705_v15 = vld [vmem:[%s923_s1 + $0x98] sm:$0xff]   ;;  %v709_v19 = vld [vmem:[%s923_s1 + $0xa0] sm:$0xff]   ;;  %v713_v23 = vld [vmem:[%s923_s1 + $0xa8] sm:$0xff]  }
   0x9   :  { %648 = vmatpush3.bf16.msra.mxu1 %v697_v7  ;;  %627 = vmatprep.subr.bf16.mxu0 %v698_v8  ;;  %v714_v24 = vld [vmem:[%s923_s1 + $0x70] sm:$0xff]   ;;  %v718_v28 = vld [vmem:[%s923_s1 + $0x78] sm:$0xff]   ;;  %v21_v32 = vld [vmem:[%s924_s0] sm:$0xff] }
   0xa   :  { %649 = vmatprep.subr.bf16.mxu1 %v699_v9  ;;  %v715_v25 = vld [vmem:[%s923_s1 + $0xf0] sm:$0xff]   ;;  %v719_v29 = vld [vmem:[%s923_s1 + $0xf8] sm:$0xff]   ;;  %v22_v33 = vld [vmem:[%s924_s0 + $0x8] sm:$0xff]  ;;  %v568_v34 = vcombine.low %v21_v32, %v21_v32  ;;  %v569_v35 = vcombine.high %v21_v32, %v21_v32 }
   0xb   :  { %v716_v26 = vld [vmem:[%s923_s1 + $0x30] sm:$0xff]   ;;  %v720_v30 = vld [vmem:[%s923_s1 + $0x38] sm:$0xff]   ;;  %v570_v36 = vcombine.low %v22_v33, %v22_v33  ;;  %v571_v37 = vcombine.high %v22_v33, %v22_v33  ;;  %v726_v38 = vld [vmem:[%s923_s1 + $0x140] sm:$0xff]  }
   0xc   :  { %628 = vmatpush3.bf16.msra.mxu0 %v700_v10  ;;  %v717_v27 = vld [vmem:[%s923_s1 + $0xb0] sm:$0xff]   ;;  %v721_v31 = vld [vmem:[%s923_s1 + $0xb8] sm:$0xff]   ;;  %v727_v39 = vld [vmem:[%s923_s1 + $0x100] sm:$0xff]   ;;  %461 = vmatprep.mubr.bf16.mxu0 %v569_v35 }
   0xd   :  { %650 = vmatpush3.bf16.msra.mxu1 %v701_v11  ;;  %629 = vmatprep.subr.bf16.mxu0 %v702_v12  ;;  %v728_v40 = vld [vmem:[%s923_s1 + $0x148] sm:$0xff]   ;;  %v730_v42 = vld [vmem:[%s923_s1 + $0x150] sm:$0xff]   ;;  %v732_v44 = vld [vmem:[%s923_s1 + $0x158] sm:$0xff]  }
   0xe   :  { %651 = vmatprep.subr.bf16.mxu1 %v703_v13  ;;  %501 = vmatprep.mubr.bf16.mxu1 %v571_v37  ;;  %v729_v41 = vld [vmem:[%s923_s1 + $0x108] sm:$0xff]   ;;  %v731_v43 = vld [vmem:[%s923_s1 + $0x110] sm:$0xff]   ;;  %v733_v45 = vld [vmem:[%s923_s1 + $0x118] sm:$0xff]  }
   0xf   :  { %v734_v46 = vld [vmem:[%s923_s1 + $0x160] sm:$0xff]   ;;  %v23_v47 = vld [vmem:[%s924_s0 + $0x10] sm:$0xff]  ;;  %v736_v50 = vld [vmem:[%s923_s1 + $0x168] sm:$0xff]  }
  0x10   :  { %630 = vmatpush3.bf16.msra.mxu0 %v704_v14  ;;  %v573_v48 = vcombine.high %v23_v47, %v23_v47  ;;  %v735_v49 = vld [vmem:[%s923_s1 + $0x120] sm:$0xff]   ;;  %v737_v51 = vld [vmem:[%s923_s1 + $0x128] sm:$0xff]   ;;  %v738_v52 = vld [vmem:[%s923_s1 + $0x170] sm:$0xff]   ;;  %v572_v56 = vcombine.low %v23_v47, %v23_v47 }
  0x11   :  { %652 = vmatpush3.bf16.msra.mxu1 %v705_v15  ;;  %631 = vmatprep.subr.bf16.mxu0 %v706_v16  ;;  %v739_v53 = vld [vmem:[%s923_s1 + $0x130] sm:$0xff]   ;;  %v740_v54 = vld [vmem:[%s923_s1 + $0x178] sm:$0xff]   ;;  %v622_v10 = vld [vmem:[%s925_s2] ss:$0 sm:$0xff] }
  0x12   :  { %653 = vmatprep.subr.bf16.mxu1 %v707_v17  ;;  %v741_v55 = vld [vmem:[%s923_s1 + $0x138] sm:$0xff]  }
  0x14   :  { %632 = vmatpush3.bf16.msra.mxu0 %v708_v18 }
  0x15   :  { %654 = vmatpush3.bf16.msra.mxu1 %v709_v19  ;;  %633 = vmatprep.subr.bf16.mxu0 %v710_v20 }
  0x16   :  { %655 = vmatprep.subr.bf16.mxu1 %v711_v21 }
  0x18   :  { %634 = vmatpush3.bf16.msra.mxu0 %v712_v22 }
  0x19   :  { %656 = vmatpush3.bf16.msra.mxu1 %v713_v23  ;;  %635 = vmatprep.subr.bf16.mxu0 %v714_v24 }
  0x1a   :  { %657 = vmatprep.subr.bf16.mxu1 %v715_v25 }
  0x1c   :  { %636 = vmatpush3.bf16.msra.mxu0 %v716_v26 }
  0x1d   :  { %658 = vmatpush3.bf16.msra.mxu1 %v717_v27  ;;  %637 = vmatprep.subr.bf16.mxu0 %v718_v28 }
  0x1e   :  { %659 = vmatprep.subr.bf16.mxu1 %v719_v29 }
  0x20   :  { %638 = vmatpush3.bf16.msra.mxu0 %v720_v30 }
  0x21   :  { %660 = vmatpush3.bf16.msra.mxu1 %v721_v31  ;;  %667 = vmatprep.subr.bf16.mxu0 %v726_v38 }
  0x23   :  { %462 = vmatmul.mubr.bf16.vlgmr.msra.gmra.mrb[0].mxu0 %v568_v34 }
  0x24   :  { %502 = vmatmul.mubr.bf16.vlgmr.msra.gmra.mrb[0].mxu1 %v570_v36  ;;  %668 = vmatpush3.bf16.msra.mxu0 %v727_v39 }
  0x25   :  { %669 = vmatprep.subr.bf16.mxu0 %v728_v40  ;;  %541 = vmatprep.mubr.bf16.mxu0 %v573_v48 }
  0x28   :  { %670 = vmatpush3.bf16.msra.mxu0 %v729_v41 }
  0x29   :  { %671 = vmatprep.subr.bf16.mxu0 %v730_v42 }
  0x2c   :  { %672 = vmatpush3.bf16.msra.mxu0 %v731_v43 }
  0x2d   :  { %673 = vmatprep.subr.bf16.mxu0 %v732_v44 }
  0x30   :  { %674 = vmatpush3.bf16.msra.mxu0 %v733_v45 }
  0x31   :  { %675 = vmatprep.subr.bf16.mxu0 %v734_v46 }
  0x34   :  { %676 = vmatpush3.bf16.msra.mxu0 %v735_v49 }
  0x35   :  { %677 = vmatprep.subr.bf16.mxu0 %v736_v50 }
  0x38   :  { %678 = vmatpush3.bf16.msra.mxu0 %v737_v51 }
  0x39   :  { %679 = vmatprep.subr.bf16.mxu0 %v738_v52 }
  0x3c   :  { %680 = vmatpush3.bf16.msra.mxu0 %v739_v53 }
  0x3d   :  { %681 = vmatprep.subr.bf16.mxu0 %v740_v54 }
  0x40   :  { %682 = vmatpush3.bf16.msra.mxu0 %v741_v55 }
  0x43   :  { %542 = vmatmul.mubr.bf16.vlgmr.msra.gmra.mrb[4].mxu0 %v572_v56 }
  0xf6   :  { %v639_v57 = vpop.f32.mrb[0].mxu0 }
  0xf7   :  { %v661_v58 = vpop.f32.mrb[0].mxu1  ;;  %v640_v59 = vpop.f32.mrb[1].mxu0 }
  0xf8   :  { %v662_v60 = vpop.f32.mrb[1].mxu1  ;;  %v641_v61 = vadd.f32 %v640_v59, %v639_v57  ;;  %v642_v63 = vpop.f32.mrb[2].mxu0 }
  0xf9   :  { %v663_v62 = vadd.f32 %v662_v60, %v661_v58  ;;  %v664_v0 = vpop.f32.mrb[2].mxu1  ;;  %v643_v1 = vpop.f32.mrb[3].mxu0 }
  0xfa   :  { %v665_v2 = vpop.f32.mrb[3].mxu1 }
  0xfb   :  { %v504_v3 = vadd.f32 %v663_v62, %v641_v61 }
 0x116   :  { %v683_v4 = vpop.f32.mrb[4].mxu0 }
 0x117   :  { %v684_v5 = vpop.f32.mrb[5].mxu0 }
 0x118   :  { %v685_v6 = vadd.f32 %v684_v5, %v683_v4  ;;  %v686_v7 = vpop.f32.mrb[6].mxu0 }
 0x119   :  { %v687_v8 = vpop.f32.mrb[7].mxu0 }
 0x11a   :  { %v544_v9 = vadd.f32 %v685_v6, %v504_v3 }
 0x11c   :  { %v562_v11 = vadd.f32 %v622_v10, %v544_v9 }
 0x11e   :  { %563 = vst [vmem:[%s926_s3] sm:$0xff] %v562_v11 }

// kernel: squeeze.10
= control target key start
LH: loop header
LB: loop body
LE: loop exit
PB: predicated region body
PF: predicated region fallthrough
CT: control target
= control target key end

     0   :  { %vm7_vm0 = vcmask 23552   ;;  %s48_s0 = inlined_call_operand.vmem [shape: f32[2,6], index: 0, kind: input, shape index: {}]   ;;  %s49_s1 = inlined_call_operand.vmem [shape: f32[2,2,3], index: 1, kind: output, shape index: {}]  }
   0x1   :  { %v4_v0 = vld [vmem:[%s48_s0] sm:$0x3]  ;;  %s28_s0 = smov 125  }
   0x2   :  { %5 = vst [vmem:[#allocation1] sm:$0x3] %v4_v0 }
   0x9   :  { %v9_v1 = vld [vmem:[#allocation1] sm:$0x3]  }
   0xa   :  { %v6_v2 = vld [vmem:[#allocation1] sm:$0x3]   ;;  %10 = vrot.lane.b32.xlu0 %v9_v1, %s28_s0 }
   0xb   :  { %8 = vst.msk [vmem:[#allocation0] ss:$8 sm:$0x3] %vm7_vm0, %v6_v2  }
  0x7c   :  { %v11_v3 = vpop.permute.xlu0 %10  }
  0x7d   :  { %14 = vst.msk [vmem:[#allocation0 + $0x1] ss:$8 sm:$0x3] %vm7_vm0, %v11_v3  }
  0x84   :  { %v18_v4 = vld [vmem:[#allocation0] sm:$0x3]  ;;  %v22_v5 = vld [vmem:[#allocation0 + $0x8] sm:$0x3] }
  0x85   :  { %20 = vst [vmem:[%s49_s1] sm:$0x3] %v18_v4  ;;  %26 = vst [vmem:[%s49_s1 + $0x2] sm:$0x3] %v22_v5 }

// kernel: run.7
= control target key start
LH: loop header
LB: loop body
LE: loop exit
PB: predicated region body
PF: predicated region fallthrough
CT: control target
= control target key end

     0   :  { %v1249_v1 = vmov 0   ;;  %vm192_vm0 = vcmask 261120   ;;  %vm518_vm1 = vcmask 1046528   ;;  %vm562_vm2 = vcmask 1045504   ;;  %s1508_s1 = inlined_call_operand.vmem [shape: bf16[32,1792], index: 1, kind: input, shape index: {}]   ;;  %s1509_s0 = inlined_call_operand.vmem [shape: f32[16,32], index: 0, kind: input, shape index: {}]   ;;  %s1510_s3 = inlined_call_operand.vmem [shape: bf16[512,128], index: 3, kind: input, shape index: {}]   ;;  %s1511_s2 = inlined_call_operand.vmem [shape: f32[1,512], index: 2, kind: input, shape index: {}]   ;;  %s1512_s4 = inlined_call_operand.vmem [shape: f32[1,128], index: 4, kind: input, shape index: {}]   ;;  %s1513_s5 = inlined_call_operand.vmem [shape: f32[2,128], index: 5, kind: output, shape index: {}]  }
   0x1   :  { %v1175_v0 = vld [vmem:[%s1508_s1 + $0x4] ss:$56 sps:$4 sm:$0xff]   ;;  %228 = vmatprep.mubr.bf16.mxu0 %v1249_v1  ;;  %271 = vmatprep.mubr.bf16.mxu1 %v1249_v1  ;;  %v1179_v3 = vld [vmem:[%s1508_s1] ss:$56 sps:$4 sm:$0xff]   ;;  %v1181_v5 = vld [vmem:[%s1508_s1 + $0x74] ss:$56 sps:$4 sm:$0xff]  }
   0x2   :  { %v1177_v2 = vld [vmem:[%s1508_s1 + $0xc] ss:$56 sps:$4 sm:$0xff]   ;;  %196 = vmatprep.subr.bf16.mxu0 %v1175_v0  ;;  %v1180_v4 = vld [vmem:[%s1508_s1 + $0x8] ss:$56 sps:$4 sm:$0xff]   ;;  %v1183_v6 = vld [vmem:[%s1508_s1 + $0x7c] ss:$56 sps:$4 sm:$0xff]  }
   0x3   :  { %239 = vmatprep.subr.bf16.mxu1 %v1177_v2  ;;  %197 = vmatpush1.bf16.msra.mxu0 %v1179_v3  ;;  %v1185_v7 = vld [vmem:[%s1508_s1 + $0x70] ss:$56 sps:$4 sm:$0xff]   ;;  %v21_v9 = vld [vmem:[%s1509_s0] sm:$0xff]  ;;  %v1189_v13 = vld [vmem:[%s1508_s1 + $0x14] ss:$56 sps:$4 sm:$0xff]   ;;  %vm614_vm3 = vcmask 1044480  }
   0x4   :  { %240 = vmatpush1.bf16.msra.mxu1 %v1180_v4  ;;  %198 = vmatprep.subr.bf16.mxu0 %v1181_v5  ;;  %v1186_v8 = vld [vmem:[%s1508_s1 + $0x78] ss:$56 sps:$4 sm:$0xff]   ;;  %v22_v10 = vld [vmem:[%s1509_s0 + $0x8] sm:$0xff]  ;;  %v1192_v15 = vld [vmem:[%s1508_s1 + $0x1c] ss:$56 sps:$4 sm:$0xff]   ;;  %vm691_vm4 = vcmask 1041409  }
   0x5   :  { %241 = vmatprep.subr.bf16.mxu1 %v1183_v6  ;;  %v1187_v11 = vld [vmem:[%s1508_s1 + $0x10] ss:$56 sps:$4 sm:$0xff]   ;;  %v23_v12 = vpack.c.bf16 %v22_v10, %v21_v9  ;;  %v1195_v16 = vld [vmem:[%s1508_s1 + $0x84] ss:$56 sps:$4 sm:$0xff]   ;;  %v1193_v18 = vld [vmem:[%s1508_s1 + $0x80] ss:$56 sps:$4 sm:$0xff]  }
   0x6   :  { %v1190_v14 = vld [vmem:[%s1508_s1 + $0x18] ss:$56 sps:$4 sm:$0xff]   ;;  %v1198_v17 = vld [vmem:[%s1508_s1 + $0x8c] ss:$56 sps:$4 sm:$0xff]   ;;  %v1196_v19 = vld [vmem:[%s1508_s1 + $0x88] ss:$56 sps:$4 sm:$0xff]  }
   0x7   :  { %199 = vmatpush1.bf16.msra.mxu0 %v1185_v7  ;;  %v1201_v20 = vld [vmem:[%s1508_s1 + $0x24] ss:$56 sps:$4 sm:$0xff]   ;;  %v1199_v22 = vld [vmem:[%s1508_s1 + $0x20] ss:$56 sps:$4 sm:$0xff]   ;;  %v1207_v24 = vld [vmem:[%s1508_s1 + $0x94] ss:$56 sps:$4 sm:$0xff]  }
   0x8   :  { %242 = vmatpush1.bf16.msra.mxu1 %v1186_v8  ;;  %282 = vmatprep.subr.bf16.mxu0 %v1189_v13  ;;  %v1204_v21 = vld [vmem:[%s1508_s1 + $0x2c] ss:$56 sps:$4 sm:$0xff]   ;;  %v1202_v23 = vld [vmem:[%s1508_s1 + $0x28] ss:$56 sps:$4 sm:$0xff]   ;;  %v1210_v25 = vld [vmem:[%s1508_s1 + $0x9c] ss:$56 sps:$4 sm:$0xff]  }
   0x9   :  { %325 = vmatprep.subr.bf16.mxu1 %v1192_v15  ;;  %v1205_v26 = vld [vmem:[%s1508_s1 + $0x90] ss:$56 sps:$4 sm:$0xff]   ;;  %v1213_v28 = vld [vmem:[%s1508_s1 + $0x34] ss:$56 sps:$4 sm:$0xff]   ;;  %v1216_v30 = vld [vmem:[%s1508_s1 + $0xa4] ss:$56 sps:$4 sm:$0xff]  }
   0xa   :  { %1086 = vmatmul.mubr.msk.bf16.vlgmr.msra.gmra.mrb[0].mxu0 %vm192_vm0, %v23_v12  ;;  %v1208_v27 = vld [vmem:[%s1508_s1 + $0x98] ss:$56 sps:$4 sm:$0xff]   ;;  %v1217_v32 = vld [vmem:[%s1510_s3 + $0x40] sm:$0xff]   ;;  %v1219_v34 = vld [vmem:[%s1510_s3 + $0x48] sm:$0xff]   ;;  %vm674_vm5 = vcmask 1043456  }
   0xb   :  { %1087 = vmatmul.mubr.msk.bf16.vlgmr.msra.gmra.mrb[0].mxu1 %vm192_vm0, %v23_v12  ;;  %283 = vmatpush1.bf16.msra.mxu0 %v1187_v11  ;;  %v1211_v29 = vld [vmem:[%s1508_s1 + $0x30] ss:$56 sps:$4 sm:$0xff]   ;;  %v1214_v31 = vld [vmem:[%s1508_s1 + $0xa0] ss:$56 sps:$4 sm:$0xff]  }
   0xc   :  { %326 = vmatpush1.bf16.msra.mxu1 %v1190_v14  ;;  %284 = vmatprep.subr.bf16.mxu0 %v1195_v16  ;;  %v1218_v33 = vld [vmem:[%s1510_s3] sm:$0xff]   ;;  %v1220_v35 = vld [vmem:[%s1510_s3 + $0x8] sm:$0xff]   ;;  %v1221_v36 = vld [vmem:[%s1510_s3 + $0x50] sm:$0xff]  }
   0xd   :  { %327 = vmatprep.subr.bf16.mxu1 %v1198_v17  ;;  %314 = vmatprep.mubr.bf16.mxu0 %v1249_v1  ;;  %v1222_v37 = vld [vmem:[%s1510_s3 + $0x10] sm:$0xff]   ;;  %v1223_v38 = vld [vmem:[%s1510_s3 + $0x58] sm:$0xff]   ;;  %v1225_v40 = vld [vmem:[%s1510_s3 + $0x60] sm:$0xff]  }
   0xe   :  { %357 = vmatprep.mubr.bf16.mxu1 %v1249_v1  ;;  %v1224_v39 = vld [vmem:[%s1510_s3 + $0x18] sm:$0xff]   ;;  %v1226_v41 = vld [vmem:[%s1510_s3 + $0x20] sm:$0xff]   ;;  %v1229_v44 = vld [vmem:[%s1510_s3 + $0x68] sm:$0xff]  }
   0xf   :  { %285 = vmatpush1.bf16.msra.mxu0 %v1193_v18  ;;  %v1227_v42 = vld [vmem:[%s1510_s3 + $0xc0] sm:$0xff]   ;;  %v1230_v45 = vld [vmem:[%s1510_s3 + $0x28] sm:$0xff]   ;;  %v1233_v48 = vld [vmem:[%s1510_s3 + $0x70] sm:$0xff]  }
  0x10   :  { %328 = vmatpush1.bf16.msra.mxu1 %v1196_v19  ;;  %368 = vmatprep.subr.bf16.mxu0 %v1201_v20  ;;  %v1228_v43 = vld [vmem:[%s1510_s3 + $0x80] sm:$0xff]   ;;  %v1231_v46 = vld [vmem:[%s1510_s3 + $0xc8] sm:$0xff]   ;;  %v1234_v49 = vld [vmem:[%s1510_s3 + $0x30] sm:$0xff]  }
  0x11   :  { %411 = vmatprep.subr.bf16.mxu1 %v1204_v21  ;;  %v1232_v47 = vld [vmem:[%s1510_s3 + $0x88] sm:$0xff]   ;;  %v1235_v50 = vld [vmem:[%s1510_s3 + $0xd0] sm:$0xff]   ;;  %v1237_v52 = vld [vmem:[%s1510_s3 + $0x78] sm:$0xff]  }
  0x12   :  { %1088 = vmatmul.mubr.msk.bf16.vlgmr.msra.gmra.mrb[4].mxu0 %vm192_vm0, %v23_v12  ;;  %v1236_v51 = vld [vmem:[%s1510_s3 + $0x90] sm:$0xff]   ;;  %v1238_v53 = vld [vmem:[%s1510_s3 + $0x38] sm:$0xff]   ;;  %v1241_v56 = vld [vmem:[%s1510_s3 + $0xe0] sm:$0xff]  }
  0x13   :  { %1089 = vmatmul.mubr.msk.bf16.vlgmr.msra.gmra.mrb[4].mxu1 %vm192_vm0, %v23_v12  ;;  %369 = vmatpush1.bf16.msra.mxu0 %v1199_v22  ;;  %v1239_v54 = vld [vmem:[%s1510_s3 + $0xd8] sm:$0xff]   ;;  %v1242_v57 = vld [vmem:[%s1510_s3 + $0xa0] sm:$0xff]   ;;  %v1243_v58 = vld [vmem:[%s1510_s3 + $0xe8] sm:$0xff]  }
  0x14   :  { %412 = vmatpush1.bf16.msra.mxu1 %v1202_v23  ;;  %370 = vmatprep.subr.bf16.mxu0 %v1207_v24  ;;  %v1240_v55 = vld [vmem:[%s1510_s3 + $0x98] sm:$0xff]   ;;  %v1244_v59 = vld [vmem:[%s1510_s3 + $0xa8] sm:$0xff]   ;;  %v1245_v60 = vld [vmem:[%s1510_s3 + $0xf0] sm:$0xff]  }
  0x15   :  { %413 = vmatprep.subr.bf16.mxu1 %v1210_v25  ;;  %400 = vmatprep.mubr.bf16.mxu0 %v1249_v1  ;;  %v1246_v61 = vld [vmem:[%s1510_s3 + $0xb0] sm:$0xff]   ;;  %v1247_v62 = vld [vmem:[%s1510_s3 + $0xf8] sm:$0xff]   ;;  %v1093_v8 = vld [vmem:[%s1511_s2] ss:$0 sm:$0xff] }
  0x16   :  { %443 = vmatprep.mubr.bf16.mxu1 %v1249_v1  ;;  %v1248_v63 = vld [vmem:[%s1510_s3 + $0xb8] sm:$0xff]   ;;  %v1094_v23 = vld [vmem:[%s1511_s2 + $0x1] ss:$0 sm:$0xff] }
  0x17   :  { %371 = vmatpush1.bf16.msra.mxu0 %v1205_v26 }
  0x18   :  { %414 = vmatpush1.bf16.msra.mxu1 %v1208_v27  ;;  %454 = vmatprep.subr.bf16.mxu0 %v1213_v28 }
  0x19   :  { %1130 = vmatprep.subr.bf16.mxu1 %v1217_v32 }
  0x1a   :  { %1090 = vmatmul.mubr.msk.bf16.vlgmr.msra.gmra.mrb[8].mxu0 %vm192_vm0, %v23_v12 }
  0x1b   :  { %1091 = vmatmul.mubr.msk.bf16.vlgmr.msra.gmra.mrb[8].mxu1 %vm192_vm0, %v23_v12  ;;  %455 = vmatpush1.bf16.msra.mxu0 %v1211_v29 }
  0x1c   :  { %486 = vmatprep.mubr.bf16.mxu0 %v1249_v1  ;;  %456 = vmatprep.subr.bf16.mxu0 %v1216_v30 }
  0x1d   :  { %1131 = vmatpush3.bf16.msra.mxu1 %v1218_v33 }
  0x1e   :  { %1132 = vmatprep.subr.bf16.mxu1 %v1219_v34 }
  0x1f   :  { %457 = vmatpush1.bf16.msra.mxu0 %v1214_v31 }
  0x20   :  { %1152 = vmatprep.subr.bf16.mxu0 %v1227_v42 }
  0x21   :  { %1133 = vmatpush3.bf16.msra.mxu1 %v1220_v35 }
  0x22   :  { %1092 = vmatmul.mubr.msk.bf16.vlgmr.msra.gmra.mrb[12].mxu0 %vm192_vm0, %v23_v12  ;;  %1134 = vmatprep.subr.bf16.mxu1 %v1221_v36 }
  0x23   :  { %1153 = vmatpush3.bf16.msra.mxu0 %v1228_v43 }
  0x24   :  { %1154 = vmatprep.subr.bf16.mxu0 %v1231_v46 }
  0x25   :  { %1135 = vmatpush3.bf16.msra.mxu1 %v1222_v37 }
  0x26   :  { %1136 = vmatprep.subr.bf16.mxu1 %v1223_v38 }
  0x27   :  { %1155 = vmatpush3.bf16.msra.mxu0 %v1232_v47 }
  0x28   :  { %1156 = vmatprep.subr.bf16.mxu0 %v1235_v50 }
  0x29   :  { %1137 = vmatpush3.bf16.msra.mxu1 %v1224_v39 }
  0x2a   :  { %1138 = vmatprep.subr.bf16.mxu1 %v1225_v40 }
  0x2b   :  { %1157 = vmatpush3.bf16.msra.mxu0 %v1236_v51 }
  0x2c   :  { %1158 = vmatprep.subr.bf16.mxu0 %v1239_v54 }
  0x2d   :  { %1139 = vmatpush3.bf16.msra.mxu1 %v1226_v41 }
  0x2e   :  { %1140 = vmatprep.subr.bf16.mxu1 %v1229_v44 }
  0x2f   :  { %1159 = vmatpush3.bf16.msra.mxu0 %v1240_v55 }
  0x30   :  { %1160 = vmatprep.subr.bf16.mxu0 %v1241_v56 }
  0x31   :  { %1141 = vmatpush3.bf16.msra.mxu1 %v1230_v45 }
  0x32   :  { %1142 = vmatprep.subr.bf16.mxu1 %v1233_v48 }
  0x33   :  { %1161 = vmatpush3.bf16.msra.mxu0 %v1242_v57 }
  0x34   :  { %1162 = vmatprep.subr.bf16.mxu0 %v1243_v58 }
  0x35   :  { %1143 = vmatpush3.bf16.msra.mxu1 %v1234_v49 }
  0x36   :  { %1144 = vmatprep.subr.bf16.mxu1 %v1237_v52 }
  0x37   :  { %1163 = vmatpush3.bf16.msra.mxu0 %v1244_v59 }
  0x38   :  { %1164 = vmatprep.subr.bf16.mxu0 %v1245_v60 }
  0x39   :  { %1145 = vmatpush3.bf16.msra.mxu1 %v1238_v53  ;;  %v1095_v53 = vld [vmem:[%s1511_s2 + $0x2] ss:$0 sm:$0xff] }
  0x3b   :  { %1165 = vmatpush3.bf16.msra.mxu0 %v1246_v61 }
  0x3c   :  { %1166 = vmatprep.subr.bf16.mxu0 %v1247_v62 }
  0x3f   :  { %1167 = vmatpush3.bf16.msra.mxu0 %v1248_v63 }
  0xdd   :  { %v230_v0 = vpop.f32.mrb[0].mxu0 }
  0xde   :  { %v273_v1 = vpop.f32.mrb[0].mxu1  ;;  %v232_v2 = vpop.f32.mrb[1].mxu0 }
  0xdf   :  { %v275_v3 = vpop.f32.mrb[1].mxu1  ;;  %v501_v4 = vrot.slane %v232_v2, 1  ;;  %v234_v6 = vpop.f32.mrb[2].mxu0 }
  0xe0   :  { %v537_v5 = vrot.slane %v275_v3, 1  ;;  %v277_v7 = vpop.f32.mrb[2].mxu1  ;;  %v236_v9 = vpop.f32.mrb[3].mxu0 }
  0xe1   :  { %v279_v10 = vpop.f32.mrb[3].mxu1  ;;  %v505_v11 = vadd.f32 %v501_v4, %v230_v0  ;;  %v502_v13 = vrot.slane %v236_v9, 1 }
  0xe2   :  { %v541_v12 = vadd.f32 %v537_v5, %v273_v1  ;;  %v538_v14 = vrot.slane %v279_v10, 1 }
  0xe3   :  { %v514_v15 = vadd.f32 %v1093_v8, %v505_v11  ;;  %v506_v16 = vadd.f32 %v502_v13, %v234_v6 }
  0xe4   :  { %v542_v17 = vadd.f32 %v538_v14, %v277_v7 }
  0xe5   :  { %v516_v18 = vmax.f32 %v514_v15, 0.0  ;;  %v515_v19 = vadd.f32 %v1093_v8, %v506_v16  ;;  %v316_v20 = vpop.f32.mrb[4].mxu0 }
  0xe6   :  { %v359_v21 = vpop.f32.mrb[4].mxu1  ;;  %v545_v22 = vrot.slane %v316_v20, 2  ;;  %v318_v25 = vpop.f32.mrb[5].mxu0 }
  0xe7   :  { %v581_v24 = vrot.slane %v359_v21, 1  ;;  %v361_v26 = vpop.f32.mrb[5].mxu1  ;;  %v519_v27 = vsel %vm518_vm1, %v516_v18, -inf  ;;  %v517_v28 = vmax.f32 %v515_v19, 0.0  ;;  %v320_v30 = vpop.f32.mrb[6].mxu0 }
  0xe8   :  { %v589_v29 = vrot.slane %v361_v26, 2  ;;  %v363_v31 = vpop.f32.mrb[6].mxu1  ;;  %v520_v32 = vrot.slane %v519_v27, 4  ;;  %v549_v33 = vadd.f32 %v545_v22, %v541_v12  ;;  %v546_v35 = vrot.slane %v320_v30, 2  ;;  %v322_v36 = vpop.f32.mrb[7].mxu0 }
  0xe9   :  { %v585_v34 = vadd.f32 %v581_v24, %v318_v25  ;;  %v365_v37 = vpop.f32.mrb[7].mxu1  ;;  %v526_v38 = vsel %vm518_vm1, %v517_v28, -inf  ;;  %v582_v39 = vrot.slane %v363_v31, 1 }
  0xea   :  { %v590_v40 = vrot.slane %v365_v37, 2  ;;  %v521_v41 = vmax.f32 %v519_v27, %v520_v32  ;;  %v527_v42 = vrot.slane %v526_v38, 4  ;;  %v558_v43 = vadd.f32 %v1094_v23, %v549_v33 }
  0xeb   :  { %v593_v44 = vadd.f32 %v589_v29, %v585_v34  ;;  %v550_v45 = vadd.f32 %v546_v35, %v542_v17  ;;  %v586_v46 = vadd.f32 %v582_v39, %v322_v36 }
  0xec   :  { %v522_v47 = vrot.slane %v521_v41, 2  ;;  %v528_v48 = vmax.f32 %v526_v38, %v527_v42  ;;  %v560_v49 = vmax.f32 %v558_v43, 0.0 }
  0xed   :  { %v559_v50 = vadd.f32 %v1094_v23, %v550_v45  ;;  %v594_v51 = vadd.f32 %v590_v40, %v586_v46  ;;  %v402_v52 = vpop.f32.mrb[8].mxu0  ;;  %v1096_v45 = vld [vmem:[%s1511_s2 + $0x3] ss:$0 sm:$0xff] }
  0xee   :  { %v445_v54 = vpop.f32.mrb[8].mxu1  ;;  %v523_v55 = vmax.f32 %v521_v41, %v522_v47  ;;  %v529_v56 = vrot.slane %v528_v48, 2  ;;  %v563_v57 = vsel %vm562_vm2, %v560_v49, -inf  ;;  %v597_v58 = vrot.slane %v402_v52, 3  ;;  %v404_v59 = vpop.f32.mrb[9].mxu0 }
  0xef   :  { %v447_v60 = vpop.f32.mrb[9].mxu1  ;;  %v564_v61 = vrot.slane %v563_v57, 4  ;;  %v561_v62 = vmax.f32 %v559_v50, 0.0  ;;  %v633_v63 = vrot.slane %v445_v54, 1  ;;  %v406_v1 = vpop.f32.mrb[10].mxu0 }
  0xf0   :  { %v641_v0 = vrot.slane %v447_v60, 2  ;;  %v449_v2 = vpop.f32.mrb[10].mxu1  ;;  %v524_v3 = vrot.slane %v523_v55, 1  ;;  %v530_v4 = vmax.f32 %v528_v48, %v529_v56  ;;  %v601_v5 = vadd.f32 %v597_v58, %v593_v44  ;;  %v408_v7 = vpop.f32.mrb[11].mxu0 }
  0xf1   :  { %v598_v6 = vrot.slane %v406_v1, 3  ;;  %v451_v8 = vpop.f32.mrb[11].mxu1  ;;  %v565_v9 = vmax.f32 %v563_v57, %v564_v61  ;;  %v570_v10 = vsel %vm562_vm2, %v561_v62, -inf  ;;  %v637_v11 = vadd.f32 %v633_v63, %v404_v59 }
  0xf2   :  { %v634_v12 = vrot.slane %v449_v2, 1  ;;  %v531_v13 = vrot.slane %v530_v4, 1  ;;  %v571_v14 = vrot.slane %v570_v10, 4  ;;  %v610_v15 = vadd.f32 %v1095_v53, %v601_v5 }
  0xf3   :  { %v566_v16 = vrot.slane %v565_v9, 2  ;;  %v645_v17 = vadd.f32 %v641_v0, %v637_v11  ;;  %v602_v18 = vadd.f32 %v598_v6, %v594_v51  ;;  %v642_v23 = vrot.slane %v451_v8, 2 }
  0xf4   :  { %v638_v19 = vadd.f32 %v634_v12, %v408_v7  ;;  %v532_v20 = vmax.f32 %v530_v4, %v531_v13  ;;  %v572_v21 = vmax.f32 %v570_v10, %v571_v14  ;;  %v612_v22 = vmax.f32 %v610_v15, 0.0 }
  0xf5   :  { %v525_v24 = vmax.f32 %v523_v55, %v524_v3  ;;  %v567_v25 = vmax.f32 %v565_v9, %v566_v16  ;;  %v611_v26 = vadd.f32 %v1095_v53, %v602_v18  ;;  %v488_v27 = vpop.f32.mrb[12].mxu0 }
  0xf6   :  { %v573_v28 = vrot.slane %v572_v21, 2  ;;  %v615_v29 = vsel %vm614_vm3, %v612_v22, -inf  ;;  %v646_v30 = vadd.f32 %v642_v23, %v638_v19  ;;  %v649_v31 = vrot.slane %v488_v27, 3  ;;  %v490_v32 = vpop.f32.mrb[13].mxu0 }
  0xf7   :  { %v616_v33 = vrot.slane %v615_v29, 4  ;;  %v613_v34 = vmax.f32 %v611_v26, 0.0  ;;  %v657_v35 = vrot.slane %v490_v32, 4  ;;  %v492_v36 = vpop.f32.mrb[14].mxu0  ;;  %v568_v37 = vrot.slane %v567_v25, 1 }
  0xf8   :  { %v574_v38 = vmax.f32 %v572_v21, %v573_v28  ;;  %v653_v39 = vadd.f32 %v649_v31, %v645_v17  ;;  %v650_v40 = vrot.slane %v492_v36, 3  ;;  %v494_v41 = vpop.f32.mrb[15].mxu0  ;;  %v692_v42 = vsel %vm691_vm4, %v532_v20, %v525_v24 }
  0xf9   :  { %v617_v43 = vmax.f32 %v615_v29, %v616_v33  ;;  %v622_v44 = vsel %vm614_vm3, %v613_v34, -inf  ;;  %v658_v46 = vrot.slane %v494_v41, 4  ;;  %v569_v52 = vmax.f32 %v567_v25, %v568_v37  ;;  %v1097_v29 = vld [vmem:[%s1512_s4] ss:$0 sm:$0xff] }
  0xfa   :  { %v623_v47 = vrot.slane %v622_v44, 4  ;;  %v661_v48 = vadd.f32 %v657_v35, %v653_v39  ;;  %v654_v49 = vadd.f32 %v650_v40, %v646_v30  ;;  %v575_v50 = vrot.slane %v574_v38, 1 }
  0xfb   :  { %v618_v51 = vrot.slane %v617_v43, 2  ;;  %v706_v63 = vpack.c.bf16 %v692_v42, %v692_v42 }
  0xfc   :  { %v624_v53 = vmax.f32 %v622_v44, %v623_v47  ;;  %v670_v54 = vadd.f32 %v1096_v45, %v661_v48  ;;  %v662_v55 = vadd.f32 %v658_v46, %v654_v49  ;;  %v576_v56 = vmax.f32 %v574_v38, %v575_v50 }
  0xfd   :  { %v619_v57 = vmax.f32 %v617_v43, %v618_v51 }
  0xfe   :  { %v625_v58 = vrot.slane %v624_v53, 2  ;;  %v672_v59 = vmax.f32 %v670_v54, 0.0  ;;  %v671_v60 = vadd.f32 %v1096_v45, %v662_v55  ;;  %v696_v61 = vsel %vm691_vm4, %v576_v56, %v569_v52 }
  0xff   :  { %v707_v62 = vpack.c.bf16 %v696_v61, %v696_v61  ;;  %v620_v0 = vrot.slane %v619_v57, 1 }
 0x100   :  { %v626_v1 = vmax.f32 %v624_v53, %v625_v58  ;;  %v675_v2 = vsel %vm674_vm5, %v672_v59, -inf  ;;  %v673_v3 = vmax.f32 %v671_v60, 0.0 }
 0x101   :  { %v676_v4 = vrot.slane %v675_v2, 4  ;;  %1005 = vmatprep.mubr.bf16.mxu1 %v707_v62  ;;  %v621_v9 = vmax.f32 %v619_v57, %v620_v0 }
 0x102   :  { %v627_v5 = vrot.slane %v626_v1, 1  ;;  %v682_v6 = vsel %vm674_vm5, %v673_v3, -inf  ;;  %1006 = vmatmul.mubr.bf16.vlgmr.msra.gmra.mrb[12].mxu1 %v706_v63 }
 0x103   :  { %v677_v7 = vmax.f32 %v675_v2, %v676_v4  ;;  %v683_v8 = vrot.slane %v682_v6, 4 }
 0x104   :  { %v628_v10 = vmax.f32 %v626_v1, %v627_v5 }
 0x105   :  { %v678_v11 = vrot.slane %v677_v7, 2  ;;  %v684_v12 = vmax.f32 %v682_v6, %v683_v8 }
 0x106   :  { %v700_v13 = vsel %vm691_vm4, %v628_v10, %v621_v9 }
 0x107   :  { %v679_v14 = vmax.f32 %v677_v7, %v678_v11  ;;  %v685_v15 = vrot.slane %v684_v12, 2  ;;  %v708_v23 = vpack.c.bf16 %v700_v13, %v700_v13 }
 0x109   :  { %v686_v16 = vmax.f32 %v684_v12, %v685_v15  ;;  %v680_v17 = vrot.slane %v679_v14, 1 }
 0x10b   :  { %v687_v18 = vrot.slane %v686_v16, 1  ;;  %v681_v19 = vmax.f32 %v679_v14, %v680_v17 }
 0x10d   :  { %v688_v20 = vmax.f32 %v686_v16, %v687_v18 }
 0x10f   :  { %v704_v21 = vsel %vm691_vm4, %v688_v20, %v681_v19 }
 0x110   :  { %v709_v22 = vpack.c.bf16 %v704_v21, %v704_v21 }
 0x112   :  { %1045 = vmatprep.mubr.bf16.mxu0 %v709_v22 }
 0x113   :  { %1046 = vmatmul.mubr.bf16.vlgmr.msra.gmra.mrb[16].mxu0 %v708_v23 }
 0x1d5   :  { %v1146_v24 = vpop.f32.mrb[12].mxu1 }
 0x1d6   :  { %v1147_v25 = vpop.f32.mrb[13].mxu1 }
 0x1d7   :  { %v1148_v26 = vadd.f32 %v1147_v25, %v1146_v24  ;;  %v1149_v27 = vpop.f32.mrb[14].mxu1 }
 0x1d8   :  { %v1150_v28 = vpop.f32.mrb[15].mxu1 }
 0x1d9   :  { %v1008_v32 = vadd.f32 %v1148_v26, %v1097_v29 }
 0x1e6   :  { %v1168_v30 = vpop.f32.mrb[16].mxu0 }
 0x1e7   :  { %v1169_v31 = vpop.f32.mrb[17].mxu0 }
 0x1e8   :  { %v1170_v33 = vadd.f32 %v1169_v31, %v1168_v30  ;;  %v1171_v34 = vpop.f32.mrb[18].mxu0 }
 0x1e9   :  { %v1172_v35 = vpop.f32.mrb[19].mxu0 }
 0x1ea   :  { %v1048_v36 = vadd.f32 %v1170_v33, %v1008_v32 }
 0x1ec   :  { %1053 = vst [vmem:[%s1513_s5] sm:$0x3] %v1048_v36 }

// kernel: squeeze.8
= control target key start
LH: loop header
LB: loop body
LE: loop exit
PB: predicated region body
PF: predicated region fallthrough
CT: control target
= control target key end

     0   :  { %s85_s0 = inlined_call_operand.vmem [shape: f32[6], index: 0, kind: input, shape index: {}]   ;;  %s86_s1 = inlined_call_operand.hbm [shape: f32[2,3], index: 1, kind: output, shape index: {}]  }
   0x1   :  { %v5_v0 = vld [vmem:[%s85_s0] sm:$0x1] }
   0x2   :  { %2 = vsyncpa [#allocation1], 0  ;;  %6 = vst [vmem:[#allocation3] sm:$0x1] %v5_v0  ;;  %vm8_vm0 = vcmask 23552   ;;  %s58_s0 = smov 125  }
   0x3   :  { %s59_s8 = smov [#allocation0]  }
   0x4   :  { %s26_s9 = sshll.u32 %s59_s8, 4  ;;  %s27_s9 = int_to_ptr.vmem [resolvable:$true] %s26_s9 }
   0x5   :  { %s34_s10 = scalar_lea.vmem %s27_s9, 32  ;;  %p39_p1 = scmp.lt.s32.totalorder %s27_s9, %s27_s9 }
   0x6   :  { %p35_p0 = scmp.ne.s32.totalorder %s27_s9, %s34_s10  ;;  %p40_p2 = scmp.lt.s32.totalorder %s34_s10, %s34_s10 }
   0x8   :  { %p41_p3 = por %p40_p2, %p39_p1 }
   0x9   :  { %v10_v1 = vld [vmem:[#allocation3] sm:$0x1]  }
   0xa   :  { %v7_v2 = vld [vmem:[#allocation3] sm:$0x1]   ;;  %11 = vrot.lane.b32.xlu0 %v10_v1, %s58_s0  ;;  %p42_p4 = pnand %p41_p3, %p35_p0 }
   0xb   :  { %9 = vst.msk [vmem:[#allocation2] sm:$0x1] %vm8_vm0, %v7_v2  }
  0x7c   :  { %v12_v3 = vpop.permute.xlu0 %11  }
  0x7d   :  { %15 = vst.msk [vmem:[#allocation2 + $0x1] sm:$0x1] %vm8_vm0, %v12_v3  }
  0x84   :  { %v19_v4 = vld [vmem:[#allocation2] sm:$0x3] }
  0x85   :  { %21 = vst [vmem:[#allocation0] sm:$0x3] %v19_v4 }
  0x86   :  { %45 = shalt.err (!%p42_p4)
}
  0x87   :  { %s46_s13 = scalar_lea.hbm %s86_s1, 32 }
  0x88   :  { %p47_p5 = scmp.ne.s32.totalorder %s86_s1, %s46_s13  ;;  %p50_p6 = scmp.lt.u32.totalorder %s46_s13, %s86_s1 }
  0x8a   :  { %p52_p7 = pnand %p50_p6, %p47_p5 }
  0x8c   :  { %55 = shalt.err (!%p52_p7)
}
  0x8d   :  { %29 = dma.vmem_to_hbm [thread:$0]  %s27_s9, 32, %s86_s1, [#allocation1]  }
  0x8e   :  { %56 = dma.done.wait [#allocation1], 32  }
  0x8f   :  { %57 = vsyncadd [#allocation1], 4294967264 }
  0x90   :  { %31 = vsyncpa [#allocation1], 1 }

// kernel: run.11
= control target key start
LH: loop header
LB: loop body
LE: loop exit
PB: predicated region body
PF: predicated region fallthrough
CT: control target
= control target key end

     0   :  { %v1326_v1 = vmov 0.0   ;;  %vm1327_vm0 = vmmov 0   ;;  %v1328_v30 = vmov 0.0|0.0   ;;  %vm343_vm5 = vcmask 7168   ;;  %s1720_s1 = inlined_call_operand.vmem [shape: bf16[2,256,128], index: 1, kind: input, shape index: {}]   ;;  %s1721_s0 = inlined_call_operand.vmem [shape: f32[2,8,256], index: 0, kind: input, shape index: {}]   ;;  %s1722_s3 = inlined_call_operand.vmem [shape: bf16[2,128,128], index: 3, kind: input, shape index: {}]   ;;  %s1723_s5 = inlined_call_operand.vmem [shape: f32[2,128,128], index: 5, kind: input, shape index: {}]   ;;  %s1724_s2 = inlined_call_operand.vmem [shape: f32[2,1,128], index: 2, kind: input, shape index: {}]   ;;  %s1725_s4 = inlined_call_operand.vmem [shape: f32[2,1,128], index: 4, kind: input, shape index: {}]   ;;  %s1726_s6 = inlined_call_operand.vmem [shape: s32[2,8,1], index: 6, kind: input, shape index: {}]   ;;  %s1727_s7 = inlined_call_operand.vmem [shape: f32[2,8,1], index: 7, kind: output, shape index: {0}]   ;;  %s1728_s8 = inlined_call_operand.vmem [shape: f32[2,8,1], index: 8, kind: output, shape index: {1}]  }
   0x1   :  { %v1262_v0 = vld [vmem:[%s1720_s1 + $0x40] sm:$0xff]   ;;  %1098 = vmatprep.subr.bf16.mxu1 %v1326_v1  ;;  %v1264_v3 = vld [vmem:[%s1720_s1 + $0x48] sm:$0xff]   ;;  %v1266_v5 = vld [vmem:[%s1720_s1 + $0x50] sm:$0xff]   ;;  %1114 = vmatprep.mubr.msk.bf16.mxu1 %vm1327_vm0, %v1326_v1 }
   0x2   :  { %v1263_v2 = vld [vmem:[%s1720_s1] sm:$0xff]   ;;  %1002 = vmatprep.subr.bf16.mxu0 %v1262_v0  ;;  %v1265_v4 = vld [vmem:[%s1720_s1 + $0x8] sm:$0xff]   ;;  %v1267_v6 = vld [vmem:[%s1720_s1 + $0x10] sm:$0xff]  }
   0x3   :  { %1003 = vmatpush3.bf16.msra.mxu0 %v1263_v2  ;;  %v1268_v7 = vld [vmem:[%s1720_s1 + $0x58] sm:$0xff]   ;;  %v1270_v9 = vld [vmem:[%s1720_s1 + $0x60] sm:$0xff]   ;;  %v1272_v11 = vld [vmem:[%s1720_s1 + $0x68] sm:$0xff]  }
   0x4   :  { %1004 = vmatprep.subr.bf16.mxu0 %v1264_v3  ;;  %v1269_v8 = vld [vmem:[%s1720_s1 + $0x18] sm:$0xff]   ;;  %v1271_v10 = vld [vmem:[%s1720_s1 + $0x20] sm:$0xff]   ;;  %v30_v12 = vld [vmem:[%s1721_s0 + $0x8] sm:$0xff] }
   0x5   :  { %v32_v13 = vpack.c.bf16 %v30_v12, %v30_v12  ;;  %v1278_v14 = vld [vmem:[%s1722_s3] sm:$0xff]   ;;  %v1273_v15 = vld [vmem:[%s1720_s1 + $0x28] sm:$0xff]   ;;  %v1274_v16 = vld [vmem:[%s1720_s1 + $0x70] sm:$0xff]  }
   0x6   :  { %1099 = vmatpush3.bf16.msra.mxu1 %v1278_v14  ;;  %v1279_v17 = vld [vmem:[%s1722_s3 + $0x8] sm:$0xff]   ;;  %v1275_v18 = vld [vmem:[%s1720_s1 + $0x30] sm:$0xff]   ;;  %v1276_v19 = vld [vmem:[%s1720_s1 + $0x78] sm:$0xff]  }
   0x7   :  { %1005 = vmatpush3.bf16.msra.mxu0 %v1265_v4  ;;  %200 = vmatprep.mubr.bf16.mxu0 %v32_v13  ;;  %v1280_v20 = vld [vmem:[%s1722_s3 + $0x10] sm:$0xff]   ;;  %v1277_v21 = vld [vmem:[%s1720_s1 + $0x38] sm:$0xff]   ;;  %v29_v22 = vld [vmem:[%s1721_s0] sm:$0xff] }
   0x8   :  { %1006 = vmatprep.subr.bf16.mxu0 %v1266_v5  ;;  %1100 = vmatprep.subr.bf16.mxu1 %v1326_v1  ;;  %v1281_v23 = vld [vmem:[%s1722_s3 + $0x18] sm:$0xff]   ;;  %v31_v24 = vpack.c.bf16 %v29_v22, %v29_v22  ;;  %v1282_v25 = vld [vmem:[%s1722_s3 + $0x20] sm:$0xff]   ;;  %v1283_v26 = vld [vmem:[%s1722_s3 + $0x28] sm:$0xff]  }
   0x9   :  { %v1284_v27 = vld [vmem:[%s1722_s3 + $0x30] sm:$0xff]   ;;  %v1285_v28 = vld [vmem:[%s1722_s3 + $0x38] sm:$0xff]   ;;  %v1286_v29 = vld [vmem:[%s1720_s1 + $0xc0] sm:$0xff]  }
   0xa   :  { %1101 = vmatpush3.bf16.msra.mxu1 %v1279_v17  ;;  %v345_v31 = vld [vmem:[%s1723_s5] sm:$0xff]  ;;  %v346_v32 = vld [vmem:[%s1723_s5 + $0x8] sm:$0xff]  ;;  %v347_v33 = vld [vmem:[%s1723_s5 + $0x10] sm:$0xff] }
   0xb   :  { %1007 = vmatpush3.bf16.msra.mxu0 %v1267_v6  ;;  %1102 = vmatprep.subr.bf16.mxu1 %v1326_v1  ;;  %v1209_v34 = vpack.c.bf16 %v346_v32, %v345_v31  ;;  %v348_v35 = vld [vmem:[%s1723_s5 + $0x18] sm:$0xff]  ;;  %v349_v37 = vld [vmem:[%s1723_s5 + $0x20] sm:$0xff]  ;;  %v350_v38 = vld [vmem:[%s1723_s5 + $0x28] sm:$0xff] }
   0xc   :  { %1008 = vmatprep.subr.bf16.mxu0 %v1268_v7  ;;  %v1212_v36 = vpack.c.bf16 %v348_v35, %v347_v33  ;;  %v1215_v39 = vpack.c.bf16 %v350_v38, %v349_v37  ;;  %v351_v40 = vld [vmem:[%s1723_s5 + $0x30] sm:$0xff]  ;;  %v352_v41 = vld [vmem:[%s1723_s5 + $0x38] sm:$0xff]  ;;  %v353_v43 = vld [vmem:[%s1723_s5 + $0x40] sm:$0xff] }
   0xd   :  { %v1218_v42 = vpack.c.bf16 %v352_v41, %v351_v40  ;;  %v354_v44 = vld [vmem:[%s1723_s5 + $0x48] sm:$0xff]  ;;  %v355_v46 = vld [vmem:[%s1723_s5 + $0x50] sm:$0xff]  ;;  %v356_v47 = vld [vmem:[%s1723_s5 + $0x58] sm:$0xff] }
   0xe   :  { %1103 = vmatpush3.bf16.msra.mxu1 %v1280_v20  ;;  %v1221_v45 = vpack.c.bf16 %v354_v44, %v353_v43  ;;  %v1224_v48 = vpack.c.bf16 %v356_v47, %v355_v46  ;;  %v357_v49 = vld [vmem:[%s1723_s5 + $0x60] sm:$0xff]  ;;  %v358_v50 = vld [vmem:[%s1723_s5 + $0x68] sm:$0xff]  ;;  %v906_v57 = vld [vmem:[%s1721_s0 + $0x18] sm:$0xff] }
   0xf   :  { %1009 = vmatpush3.bf16.msra.mxu0 %v1269_v8  ;;  %1104 = vmatprep.subr.bf16.mxu1 %v1326_v1  ;;  %v1227_v51 = vpack.c.bf16 %v358_v50, %v357_v49  ;;  %v879_v53 = vld [vmem:[%s1724_s2] ss:$0 sm:$0xff]  ;;  %v451_v61 = vpack.c.bf16 %v906_v57, %v906_v57  ;;  %v1288_v63 = vld [vmem:[%s1720_s1 + $0xc8] sm:$0xff]   ;;  %v1290_v2 = vld [vmem:[%s1720_s1 + $0xd0] sm:$0xff]   ;;  %v1329_v49 = vmov 0  }
  0x10   :  { %1010 = vmatprep.subr.bf16.mxu0 %v1270_v9  ;;  %v1287_v60 = vld [vmem:[%s1720_s1 + $0x80] sm:$0xff]   ;;  %v1289_v0 = vld [vmem:[%s1720_s1 + $0x88] sm:$0xff]   ;;  %v1291_v3 = vld [vmem:[%s1720_s1 + $0x90] sm:$0xff]   ;;  %1260 = vset.pattern.permute.xlu0 %v1329_v49 }
  0x11   :  { %v1292_v4 = vld [vmem:[%s1720_s1 + $0xd8] sm:$0xff]   ;;  %v1294_v6 = vld [vmem:[%s1720_s1 + $0xe0] sm:$0xff]   ;;  %v1296_v8 = vld [vmem:[%s1720_s1 + $0xe8] sm:$0xff]   ;;  %1261 = vset.pattern.permute.xlu1 %v1329_v49 }
  0x12   :  { %1105 = vmatpush3.bf16.msra.mxu1 %v1281_v23  ;;  %v1293_v5 = vld [vmem:[%s1720_s1 + $0x98] sm:$0xff]   ;;  %v1295_v7 = vld [vmem:[%s1720_s1 + $0xa0] sm:$0xff]   ;;  %v1297_v9 = vld [vmem:[%s1720_s1 + $0xa8] sm:$0xff]  }
  0x13   :  { %1011 = vmatpush3.bf16.msra.mxu0 %v1271_v10  ;;  %1106 = vmatprep.subr.bf16.mxu1 %v1326_v1  ;;  %v1298_v10 = vld [vmem:[%s1720_s1 + $0xf0] sm:$0xff]   ;;  %v1300_v12 = vld [vmem:[%s1720_s1 + $0xf8] sm:$0xff]   ;;  %v1302_v23 = vld [vmem:[%s1722_s3 + $0x40] sm:$0xff]  }
  0x14   :  { %1012 = vmatprep.subr.bf16.mxu0 %v1272_v11  ;;  %v1299_v11 = vld [vmem:[%s1720_s1 + $0xb0] sm:$0xff]   ;;  %v1301_v13 = vld [vmem:[%s1720_s1 + $0xb8] sm:$0xff]   ;;  %v1306_v33 = vld [vmem:[%s1722_s3 + $0x60] sm:$0xff]  }
  0x15   :  { %v905_v14 = vld [vmem:[%s1721_s0 + $0x10] sm:$0xff]  ;;  %v360_v17 = vld [vmem:[%s1723_s5 + $0x78] sm:$0xff]  ;;  %v940_v38 = vld [vmem:[%s1724_s2 + $0x1] ss:$0 sm:$0xff] }
  0x16   :  { %1107 = vmatpush3.bf16.msra.mxu1 %v1282_v25  ;;  %v1304_v31 = vld [vmem:[%s1722_s3 + $0x50] sm:$0xff]   ;;  %v1305_v32 = vld [vmem:[%s1722_s3 + $0x58] sm:$0xff]   ;;  %v993_v57 = vld [vmem:[%s1723_s5 + $0xc0] sm:$0xff] }
  0x17   :  { %1013 = vmatpush3.bf16.msra.mxu0 %v1273_v15  ;;  %1108 = vmatprep.subr.bf16.mxu1 %v1326_v1  ;;  %v450_v15 = vpack.c.bf16 %v905_v14, %v905_v14  ;;  %v1308_v35 = vld [vmem:[%s1722_s3 + $0x70] sm:$0xff]  }
  0x18   :  { %1014 = vmatprep.subr.bf16.mxu0 %v1274_v16  ;;  %v359_v16 = vld [vmem:[%s1723_s5 + $0x70] sm:$0xff] }
  0x19   :  { %v987_v46 = vld [vmem:[%s1723_s5 + $0x90] sm:$0xff] }
  0x1a   :  { %1109 = vmatpush3.bf16.msra.mxu1 %v1283_v26 }
  0x1b   :  { %1015 = vmatpush3.bf16.msra.mxu0 %v1275_v18  ;;  %1110 = vmatprep.subr.bf16.mxu1 %v1326_v1  ;;  %v1230_v18 = vpack.c.bf16 %v360_v17, %v359_v16 }
  0x1c   :  { %1016 = vmatprep.subr.bf16.mxu0 %v1276_v19  ;;  %v320_v19 = vlaneseq }
  0x1e   :  { %1111 = vmatpush3.bf16.msra.mxu1 %v1284_v27  ;;  %v1582_v20 = vand.u32 127, %v320_v19 }
  0x1f   :  { %1017 = vmatpush3.bf16.msra.mxu0 %v1277_v21  ;;  %1112 = vmatprep.subr.bf16.mxu1 %v1326_v1  ;;  %v896_v21 = vld [vmem:[%s1725_s4] ss:$0 sm:$0xff] }
  0x20   :  { %1208 = vmatprep.subr.bf16.mxu0 %v1328_v30  ;;  %vm322_vm1 = vcmp.lt.s32.totalorder %v1582_v20, 4  ;;  %vm743_vm2 = vcmp.lt.s32.totalorder %v1582_v20, 5 }
  0x22   :  { %201 = vmatmul.mubr.bf16.vlgmr.msra.gmra.mrb[0].mxu0 %v31_v24  ;;  %1113 = vmatpush3.bf16.msra.mxu1 %v1285_v28 }
  0x23   :  { %1050 = vmatprep.subr.bf16.mxu1 %v1286_v29  ;;  %1150 = vmatprep.mubr.msk.f32.mxu0 %vm1327_vm0, %v1326_v1  ;;  %v1303_v29 = vld [vmem:[%s1722_s3 + $0x48] sm:$0xff]  }
  0x24   :  { %1210 = vmatpush3.bf16.msra.mxu0 %v1209_v34  ;;  %v1307_v34 = vld [vmem:[%s1722_s3 + $0x68] sm:$0xff]  }
  0x25   :  { %1211 = vmatprep.subr.bf16.mxu0 %v1328_v30 }
  0x28   :  { %1213 = vmatpush3.bf16.msra.mxu0 %v1212_v36  ;;  %v1309_v36 = vld [vmem:[%s1722_s3 + $0x78] sm:$0xff]  }
  0x29   :  { %1214 = vmatprep.subr.bf16.mxu0 %v1328_v30 }
  0x2c   :  { %1216 = vmatpush3.bf16.msra.mxu0 %v1215_v39 }
  0x2d   :  { %1217 = vmatprep.subr.bf16.mxu0 %v1328_v30 }
  0x30   :  { %1219 = vmatpush3.bf16.msra.mxu0 %v1218_v42 }
  0x31   :  { %1220 = vmatprep.subr.bf16.mxu0 %v1328_v30 }
  0x34   :  { %1222 = vmatpush3.bf16.msra.mxu0 %v1221_v45  ;;  %v985_v45 = vld [vmem:[%s1723_s5 + $0x80] sm:$0xff] }
  0x35   :  { %1223 = vmatprep.subr.bf16.mxu0 %v1328_v30 }
  0x38   :  { %1225 = vmatpush3.bf16.msra.mxu0 %v1224_v48  ;;  %v988_v48 = vld [vmem:[%s1723_s5 + $0x98] sm:$0xff] }
  0x39   :  { %1226 = vmatprep.subr.bf16.mxu0 %v1328_v30  ;;  %v1236_v50 = vpack.c.bf16 %v988_v48, %v987_v46 }
  0x3c   :  { %1228 = vmatpush3.bf16.msra.mxu0 %v1227_v51  ;;  %v989_v51 = vld [vmem:[%s1723_s5 + $0xa0] sm:$0xff] }
  0x3d   :  { %1229 = vmatprep.subr.bf16.mxu0 %v1328_v30 }
  0x40   :  { %1231 = vmatpush3.bf16.msra.mxu0 %v1230_v18 }
  0x41   :  { %1153 = vmatprep.subr.bf16.mxu0 %v1326_v1 }
  0xf5   :  { %v1018_v52 = vpop.f32.mrb[0].mxu0 }
  0xf6   :  { %v1019_v54 = vpop.f32.mrb[1].mxu0 }
  0xf7   :  { %v1020_v55 = vadd.f32 %v1019_v54, %v1018_v52  ;;  %v1021_v56 = vpop.f32.mrb[2].mxu0  ;;  %v990_v52 = vld [vmem:[%s1723_s5 + $0xa8] sm:$0xff]  ;;  %v991_v54 = vld [vmem:[%s1723_s5 + $0xb0] sm:$0xff] }
  0xf8   :  { %v1022_v58 = vpop.f32.mrb[3].mxu0 }
  0xf9   :  { %v203_v59 = vadd.f32 %v1020_v55, %v879_v53  ;;  %v1239_v53 = vpack.c.bf16 %v990_v52, %v989_v51  ;;  %v992_v55 = vld [vmem:[%s1723_s5 + $0xb8] sm:$0xff]  ;;  %v994_v58 = vld [vmem:[%s1723_s5 + $0xc8] sm:$0xff] }
  0xfa   :  { %v1242_v56 = vpack.c.bf16 %v992_v55, %v991_v54 }
  0xfb   :  { %v208_v62 = vpack.c.bf16 %v203_v59, %v203_v59  ;;  %v1245_v59 = vpack.c.bf16 %v994_v58, %v993_v57 }
  0xfd   :  { %1115 = vmatmul.mubr.bf16.vlgmr.msra.gmra.mrb[0].mxu1 %v208_v62  ;;  %v997_v62 = vld [vmem:[%s1723_s5 + $0xe0] sm:$0xff] }
  0xfe   :  { %1051 = vmatpush3.bf16.msra.mxu1 %v1287_v60  ;;  %621 = vmatprep.mubr.bf16.mxu1 %v451_v61  ;;  %v995_v60 = vld [vmem:[%s1723_s5 + $0xd0] sm:$0xff]  ;;  %v996_v61 = vld [vmem:[%s1723_s5 + $0xd8] sm:$0xff] }
  0xff   :  { %1052 = vmatprep.subr.bf16.mxu1 %v1288_v63  ;;  %v1248_v63 = vpack.c.bf16 %v996_v61, %v995_v60 }
 0x102   :  { %1053 = vmatpush3.bf16.msra.mxu1 %v1289_v0  ;;  %v998_v0 = vld [vmem:[%s1723_s5 + $0xe8] sm:$0xff] }
 0x103   :  { %1054 = vmatprep.subr.bf16.mxu1 %v1290_v2  ;;  %v1251_v2 = vpack.c.bf16 %v998_v0, %v997_v62 }
 0x106   :  { %1055 = vmatpush3.bf16.msra.mxu1 %v1291_v3  ;;  %v999_v3 = vld [vmem:[%s1723_s5 + $0xf0] sm:$0xff] }
 0x107   :  { %1056 = vmatprep.subr.bf16.mxu1 %v1292_v4  ;;  %v1000_v4 = vld [vmem:[%s1723_s5 + $0xf8] sm:$0xff] }
 0x10a   :  { %1057 = vmatpush3.bf16.msra.mxu1 %v1293_v5  ;;  %v1254_v5 = vpack.c.bf16 %v1000_v4, %v999_v3 }
 0x10b   :  { %1058 = vmatprep.subr.bf16.mxu1 %v1294_v6 }
 0x10e   :  { %1059 = vmatpush3.bf16.msra.mxu1 %v1295_v7 }
 0x10f   :  { %1060 = vmatprep.subr.bf16.mxu1 %v1296_v8 }
 0x112   :  { %1061 = vmatpush3.bf16.msra.mxu1 %v1297_v9  ;;  %v974_v9 = vld [vmem:[%s1725_s4 + $0x1] ss:$0 sm:$0xff] }
 0x113   :  { %1062 = vmatprep.subr.bf16.mxu1 %v1298_v10 }
 0x116   :  { %1063 = vmatpush3.bf16.msra.mxu1 %v1299_v11 }
 0x117   :  { %1064 = vmatprep.subr.bf16.mxu1 %v1300_v12 }
 0x11a   :  { %1065 = vmatpush3.bf16.msra.mxu1 %v1301_v13 }
 0x11b   :  { %1232 = vmatprep.subr.bf16.mxu1 %v1328_v30 }
 0x11d   :  { %622 = vmatmul.mubr.bf16.vlgmr.msra.gmra.mrb[4].mxu1 %v450_v15 }
 0x11e   :  { %1205 = vmatprep.mubr.msk.f32.mxu1 %vm1327_vm0, %v1326_v1 }
 0x1d0   :  { %v314_v22 = vpop.f32.mrb[0].mxu1 }
 0x1d1   :  { %v315_v24 = vadd.f32 %v896_v21, %v314_v22  ;;  %v1116_v25 = vpop.f32.mrb[1].mxu1 }
 0x1d2   :  { %v317_v26 = vpop.f32.mrb[2].mxu1  ;;  %v983_v25 = vld [vmem:[%s1726_s6 + $0x8] sm:$0xff] }
 0x1d3   :  { %v1117_v27 = vpop.f32.mrb[3].mxu1  ;;  %1151 = vmatmul.mubr.f32.vlgmr.msra.gmra.mrb[4].mxu0 %v315_v24  ;;  %v1593_v28 = vsel %vm322_vm1, %v315_v24, -1e+09 }
 0x1d4   :  { %325 = vmax.xlane.f32.xlu0 %v1593_v28  ;;  %1154 = vmatpush3.bf16.msra.mxu0 %v1302_v23 }
 0x1d5   :  { %1155 = vmatprep.subr.bf16.mxu0 %v1326_v1  ;;  %1169 = vmatprep.mubr.msk.bf16.mxu0 %vm1327_vm0, %v1326_v1 }
 0x1d8   :  { %1156 = vmatpush3.bf16.msra.mxu0 %v1303_v29 }
 0x1d9   :  { %1157 = vmatprep.subr.bf16.mxu0 %v1326_v1 }
 0x1dc   :  { %1158 = vmatpush3.bf16.msra.mxu0 %v1304_v31 }
 0x1dd   :  { %1159 = vmatprep.subr.bf16.mxu0 %v1326_v1 }
 0x1e0   :  { %1160 = vmatpush3.bf16.msra.mxu0 %v1305_v32 }
 0x1e1   :  { %1161 = vmatprep.subr.bf16.mxu0 %v1326_v1 }
 0x1e4   :  { %1162 = vmatpush3.bf16.msra.mxu0 %v1306_v33 }
 0x1e5   :  { %1163 = vmatprep.subr.bf16.mxu0 %v1326_v1 }
 0x1e8   :  { %1164 = vmatpush3.bf16.msra.mxu0 %v1307_v34 }
 0x1e9   :  { %1165 = vmatprep.subr.bf16.mxu0 %v1326_v1 }
 0x1ec   :  { %1166 = vmatpush3.bf16.msra.mxu0 %v1308_v35 }
 0x1ed   :  { %1167 = vmatprep.subr.bf16.mxu0 %v1326_v1  ;;  %v986_v1 = vld [vmem:[%s1723_s5 + $0x88] sm:$0xff] }
 0x1ee   :  { %v1233_v47 = vpack.c.bf16 %v986_v1, %v985_v45 }
 0x1f0   :  { %v1066_v37 = vpop.f32.mrb[4].mxu1  ;;  %1168 = vmatpush3.bf16.msra.mxu0 %v1309_v36  ;;  %1234 = vmatpush3.bf16.msra.mxu1 %v1233_v47 }
 0x1f1   :  { %v1067_v39 = vpop.f32.mrb[5].mxu1  ;;  %1235 = vmatprep.subr.bf16.mxu1 %v1328_v30 }
 0x1f2   :  { %v1068_v40 = vadd.f32 %v1067_v39, %v1066_v37  ;;  %v1069_v41 = vpop.f32.mrb[6].mxu1 }
 0x1f3   :  { %v1070_v42 = vpop.f32.mrb[7].mxu1 }
 0x1f4   :  { %v624_v43 = vadd.f32 %v1068_v40, %v940_v38  ;;  %1237 = vmatpush3.bf16.msra.mxu1 %v1236_v50 }
 0x1f5   :  { %1238 = vmatprep.subr.bf16.mxu1 %v1328_v30 }
 0x1f6   :  { %v629_v44 = vpack.c.bf16 %v624_v43, %v624_v43 }
 0x1f8   :  { %1170 = vmatmul.mubr.bf16.vlgmr.msra.gmra.mrb[8].mxu0 %v629_v44  ;;  %1240 = vmatpush3.bf16.msra.mxu1 %v1239_v53 }
 0x1f9   :  { %1241 = vmatprep.subr.bf16.mxu1 %v1328_v30 }
 0x1fc   :  { %1243 = vmatpush3.bf16.msra.mxu1 %v1242_v56 }
 0x1fd   :  { %1244 = vmatprep.subr.bf16.mxu1 %v1328_v30 }
 0x200   :  { %1246 = vmatpush3.bf16.msra.mxu1 %v1245_v59 }
 0x201   :  { %1247 = vmatprep.subr.bf16.mxu1 %v1328_v30 }
 0x204   :  { %1249 = vmatpush3.bf16.msra.mxu1 %v1248_v63 }
 0x205   :  { %1250 = vmatprep.subr.bf16.mxu1 %v1328_v30 }
 0x208   :  { %1252 = vmatpush3.bf16.msra.mxu1 %v1251_v2 }
 0x209   :  { %1253 = vmatprep.subr.bf16.mxu1 %v1328_v30  ;;  %v323_v30 = vld [vmem:[%s1726_s6] sm:$0xff] }
 0x20c   :  { %1255 = vmatpush3.bf16.msra.mxu1 %v1254_v5 }
 0x261   :  { %v326_v16 = vpop.xlane.xlu0 %325 }
 0x262   :  { %v327_v26 = vsub.f32 %v1593_v28, %v326_v16 }
 0x264   :  { %v328_v29 = vmul.f32 1.442695, %v327_v26 }
 0x2a6   :  { %v427_v6 = vpop.f32.mrb[4].mxu0 }
 0x2a7   :  { %v431_v7 = vsel %vm322_vm1, %v427_v6, -1e+09  ;;  %v1152_v8 = vpop.f32.mrb[5].mxu0 }
 0x2a8   :  { %432 = vmax.xlane.f32.xlu0 %v431_v7 }
 0x2be   :  { %336 = vperm.xlu0 %1260, %v323_v30  }
 0x2cb   :  { %v737_v10 = vpop.f32.mrb[8].mxu0 }
 0x2cc   :  { %v738_v11 = vadd.f32 %v974_v9, %v737_v10  ;;  %v1171_v12 = vpop.f32.mrb[9].mxu0 }
 0x2cd   :  { %v740_v13 = vpop.f32.mrb[10].mxu0 }
 0x2ce   :  { %v1172_v14 = vpop.f32.mrb[11].mxu0  ;;  %1206 = vmatmul.mubr.f32.vlgmr.msra.gmra.mrb[8].mxu1 %v738_v11  ;;  %v746_v15 = vsel %vm743_vm2, %v738_v11, -1e+09 }
 0x2cf   :  { %747 = vmax.xlane.f32.xlu1 %v746_v15 }
 0x335   :  { %v433_v17 = vpop.xlane.xlu0 %432 }
 0x336   :  { %v434_v18 = vsub.f32 %v431_v7, %v433_v17 }
 0x338   :  { %v435_v19 = vmul.f32 1.442695, %v434_v18 }
 0x33a   :  { %1310 = vpow2.f32 %v435_v19 }
 0x33b   :  { %1312 = vpow2.f32 %v328_v29 }
 0x33d   :  { %v337_v38 = vpop.permute.xlu0 %336 }
 0x33e   :  { %vm338_vm3 = vcmp.eq.s32.totalorder %v1582_v20, %v337_v38 }
 0x33f   :  { %v339_v40 = vsel %vm338_vm3, %v1593_v28, 0.0  ;;  %v442_v42 = vsel %vm338_vm3, %v431_v7, 0.0 }
 0x344   :  { %v1311_v21 = vpop.eup %1310 }
 0x345   :  { %437 = vadd.xlane.f32.xlu0 %v1311_v21  ;;  %v1313_v33 = vpop.eup %1312 }
 0x35c   :  { %v748_v27 = vpop.xlane.xlu1 %747 }
 0x35d   :  { %v749_v31 = vsub.f32 %v746_v15, %v748_v27 }
 0x35f   :  { %v750_v32 = vmul.f32 1.442695, %v749_v31 }
 0x361   :  { %1314 = vpow2.f32 %v750_v32 }
 0x36b   :  { %v1315_v34 = vpop.eup %1314 }
 0x3a1   :  { %v850_v22 = vpop.f32.mrb[8].mxu1 }
 0x3a2   :  { %v854_v23 = vsel %vm743_vm2, %v850_v22, -1e+09  ;;  %v1207_v24 = vpop.f32.mrb[9].mxu1 }
 0x3a3   :  { %855 = vmax.xlane.f32.xlu1 %v854_v23 }
 0x3b4   :  { %758 = vperm.xlu1 %1261, %v983_v25  }
 0x3d2   :  { %v438_v1 = vpop.xlane.xlu0 %437 }
 0x3d8   :  { %330 = vadd.xlane.f32.xlu1 %v1313_v33 }
 0x3dc   :  { %752 = vadd.xlane.f32.xlu1 %v1315_v34 }
 0x430   :  { %v856_v35 = vpop.xlane.xlu1 %855 }
 0x431   :  { %v857_v36 = vsub.f32 %v854_v23, %v856_v35 }
 0x433   :  { %v858_v37 = vmul.f32 1.442695, %v857_v36 }
 0x434   :  { %v759_v41 = vpop.permute.xlu1 %758 }
 0x435   :  { %1316 = vpow2.f32 %v858_v37  ;;  %vm760_vm4 = vcmp.eq.s32.totalorder %v1582_v20, %v759_v41 }
 0x436   :  { %v761_v43 = vsel %vm760_vm4, %v746_v15, 0.0  ;;  %v865_v44 = vsel %vm760_vm4, %v854_v23, 0.0 }
 0x43f   :  { %v1317_v39 = vpop.eup %1316 }
 0x440   :  { %860 = vadd.xlane.f32.xlu1 %v1317_v39 }
 0x444   :  { %340 = vadd.xlane.f32.xlu1 %v339_v40 }
 0x448   :  { %443 = vadd.xlane.f32.xlu1 %v442_v42 }
 0x44c   :  { %762 = vadd.xlane.f32.xlu1 %v761_v43 }
 0x450   :  { %866 = vadd.xlane.f32.xlu1 %v865_v44 }
 0x465   :  { %v331_v45 = vpop.xlane.xlu1 %330 }
 0x466   :  { %1318 = vlog2.f32 %v331_v45 }
 0x467   :  { %1320 = vlog2.f32 %v438_v1 }
 0x469   :  { %v753_v46 = vpop.xlane.xlu1 %752 }
 0x46a   :  { %1322 = vlog2.f32 %v753_v46 }
 0x470   :  { %v1319_v47 = vpop.eup %1318 }
 0x471   :  { %v333_v48 = vmul.f32 0.6931472, %v1319_v47  ;;  %v1321_v49 = vpop.eup %1320 }
 0x472   :  { %v440_v50 = vmul.f32 0.6931472, %v1321_v49 }
 0x473   :  { %v334_v51 = vadd.f32 %v333_v48, %v326_v16 }
 0x474   :  { %v1323_v52 = vpop.eup %1322  ;;  %v441_v55 = vadd.f32 %v440_v50, %v433_v17 }
 0x475   :  { %v755_v54 = vmul.f32 0.6931472, %v1323_v52 }
 0x477   :  { %v756_v59 = vadd.f32 %v755_v54, %v748_v27 }
 0x4cd   :  { %v861_v28 = vpop.xlane.xlu1 %860 }
 0x4ce   :  { %1324 = vlog2.f32 %v861_v28 }
 0x4d1   :  { %v341_v20 = vpop.xlane.xlu1 %340 }
 0x4d2   :  { %v342_v53 = vsub.f32 %v334_v51, %v341_v20 }
 0x4d4   :  { %344 = vst.msk [vmem:[%s1727_s7] sm:$0xff] %vm343_vm5, %v342_v53 }
 0x4d5   :  { %v444_v56 = vpop.xlane.xlu1 %443 }
 0x4d6   :  { %v445_v57 = vsub.f32 %v441_v55, %v444_v56 }
 0x4d8   :  { %v1325_v58 = vpop.eup %1324  ;;  %446 = vst.msk [vmem:[%s1728_s8] sm:$0xff] %vm343_vm5, %v445_v57 }
 0x4d9   :  { %v863_v60 = vmul.f32 0.6931472, %v1325_v58  ;;  %v763_v61 = vpop.xlane.xlu1 %762 }
 0x4da   :  { %v764_v62 = vsub.f32 %v756_v59, %v763_v61 }
 0x4db   :  { %v864_v63 = vadd.f32 %v863_v60, %v856_v35 }
 0x4dc   :  { %984 = vst.msk [vmem:[%s1727_s7 + $0x8] sm:$0xff] %vm343_vm5, %v764_v62 }
 0x4dd   :  { %v867_v0 = vpop.xlane.xlu1 %866 }
 0x4de   :  { %v868_v2 = vsub.f32 %v864_v63, %v867_v0 }
 0x4e0   :  { %1001 = vst.msk [vmem:[%s1728_s8 + $0x8] sm:$0xff] %vm343_vm5, %v868_v2 }

// kernel: run.9
= control target key start
LH: loop header
LB: loop body
LE: loop exit
PB: predicated region body
PF: predicated region fallthrough
CT: control target
= control target key end

     0   :  { %v2119_v22 = vmov 1983009808   ;;  %v74_v24 = vlaneseq  ;;  %v2120_v41 = vmov 0.0   ;;  %vm2121_vm0 = vmmov 0   ;;  %s2708_s2 = inlined_call_operand.vmem [shape: bf16[512,128], index: 2, kind: input, shape index: {}]   ;;  %s2709_s0 = inlined_call_operand.vmem [shape: f32[2,512], index: 0, kind: input, shape index: {}]   ;;  %s2710_s4 = inlined_call_operand.vmem [shape: bf16[128,128], index: 4, kind: input, shape index: {}]   ;;  %s2711_s10 = inlined_call_operand.vmem [shape: bf16[256,128], index: 10, kind: input, shape index: {}]   ;;  %s2712_s6 = inlined_call_operand.vmem [shape: bf16[128,6], index: 6, kind: input, shape index: {}]   ;;  %s2713_s3 = inlined_call_operand.vmem [shape: f32[1,128], index: 3, kind: input, shape index: {}]   ;;  %s2714_s8 = inlined_call_operand.vmem [shape: f32[8,256], index: 8, kind: input, shape index: {}]   ;;  %s2715_s17 = inlined_call_operand.vmem [shape: bf16[2,256,128], index: 17, kind: input, shape index: {}]   ;;  %s2716_s12 = inlined_call_operand.vmem [shape: bf16[128,128], index: 12, kind: input, shape index: {}]   ;;  %s2717_s5 = inlined_call_operand.vmem [shape: f32[1,128], index: 5, kind: input, shape index: {}]   ;;  %s2718_s11 = inlined_call_operand.vmem [shape: f32[1,128], index: 11, kind: input, shape index: {}]   ;;  %s2719_s20 = inlined_call_operand.vmem [shape: f32[8,128], index: 20, kind: output, shape index: {1}]   ;;  %s2720_s14 = inlined_call_operand.vmem [shape: bf16[128,10], index: 14, kind: input, shape index: {}]   ;;  %s2721_s7 = inlined_call_operand.vmem [shape: f32[1,6], index: 7, kind: input, shape index: {}]   ;;  %s2722_s16 = inlined_call_operand.vmem [shape: f32[10,10], index: 16, kind: input, shape index: {}]   ;;  %s2723_s18 = inlined_call_operand.vmem [shape: f32[2,1,128], index: 18, kind: input, shape index: {}]   ;;  %s2724_s21 = inlined_call_operand.vmem [shape: f32[2,8,128], index: 21, kind: output, shape index: {2}]   ;;  %s2725_s13 = inlined_call_operand.vmem [shape: f32[1,128], index: 13, kind: input, shape index: {}]   ;;  %s2726_s15 = inlined_call_operand.vmem [shape: f32[1,10], index: 15, kind: input, shape index: {}]   ;;  %s2727_s9 = inlined_call_operand.vmem [shape: s32[8,1], index: 9, kind: input, shape index: {}]   ;;  %s2728_s1 = inlined_call_operand.vmem [shape: s32[2,1], index: 1, kind: input, shape index: {}]   ;;  %s2729_s19 = inlined_call_operand.vmem [shape: f32[2,1], index: 19, kind: output, shape index: {0}]   ;;  %s2730_s22 = inlined_call_operand.vmem [shape: f32[8,1], index: 22, kind: output, shape index: {3}]   ;;  %s2731_s23 = inlined_call_operand.vmem [shape: f32[8,1], index: 23, kind: output, shape index: {4}]  }
   0x1   :  { %2738 = sst [smem:[#allocation2_spill]] %s2708_s2  ;;  %v72_v23 = vunpack.c.l.s4 %v2119_v22  ;;  %vm663_vm1 = vcmask 41984   ;;  %vm1478_vm2 = vcmask 1041408   ;;  %vm2123_vm3 = vmmov 1  }
   0x2   :  { %2739 = sst [smem:[#allocation3_spill]] %s2709_s0  ;;  %s2746_s24 = sld [smem:[#allocation2_spill]]  ;;  %v75_v30 = vshrl.u32 %v74_v24, 7  ;;  %vm1984_vm4 = vmpackc.low %vm1478_vm2, %vm2123_vm3  ;;  %vm1449_vm5 = vcmask 80896   ;;  %vm687_vm8 = vcmask 1024   ;;  %vm1471_vm9 = vcmask 7168  }
   0x3   :  { %2740 = sst [smem:[#allocation4_spill]] %s2710_s4  ;;  %v73_v29 = vunpack.c.0.s8 %v72_v23  ;;  %s2747_s28 = sld [smem:[#allocation3_spill]] }
   0x4   :  { %2741 = sst [smem:[#allocation5_spill]] %s2711_s10  ;;  %s2748_s10 = sld [smem:[#allocation4_spill]] }
   0x5   :  { %2742 = sst [smem:[#allocation6_spill]] %s2712_s6  ;;  %v76_v35 = vsub.s32 %v73_v29, %v75_v30  ;;  %s2749_s30 = sld [smem:[#allocation5_spill]] }
   0x6   :  { %2743 = sst [smem:[#allocation7_spill]] %s2713_s3  ;;  %s2750_s0 = sld [smem:[#allocation6_spill]] }
   0x7   :  { %2744 = sst [smem:[#allocation8_spill]] %s2714_s8 }
   0x8   :  { %2745 = sst [smem:[#allocation9_spill]] %s2715_s17  ;;  %v1994_v0 = vld [vmem:[%s2746_s24 + $0x40] sm:$0xff]   ;;  %v1998_v4 = vld [vmem:[%s2746_s24 + $0x48] sm:$0xff]   ;;  %v2002_v8 = vld [vmem:[%s2746_s24 + $0x50] sm:$0xff]   ;;  %s2752_s27 = sld [smem:[#allocation8_spill]] }
   0x9   :  { %v1995_v1 = vld [vmem:[%s2746_s24 + $0xc0] sm:$0xff]   ;;  %1746 = vmatprep.subr.bf16.mxu0 %v1994_v0  ;;  %v1999_v5 = vld [vmem:[%s2746_s24 + $0xc8] sm:$0xff]   ;;  %v2003_v9 = vld [vmem:[%s2746_s24 + $0xd0] sm:$0xff]   ;;  %s2753_s17 = sld [smem:[#allocation9_spill]] }
   0xa   :  { %v1996_v2 = vld [vmem:[%s2746_s24] sm:$0xff]   ;;  %1768 = vmatprep.subr.bf16.mxu1 %v1995_v1  ;;  %v2000_v6 = vld [vmem:[%s2746_s24 + $0x8] sm:$0xff]   ;;  %v2004_v10 = vld [vmem:[%s2746_s24 + $0x10] sm:$0xff]  }
   0xb   :  { %v1997_v3 = vld [vmem:[%s2746_s24 + $0x80] sm:$0xff]   ;;  %1747 = vmatpush3.bf16.msra.mxu0 %v1996_v2  ;;  %v2001_v7 = vld [vmem:[%s2746_s24 + $0x88] sm:$0xff]   ;;  %v2005_v11 = vld [vmem:[%s2746_s24 + $0x90] sm:$0xff]  }
   0xc   :  { %1769 = vmatpush3.bf16.msra.mxu1 %v1997_v3  ;;  %1748 = vmatprep.subr.bf16.mxu0 %v1998_v4  ;;  %v2006_v12 = vld [vmem:[%s2746_s24 + $0x58] sm:$0xff]   ;;  %v2010_v16 = vld [vmem:[%s2746_s24 + $0x60] sm:$0xff]   ;;  %v2014_v20 = vld [vmem:[%s2746_s24 + $0x68] sm:$0xff]  }
   0xd   :  { %1770 = vmatprep.subr.bf16.mxu1 %v1999_v5  ;;  %v2007_v13 = vld [vmem:[%s2746_s24 + $0xd8] sm:$0xff]   ;;  %v2011_v17 = vld [vmem:[%s2746_s24 + $0xe0] sm:$0xff]   ;;  %v2015_v21 = vld [vmem:[%s2746_s24 + $0xe8] sm:$0xff]  }
   0xe   :  { %v2008_v14 = vld [vmem:[%s2746_s24 + $0x18] sm:$0xff]   ;;  %v2012_v18 = vld [vmem:[%s2746_s24 + $0x20] sm:$0xff]   ;;  %v2016_v25 = vld [vmem:[%s2746_s24 + $0x28] sm:$0xff]  }
   0xf   :  { %1749 = vmatpush3.bf16.msra.mxu0 %v2000_v6  ;;  %v2009_v15 = vld [vmem:[%s2746_s24 + $0x98] sm:$0xff]   ;;  %v2013_v19 = vld [vmem:[%s2746_s24 + $0xa0] sm:$0xff]   ;;  %v2017_v26 = vld [vmem:[%s2746_s24 + $0xa8] sm:$0xff]  }
  0x10   :  { %1771 = vmatpush3.bf16.msra.mxu1 %v2001_v7  ;;  %1750 = vmatprep.subr.bf16.mxu0 %v2002_v8  ;;  %v2018_v27 = vld [vmem:[%s2746_s24 + $0x70] sm:$0xff]   ;;  %v2022_v33 = vld [vmem:[%s2746_s24 + $0x78] sm:$0xff]   ;;  %v68_v38 = vld [vmem:[%s2747_s28] sm:$0xff] }
  0x11   :  { %1772 = vmatprep.subr.bf16.mxu1 %v2003_v9  ;;  %v2019_v28 = vld [vmem:[%s2746_s24 + $0xf0] sm:$0xff]   ;;  %v2023_v34 = vld [vmem:[%s2746_s24 + $0xf8] sm:$0xff]   ;;  %v77_v39 = vrot.slane %v68_v38, %v76_v35  ;;  %v70_v40 = vcombine.high %v68_v38, %v68_v38  ;;  %v2027_v47 = vld [vmem:[%s2748_s10] sm:$0xff]  }
  0x12   :  { %v2020_v31 = vld [vmem:[%s2746_s24 + $0x30] sm:$0xff]   ;;  %v2024_v36 = vld [vmem:[%s2746_s24 + $0x38] sm:$0xff]   ;;  %v2028_v50 = vld [vmem:[%s2748_s10 + $0x8] sm:$0xff]  }
  0x13   :  { %1751 = vmatpush3.bf16.msra.mxu0 %v2004_v10  ;;  %v2021_v32 = vld [vmem:[%s2746_s24 + $0xb0] sm:$0xff]   ;;  %v2025_v37 = vld [vmem:[%s2746_s24 + $0xb8] sm:$0xff]   ;;  %v85_v42 = vcombine.high %v77_v39, %v77_v39  ;;  %v84_v43 = vrot.slane %v70_v40, %v76_v35  ;;  %v91_v44 = vpack.c.bf16 %v77_v39, %v77_v39  ;;  %v2031_v53 = vld [vmem:[%s2748_s10 + $0x20] sm:$0xff]  }
  0x14   :  { %1773 = vmatpush3.bf16.msra.mxu1 %v2005_v11  ;;  %1752 = vmatprep.subr.bf16.mxu0 %v2006_v12  ;;  %v2029_v51 = vld [vmem:[%s2748_s10 + $0x10] sm:$0xff]   ;;  %v2030_v52 = vld [vmem:[%s2748_s10 + $0x18] sm:$0xff]   ;;  %v2032_v54 = vld [vmem:[%s2748_s10 + $0x28] sm:$0xff]  }
  0x15   :  { %1774 = vmatprep.subr.bf16.mxu1 %v2007_v13  ;;  %v92_v45 = vpack.c.bf16 %v85_v42, %v85_v42  ;;  %v86_v46 = vcombine.high %v84_v43, %v84_v43  ;;  %v93_v48 = vpack.c.bf16 %v84_v43, %v84_v43  ;;  %v2033_v55 = vld [vmem:[%s2748_s10 + $0x30] sm:$0xff]   ;;  %v2034_v56 = vld [vmem:[%s2748_s10 + $0x38] sm:$0xff]   ;;  %v2035_v57 = vld [vmem:[%s2749_s30 + $0x40] sm:$0xff]   ;;  %s2751_s10 = sld [smem:[#allocation7_spill]] }
  0x16   :  { %v2051_v58 = vld [vmem:[%s2750_s0] sm:$0xff]   ;;  %v2052_v59 = vld [vmem:[%s2750_s0 + $0x8] sm:$0xff]   ;;  %v2053_v60 = vld [vmem:[%s2750_s0 + $0x10] sm:$0xff]  }
  0x17   :  { %1753 = vmatpush3.bf16.msra.mxu0 %v2008_v14  ;;  %390 = vmatprep.mubr.bf16.mxu0 %v92_v45  ;;  %v94_v49 = vpack.c.bf16 %v86_v46, %v86_v46  ;;  %v2054_v61 = vld [vmem:[%s2750_s0 + $0x18] sm:$0xff]   ;;  %v2055_v62 = vld [vmem:[%s2750_s0 + $0x20] sm:$0xff]   ;;  %v2056_v63 = vld [vmem:[%s2750_s0 + $0x28] sm:$0xff]  }
  0x18   :  { %1775 = vmatpush3.bf16.msra.mxu1 %v2009_v15  ;;  %1754 = vmatprep.subr.bf16.mxu0 %v2010_v16  ;;  %v2057_v0 = vld [vmem:[%s2750_s0 + $0x30] sm:$0xff]   ;;  %v690_v12 = vld [vmem:[%s2752_s27 + $0x8] sm:$0xff]  ;;  %v2036_v15 = vld [vmem:[%s2749_s30] sm:$0xff]  }
  0x19   :  { %1776 = vmatprep.subr.bf16.mxu1 %v2011_v17  ;;  %430 = vmatprep.mubr.bf16.mxu1 %v94_v49  ;;  %v692_v16 = vpack.c.bf16 %v690_v12, %v690_v12  ;;  %v2041_v22 = vld [vmem:[%s2749_s30 + $0x58] sm:$0xff]   ;;  %v2047_v29 = vld [vmem:[%s2749_s30 + $0x70] sm:$0xff]   ;;  %v2060_v43 = vld [vmem:[%s2753_s17] sm:$0xff]  }
  0x1a   :  { %v2042_v23 = vld [vmem:[%s2749_s30 + $0x18] sm:$0xff]   ;;  %v2048_v30 = vld [vmem:[%s2749_s30 + $0x30] sm:$0xff]   ;;  %v2061_v46 = vld [vmem:[%s2753_s17 + $0x48] sm:$0xff]  }
  0x1b   :  { %1755 = vmatpush3.bf16.msra.mxu0 %v2012_v18  ;;  %v1590_v2 = vld [vmem:[%s2751_s10] ss:$0 sm:$0xff]  ;;  %v2037_v18 = vld [vmem:[%s2749_s30 + $0x48] sm:$0xff]   ;;  %v2058_v35 = vld [vmem:[%s2750_s0 + $0x38] sm:$0xff]  }
  0x1c   :  { %1777 = vmatpush3.bf16.msra.mxu1 %v2013_v19  ;;  %1756 = vmatprep.subr.bf16.mxu0 %v2014_v20  ;;  %v2038_v19 = vld [vmem:[%s2749_s30 + $0x8] sm:$0xff]   ;;  %v2039_v20 = vld [vmem:[%s2749_s30 + $0x50] sm:$0xff]   ;;  %v2083_v12 = vld [vmem:[%s2753_s17 + $0xc0] sm:$0xff]  }
  0x1d   :  { %1778 = vmatprep.subr.bf16.mxu1 %v2015_v21  ;;  %v2040_v21 = vld [vmem:[%s2749_s30 + $0x10] sm:$0xff]  }
  0x1e   :  { %v2064_v49 = vld [vmem:[%s2753_s17 + $0x10] sm:$0xff]  }
  0x1f   :  { %1757 = vmatpush3.bf16.msra.mxu0 %v2016_v25  ;;  %v2043_v25 = vld [vmem:[%s2749_s30 + $0x60] sm:$0xff]  }
  0x20   :  { %1779 = vmatpush3.bf16.msra.mxu1 %v2017_v26  ;;  %1758 = vmatprep.subr.bf16.mxu0 %v2018_v27  ;;  %v2044_v26 = vld [vmem:[%s2749_s30 + $0x20] sm:$0xff]   ;;  %v2045_v27 = vld [vmem:[%s2749_s30 + $0x68] sm:$0xff]  }
  0x21   :  { %1780 = vmatprep.subr.bf16.mxu1 %v2019_v28  ;;  %v2046_v28 = vld [vmem:[%s2749_s30 + $0x28] sm:$0xff]  }
  0x23   :  { %1759 = vmatpush3.bf16.msra.mxu0 %v2020_v31  ;;  %v2049_v31 = vld [vmem:[%s2749_s30 + $0x78] sm:$0xff]  }
  0x24   :  { %1781 = vmatpush3.bf16.msra.mxu1 %v2021_v32  ;;  %1760 = vmatprep.subr.bf16.mxu0 %v2022_v33  ;;  %v2050_v32 = vld [vmem:[%s2749_s30 + $0x38] sm:$0xff]   ;;  %v689_v33 = vld [vmem:[%s2752_s27] sm:$0xff] }
  0x25   :  { %1782 = vmatprep.subr.bf16.mxu1 %v2023_v34  ;;  %v2467_v34 = vpack.c.bf16 %v689_v33, %v689_v33  ;;  %v2103_v33 = vld [vmem:[%s2720_s14 + $0x20] sm:$0xff]  }
  0x27   :  { %1761 = vmatpush3.bf16.msra.mxu0 %v2024_v36  ;;  %v2059_v36 = vld [vmem:[%s2753_s17 + $0x40] sm:$0xff]  }
  0x28   :  { %1783 = vmatpush3.bf16.msra.mxu1 %v2025_v37  ;;  %1895 = vmatprep.subr.bf16.mxu0 %v2120_v41  ;;  %v1623_v37 = vld [vmem:[%s2717_s5] ss:$0 sm:$0xff] }
  0x29   :  { %1915 = vmatprep.subr.bf16.mxu1 %v2120_v41 }
  0x2a   :  { %391 = vmatmul.mubr.bf16.vlgmr.msra.gmra.mrb[0].mxu0 %v91_v44 }
  0x2b   :  { %1896 = vmatpush3.bf16.msra.mxu0 %v2027_v47  ;;  %431 = vmatmul.mubr.bf16.vlgmr.msra.gmra.mrb[0].mxu1 %v93_v48  ;;  %v2062_v47 = vld [vmem:[%s2753_s17 + $0x8] sm:$0xff]   ;;  %v2063_v48 = vld [vmem:[%s2753_s17 + $0x50] sm:$0xff]  }
  0x2c   :  { %1897 = vmatprep.subr.bf16.mxu0 %v2120_v41  ;;  %1911 = vmatprep.mubr.msk.bf16.mxu0 %vm2121_vm0, %v2120_v41 }
  0x2d   :  { %1931 = vmatprep.mubr.msk.bf16.mxu1 %vm2121_vm0, %v2120_v41  ;;  %1916 = vmatpush3.bf16.msra.mxu1 %v2051_v58  ;;  %v2073_v58 = vld [vmem:[%s2753_s17 + $0x78] sm:$0xff]  }
  0x2e   :  { %1917 = vmatprep.subr.bf16.mxu1 %v2120_v41 }
  0x2f   :  { %1898 = vmatpush3.bf16.msra.mxu0 %v2028_v50  ;;  %v2065_v50 = vld [vmem:[%s2753_s17 + $0x58] sm:$0xff]  }
  0x30   :  { %1899 = vmatprep.subr.bf16.mxu0 %v2120_v41 }
  0x31   :  { %1918 = vmatpush3.bf16.msra.mxu1 %v2052_v59  ;;  %v2074_v59 = vld [vmem:[%s2753_s17 + $0x38] sm:$0xff]  }
  0x32   :  { %1919 = vmatprep.subr.bf16.mxu1 %v2120_v41 }
  0x33   :  { %1900 = vmatpush3.bf16.msra.mxu0 %v2029_v51  ;;  %v2066_v51 = vld [vmem:[%s2753_s17 + $0x18] sm:$0xff]  }
  0x34   :  { %1901 = vmatprep.subr.bf16.mxu0 %v2120_v41 }
  0x35   :  { %1920 = vmatpush3.bf16.msra.mxu1 %v2053_v60 }
  0x36   :  { %1921 = vmatprep.subr.bf16.mxu1 %v2120_v41 }
  0x37   :  { %1902 = vmatpush3.bf16.msra.mxu0 %v2030_v52  ;;  %v2067_v52 = vld [vmem:[%s2753_s17 + $0x60] sm:$0xff]  }
  0x38   :  { %1903 = vmatprep.subr.bf16.mxu0 %v2120_v41 }
  0x39   :  { %1922 = vmatpush3.bf16.msra.mxu1 %v2054_v61  ;;  %v1641_v61 = vld [vmem:[%s2718_s11] ss:$0 sm:$0xff] }
  0x3a   :  { %1923 = vmatprep.subr.bf16.mxu1 %v2120_v41 }
  0x3b   :  { %1904 = vmatpush3.bf16.msra.mxu0 %v2031_v53  ;;  %v2068_v53 = vld [vmem:[%s2753_s17 + $0x20] sm:$0xff]  }
  0x3c   :  { %1905 = vmatprep.subr.bf16.mxu0 %v2120_v41 }
  0x3d   :  { %1924 = vmatpush3.bf16.msra.mxu1 %v2055_v62 }
  0x3e   :  { %1925 = vmatprep.subr.bf16.mxu1 %v2120_v41 }
  0x3f   :  { %1906 = vmatpush3.bf16.msra.mxu0 %v2032_v54  ;;  %v2069_v54 = vld [vmem:[%s2753_s17 + $0x68] sm:$0xff]  }
  0x40   :  { %1907 = vmatprep.subr.bf16.mxu0 %v2120_v41 }
  0x41   :  { %1926 = vmatpush3.bf16.msra.mxu1 %v2056_v63  ;;  %v2075_v63 = vld [vmem:[%s2716_s12] sm:$0xff]  }
  0x42   :  { %1927 = vmatprep.subr.bf16.mxu1 %v2120_v41 }
  0x43   :  { %1908 = vmatpush3.bf16.msra.mxu0 %v2033_v55  ;;  %v2070_v55 = vld [vmem:[%s2753_s17 + $0x28] sm:$0xff]  }
  0x44   :  { %1909 = vmatprep.subr.bf16.mxu0 %v2120_v41 }
  0x45   :  { %1928 = vmatpush3.bf16.msra.mxu1 %v2057_v0 }
  0x46   :  { %1929 = vmatprep.subr.bf16.mxu1 %v2120_v41 }
  0x47   :  { %1910 = vmatpush3.bf16.msra.mxu0 %v2034_v56  ;;  %v2071_v56 = vld [vmem:[%s2753_s17 + $0x70] sm:$0xff]  }
  0x48   :  { %1808 = vmatprep.subr.bf16.mxu0 %v2035_v57  ;;  %v2072_v57 = vld [vmem:[%s2753_s17 + $0x30] sm:$0xff]  }
  0x49   :  { %1930 = vmatpush3.bf16.msra.mxu1 %v2058_v35  ;;  %v2105_v35 = vld [vmem:[%s2720_s14 + $0x30] sm:$0xff]  }
  0x4a   :  { %1830 = vmatprep.subr.bf16.mxu1 %v2059_v36  ;;  %v2106_v36 = vld [vmem:[%s2720_s14 + $0x38] sm:$0xff]  }
  0xfd   :  { %v1762_v1 = vpop.f32.mrb[0].mxu0 }
  0xfe   :  { %v1763_v3 = vpop.f32.mrb[1].mxu0  ;;  %v1784_v4 = vpop.f32.mrb[0].mxu1 }
  0xff   :  { %v1764_v5 = vadd.f32 %v1763_v3, %v1762_v1  ;;  %v1765_v6 = vpop.f32.mrb[2].mxu0  ;;  %v1785_v7 = vpop.f32.mrb[1].mxu1 }
 0x100   :  { %v1766_v8 = vpop.f32.mrb[3].mxu0  ;;  %v1786_v10 = vadd.f32 %v1785_v7, %v1784_v4  ;;  %v1787_v11 = vpop.f32.mrb[2].mxu1  ;;  %v2076_v4 = vld [vmem:[%s2716_s12 + $0x8] sm:$0xff]   ;;  %v2078_v6 = vld [vmem:[%s2716_s12 + $0x18] sm:$0xff]   ;;  %v2079_v7 = vld [vmem:[%s2716_s12 + $0x20] sm:$0xff]  }
 0x101   :  { %v393_v9 = vadd.f32 %v1764_v5, %v1590_v2  ;;  %v1788_v13 = vpop.f32.mrb[3].mxu1  ;;  %v2077_v5 = vld [vmem:[%s2716_s12 + $0x10] sm:$0xff]   ;;  %v2080_v8 = vld [vmem:[%s2716_s12 + $0x28] sm:$0xff]  }
 0x102   :  { %v2084_v13 = vld [vmem:[%s2753_s17 + $0x80] sm:$0xff]  }
 0x103   :  { %v433_v14 = vadd.f32 %v1786_v10, %v393_v9  ;;  %v2081_v9 = vld [vmem:[%s2716_s12 + $0x30] sm:$0xff]   ;;  %v2082_v10 = vld [vmem:[%s2716_s12 + $0x38] sm:$0xff]  }
 0x105   :  { %v438_v17 = vpack.c.bf16 %v433_v14, %v433_v14  ;;  %v2085_v14 = vld [vmem:[%s2753_s17 + $0xc8] sm:$0xff]  }
 0x107   :  { %1912 = vmatmul.mubr.bf16.vlgmr.msra.gmra.mrb[4].mxu0 %v438_v17  ;;  %v2088_v17 = vld [vmem:[%s2753_s17 + $0x90] sm:$0xff]  }
 0x108   :  { %1809 = vmatpush3.bf16.msra.mxu0 %v2036_v15  ;;  %860 = vmatprep.mubr.bf16.mxu0 %v692_v16  ;;  %v2086_v15 = vld [vmem:[%s2753_s17 + $0x88] sm:$0xff]  }
 0x109   :  { %1810 = vmatprep.subr.bf16.mxu0 %v2037_v18  ;;  %v2089_v18 = vld [vmem:[%s2753_s17 + $0xd8] sm:$0xff]  }
 0x10c   :  { %1811 = vmatpush3.bf16.msra.mxu0 %v2038_v19  ;;  %v2090_v19 = vld [vmem:[%s2753_s17 + $0x98] sm:$0xff]  }
 0x10d   :  { %1812 = vmatprep.subr.bf16.mxu0 %v2039_v20  ;;  %v2091_v20 = vld [vmem:[%s2753_s17 + $0xe0] sm:$0xff]  }
 0x110   :  { %1813 = vmatpush3.bf16.msra.mxu0 %v2040_v21  ;;  %v2092_v21 = vld [vmem:[%s2753_s17 + $0xa0] sm:$0xff]  }
 0x111   :  { %1814 = vmatprep.subr.bf16.mxu0 %v2041_v22  ;;  %v2093_v22 = vld [vmem:[%s2753_s17 + $0xe8] sm:$0xff]  }
 0x114   :  { %1815 = vmatpush3.bf16.msra.mxu0 %v2042_v23  ;;  %v2094_v23 = vld [vmem:[%s2753_s17 + $0xa8] sm:$0xff]  }
 0x115   :  { %1816 = vmatprep.subr.bf16.mxu0 %v2043_v25  ;;  %v2095_v25 = vld [vmem:[%s2753_s17 + $0xf0] sm:$0xff]  }
 0x118   :  { %1817 = vmatpush3.bf16.msra.mxu0 %v2044_v26  ;;  %v2096_v26 = vld [vmem:[%s2753_s17 + $0xb0] sm:$0xff]  }
 0x119   :  { %1818 = vmatprep.subr.bf16.mxu0 %v2045_v27  ;;  %v2097_v27 = vld [vmem:[%s2753_s17 + $0xf8] sm:$0xff]  }
 0x11c   :  { %1819 = vmatpush3.bf16.msra.mxu0 %v2046_v28  ;;  %v2098_v28 = vld [vmem:[%s2753_s17 + $0xb8] sm:$0xff]  }
 0x11d   :  { %1820 = vmatprep.subr.bf16.mxu0 %v2047_v29  ;;  %v2099_v29 = vld [vmem:[%s2720_s14] sm:$0xff]  }
 0x120   :  { %1821 = vmatpush3.bf16.msra.mxu0 %v2048_v30  ;;  %v2100_v30 = vld [vmem:[%s2720_s14 + $0x8] sm:$0xff]  }
 0x121   :  { %1822 = vmatprep.subr.bf16.mxu0 %v2049_v31  ;;  %v2101_v31 = vld [vmem:[%s2720_s14 + $0x10] sm:$0xff]  }
 0x124   :  { %1823 = vmatpush3.bf16.msra.mxu0 %v2050_v32  ;;  %v2102_v32 = vld [vmem:[%s2720_s14 + $0x18] sm:$0xff]  }
 0x125   :  { %1852 = vmatprep.subr.bf16.mxu0 %v2083_v12 }
 0x127   :  { %861 = vmatmul.mubr.bf16.vlgmr.msra.gmra.mrb[8].mxu0 %v2467_v34 }
 0x128   :  { %1214 = vmatprep.mubr.bf16.mxu0 %v692_v16  ;;  %1853 = vmatpush3.bf16.msra.mxu0 %v2084_v13  ;;  %v1448_v13 = vld [vmem:[%s2727_s9] sm:$0xff] }
 0x129   :  { %1854 = vmatprep.subr.bf16.mxu0 %v2085_v14 }
 0x12c   :  { %1855 = vmatpush3.bf16.msra.mxu0 %v2086_v15 }
 0x1da   :  { %v544_v38 = vpop.f32.mrb[4].mxu0 }
 0x1db   :  { %v545_v39 = vadd.f32 %v1623_v37, %v544_v38  ;;  %v1913_v40 = vpop.f32.mrb[5].mxu0  ;;  %v1632_v37 = vld [vmem:[%s2721_s7] ss:$0 sm:$0xff] }
 0x1dc   :  { %v547_v42 = vpop.f32.mrb[6].mxu0 }
 0x1dd   :  { %v550_v44 = vpack.c.bf16 %v545_v39, %v545_v39  ;;  %v1914_v45 = vpop.f32.mrb[7].mxu0 }
 0x1de   :  { %v1473_v45 = vld [vmem:[%s2722_s16] sm:$0xff] }
 0x1df   :  { %1932 = vmatmul.mubr.bf16.vlgmr.msra.gmra.mrb[4].mxu1 %v550_v44 }
 0x1e0   :  { %1831 = vmatpush3.bf16.msra.mxu1 %v2060_v43  ;;  %1036 = vmatprep.mubr.bf16.mxu1 %v692_v16  ;;  %v2087_v16 = vld [vmem:[%s2753_s17 + $0xd0] sm:$0xff]  }
 0x1e1   :  { %1832 = vmatprep.subr.bf16.mxu1 %v2061_v46  ;;  %1856 = vmatprep.subr.bf16.mxu0 %v2087_v16  ;;  %v1474_v46 = vld [vmem:[%s2722_s16 + $0x8] sm:$0x3] }
 0x1e2   :  { %1857 = vmatpush3.bf16.msra.mxu0 %v2088_v17 }
 0x1e3   :  { %1858 = vmatprep.subr.bf16.mxu0 %v2089_v18 }
 0x1e4   :  { %1833 = vmatpush3.bf16.msra.mxu1 %v2062_v47  ;;  %v1983_v47 = vpack.c.bf16 %v1474_v46, %v1473_v45 }
 0x1e5   :  { %1834 = vmatprep.subr.bf16.mxu1 %v2063_v48 }
 0x1e6   :  { %1859 = vmatpush3.bf16.msra.mxu0 %v2090_v19 }
 0x1e7   :  { %1860 = vmatprep.subr.bf16.mxu0 %v2091_v20 }
 0x1e8   :  { %1835 = vmatpush3.bf16.msra.mxu1 %v2064_v49  ;;  %v1658_v49 = vld [vmem:[%s2723_s18] ss:$0 sm:$0xff] }
 0x1e9   :  { %1836 = vmatprep.subr.bf16.mxu1 %v2065_v50 }
 0x1ea   :  { %1861 = vmatpush3.bf16.msra.mxu0 %v2092_v21 }
 0x1eb   :  { %1862 = vmatprep.subr.bf16.mxu0 %v2093_v22 }
 0x1ec   :  { %1837 = vmatpush3.bf16.msra.mxu1 %v2066_v51 }
 0x1ed   :  { %1838 = vmatprep.subr.bf16.mxu1 %v2067_v52 }
 0x1ee   :  { %1863 = vmatpush3.bf16.msra.mxu0 %v2094_v23  ;;  %v662_v23 = vld [vmem:[%s2728_s1] sm:$0x3] }
 0x1ef   :  { %1864 = vmatprep.subr.bf16.mxu0 %v2095_v25 }
 0x1f0   :  { %1839 = vmatpush3.bf16.msra.mxu1 %v2068_v53 }
 0x1f1   :  { %1840 = vmatprep.subr.bf16.mxu1 %v2069_v54 }
 0x1f2   :  { %1865 = vmatpush3.bf16.msra.mxu0 %v2096_v26 }
 0x1f3   :  { %1866 = vmatprep.subr.bf16.mxu0 %v2097_v27 }
 0x1f4   :  { %1841 = vmatpush3.bf16.msra.mxu1 %v2070_v55  ;;  %v1726_v55 = vld [vmem:[%s2725_s13] ss:$0 sm:$0xff] }
 0x1f5   :  { %1842 = vmatprep.subr.bf16.mxu1 %v2071_v56 }
 0x1f6   :  { %1867 = vmatpush3.bf16.msra.mxu0 %v2098_v28 }
 0x1f7   :  { %1955 = vmatprep.subr.bf16.mxu0 %v2120_v41 }
 0x1f8   :  { %1843 = vmatpush3.bf16.msra.mxu1 %v2072_v57 }
 0x1f9   :  { %1844 = vmatprep.subr.bf16.mxu1 %v2073_v58  ;;  %1215 = vmatmul.mubr.bf16.vlgmr.msra.gmra.mrb[12].mxu0 %v2467_v34 }
 0x1fa   :  { %v1824_v60 = vpop.f32.mrb[8].mxu0  ;;  %1971 = vmatprep.mubr.msk.bf16.mxu0 %vm2121_vm0, %v2120_v41  ;;  %1956 = vmatpush3.bf16.msra.mxu0 %v2099_v29 }
 0x1fb   :  { %v1825_v62 = vpop.f32.mrb[9].mxu0  ;;  %1957 = vmatprep.subr.bf16.mxu0 %v2120_v41 }
 0x1fc   :  { %1845 = vmatpush3.bf16.msra.mxu1 %v2074_v59  ;;  %v1826_v0 = vadd.f32 %v1825_v62, %v1824_v60  ;;  %v1827_v1 = vpop.f32.mrb[10].mxu0 }
 0x1fd   :  { %1935 = vmatprep.subr.bf16.mxu1 %v2120_v41  ;;  %v1828_v2 = vpop.f32.mrb[11].mxu0 }
 0x1fe   :  { %v863_v3 = vadd.f32 %v1826_v0, %v1641_v61  ;;  %1958 = vmatpush3.bf16.msra.mxu0 %v2100_v30 }
 0x1ff   :  { %1037 = vmatmul.mubr.bf16.vlgmr.msra.gmra.mrb[8].mxu1 %v2467_v34  ;;  %1959 = vmatprep.subr.bf16.mxu0 %v2120_v41  ;;  %v2104_v34 = vld [vmem:[%s2720_s14 + $0x28] sm:$0xff]  }
 0x200   :  { %1936 = vmatpush3.bf16.msra.mxu1 %v2075_v63  ;;  %868 = vst [vmem:[%s2719_s20] sm:$0xff] %v863_v3  ;;  %1951 = vmatprep.mubr.msk.bf16.mxu1 %vm2121_vm0, %v2120_v41  ;;  %v1224_v11 = vpack.c.bf16 %v863_v3, %v863_v3  ;;  %v1708_v63 = vld [vmem:[%s2723_s18 + $0x1] ss:$0 sm:$0xff] }
 0x201   :  { %1937 = vmatprep.subr.bf16.mxu1 %v2120_v41 }
 0x202   :  { %1960 = vmatpush3.bf16.msra.mxu0 %v2101_v31 }
 0x203   :  { %1961 = vmatprep.subr.bf16.mxu0 %v2120_v41 }
 0x204   :  { %1938 = vmatpush3.bf16.msra.mxu1 %v2076_v4 }
 0x205   :  { %1939 = vmatprep.subr.bf16.mxu1 %v2120_v41 }
 0x206   :  { %1962 = vmatpush3.bf16.msra.mxu0 %v2102_v32 }
 0x207   :  { %1963 = vmatprep.subr.bf16.mxu0 %v2120_v41 }
 0x208   :  { %1940 = vmatpush3.bf16.msra.mxu1 %v2077_v5  ;;  %v2124_v5 = vmov 0  }
 0x209   :  { %1941 = vmatprep.subr.bf16.mxu1 %v2120_v41  ;;  %1993 = vset.pattern.permute.xlu0 %v2124_v5 }
 0x20a   :  { %1964 = vmatpush3.bf16.msra.mxu0 %v2103_v33  ;;  %1992 = vset.pattern.permute.xlu1 %v2124_v5  ;;  %v677_v33 = vand.u32 127, %v74_v24 }
 0x20b   :  { %1965 = vmatprep.subr.bf16.mxu0 %v2120_v41 }
 0x20c   :  { %1942 = vmatpush3.bf16.msra.mxu1 %v2078_v6  ;;  %v1735_v6 = vld [vmem:[%s2726_s15] ss:$0 sm:$0xff] }
 0x20d   :  { %1943 = vmatprep.subr.bf16.mxu1 %v2120_v41 }
 0x20e   :  { %1966 = vmatpush3.bf16.msra.mxu0 %v2104_v34 }
 0x20f   :  { %1967 = vmatprep.subr.bf16.mxu0 %v2120_v41 }
 0x210   :  { %1944 = vmatpush3.bf16.msra.mxu1 %v2079_v7 }
 0x211   :  { %1945 = vmatprep.subr.bf16.mxu1 %v2120_v41 }
 0x212   :  { %1968 = vmatpush3.bf16.msra.mxu0 %v2105_v35 }
 0x213   :  { %1969 = vmatprep.subr.bf16.mxu0 %v2120_v41 }
 0x214   :  { %1946 = vmatpush3.bf16.msra.mxu1 %v2080_v8 }
 0x215   :  { %1947 = vmatprep.subr.bf16.mxu1 %v2120_v41 }
 0x216   :  { %1970 = vmatpush3.bf16.msra.mxu0 %v2106_v36 }
 0x218   :  { %1948 = vmatpush3.bf16.msra.mxu1 %v2081_v9 }
 0x219   :  { %1949 = vmatprep.subr.bf16.mxu1 %v2120_v41 }
 0x21c   :  { %1950 = vmatpush3.bf16.msra.mxu1 %v2082_v10 }
 0x21f   :  { %1952 = vmatmul.mubr.bf16.vlgmr.msra.gmra.mrb[12].mxu1 %v1224_v11 }
 0x220   :  { %1979 = vmatprep.mubr.msk.f32.mxu1 %vm2121_vm0, %v2120_v41  ;;  %v2122_v41 = vmov 0.0|0.0  }
 0x221   :  { %1982 = vmatprep.subr.bf16.mxu1 %v2122_v41 }
 0x222   :  { %1985 = vmatpush3.bf16.msk.msra.mxu1 %vm1984_vm4, %v1983_v47 }
 0x2b2   :  { %v656_v38 = vpop.f32.mrb[4].mxu1 }
 0x2b3   :  { %v2653_v39 = vadd.f32 %v1632_v37, %v656_v38  ;;  %v1933_v40 = vpop.f32.mrb[5].mxu1 }
 0x2b4   :  { %v659_v42 = vpop.f32.mrb[6].mxu1 }
 0x2b5   :  { %v1934_v43 = vpop.f32.mrb[7].mxu1  ;;  %v664_v44 = vsel %vm663_vm1, %v2653_v39, -inf }
 0x2b6   :  { %665 = vmax.xlane.f32.xlu0 %v664_v44 }
 0x2cc   :  { %v1868_v62 = vpop.f32.mrb[12].mxu0 }
 0x2cd   :  { %v1869_v0 = vpop.f32.mrb[13].mxu0 }
 0x2ce   :  { %v1870_v1 = vadd.f32 %v1869_v0, %v1868_v62  ;;  %v1871_v2 = vpop.f32.mrb[14].mxu0 }
 0x2cf   :  { %v1872_v3 = vpop.f32.mrb[15].mxu0 }
 0x2d0   :  { %v1217_v4 = vadd.f32 %v1870_v1, %v1708_v63 }
 0x2d2   :  { %v1846_v48 = vpop.f32.mrb[8].mxu1  ;;  %1725 = vst [vmem:[%s2724_s21 + $0x8] sm:$0xff] %v1217_v4 }
 0x2d3   :  { %v1847_v50 = vpop.f32.mrb[9].mxu1 }
 0x2d4   :  { %v1848_v51 = vadd.f32 %v1847_v50, %v1846_v48  ;;  %v1849_v52 = vpop.f32.mrb[10].mxu1 }
 0x2d5   :  { %v1850_v53 = vpop.f32.mrb[11].mxu1 }
 0x2d6   :  { %v1039_v54 = vadd.f32 %v1848_v51, %v1658_v49 }
 0x2d8   :  { %1044 = vst [vmem:[%s2724_s21] sm:$0xff] %v1039_v54 }
 0x2f2   :  { %v1330_v56 = vpop.f32.mrb[12].mxu1 }
 0x2f3   :  { %v1331_v57 = vadd.f32 %v1726_v55, %v1330_v56  ;;  %v1953_v58 = vpop.f32.mrb[13].mxu1 }
 0x2f4   :  { %v1333_v59 = vpop.f32.mrb[14].mxu1 }
 0x2f5   :  { %v1336_v60 = vpack.c.bf16 %v1331_v57, %v1331_v57  ;;  %v1954_v61 = vpop.f32.mrb[15].mxu1 }
 0x2f7   :  { %1972 = vmatmul.mubr.bf16.vlgmr.msra.gmra.mrb[16].mxu0 %v1336_v60 }
 0x343   :  { %v666_v14 = vpop.xlane.xlu0 %665 }
 0x344   :  { %v667_v25 = vsub.f32 %v2653_v39, %v666_v14 }
 0x346   :  { %v668_v26 = vmul.f32 1.442695, %v667_v25 }
 0x3ca   :  { %v1442_v7 = vpop.f32.mrb[16].mxu0 }
 0x3cb   :  { %v1443_v8 = vadd.f32 %v1735_v6, %v1442_v7  ;;  %v1973_v9 = vpop.f32.mrb[17].mxu0 }
 0x3cc   :  { %v1445_v10 = vpop.f32.mrb[18].mxu0 }
 0x3cd   :  { %v1974_v11 = vpop.f32.mrb[19].mxu0  ;;  %1980 = vmatmul.mubr.msk.f32.vlgmr.msra.gmra.mrb[16].mxu1 %vm1449_vm5, %v1443_v8  ;;  %v1450_v12 = vsel %vm1449_vm5, %v1443_v8, -inf }
 0x3ce   :  { %1451 = vmax.xlane.f32.xlu0 %v1450_v12 }
 0x3e4   :  { %1463 = vperm.xlu0 %1993, %v1448_v13  }
 0x45b   :  { %v1452_v15 = vpop.xlane.xlu0 %1451 }
 0x45c   :  { %v1453_v16 = vsub.f32 %v1443_v8, %v1452_v15 }
 0x45e   :  { %v1454_v17 = vmul.f32 1.442695, %v1453_v16 }
 0x460   :  { %2107 = vpow2.f32 %v1454_v17 }
 0x461   :  { %2109 = vpow2.f32 %v668_v26 }
 0x463   :  { %v1464_v35 = vpop.permute.xlu0 %1463 }
 0x464   :  { %vm1465_vm7 = vcmp.eq.s32.totalorder %v677_v33, %v1464_v35 }
 0x465   :  { %v1466_v40 = vsel %vm1465_vm7, %v1443_v8, 0.0 }
 0x466   :  { %v1467_v42 = vsel %vm1449_vm5, %v1466_v40, 0.0 }
 0x46a   :  { %v2108_v18 = vpop.eup %2107 }
 0x46b   :  { %v1456_v19 = vsel %vm1449_vm5, %v2108_v18, 0.0  ;;  %v2110_v27 = vpop.eup %2109 }
 0x46c   :  { %1457 = vadd.xlane.f32.xlu0 %v1456_v19  ;;  %v670_v28 = vsel %vm663_vm1, %v2110_v27, 0.0 }
 0x4a0   :  { %v1548_v20 = vpop.f32.mrb[16].mxu1 }
 0x4a1   :  { %v1981_v21 = vpop.f32.mrb[17].mxu1  ;;  %v1552_v22 = vsel %vm1449_vm5, %v1548_v20, -inf  ;;  %v1564_v43 = vsel %vm1465_vm7, %v1548_v20, 0.0 }
 0x4a2   :  { %1553 = vmax.xlane.f32.xlu1 %v1552_v22  ;;  %v1565_v44 = vsel %vm1449_vm5, %v1564_v43, 0.0 }
 0x4b3   :  { %679 = vperm.xlu1 %1992, %v662_v23  }
 0x4d7   :  { %671 = vadd.xlane.f32.xlu1 %v670_v28 }
 0x4f9   :  { %v1458_v41 = vpop.xlane.xlu0 %1457 }
 0x52f   :  { %v1554_v29 = vpop.xlane.xlu1 %1553 }
 0x530   :  { %v1555_v30 = vsub.f32 %v1548_v20, %v1554_v29 }
 0x532   :  { %v1556_v31 = vmul.f32 1.442695, %v1555_v30 }
 0x533   :  { %v680_v32 = vpop.permute.xlu1 %679 }
 0x534   :  { %2111 = vpow2.f32 %v1556_v31  ;;  %vm681_vm6 = vcmp.eq.s32.totalorder %v677_v33, %v680_v32 }
 0x535   :  { %v682_v37 = vsel %vm681_vm6, %v2653_v39, 0.0 }
 0x536   :  { %v683_v38 = vsel %vm663_vm1, %v682_v37, 0.0 }
 0x53e   :  { %v2112_v34 = vpop.eup %2111 }
 0x53f   :  { %v1558_v36 = vsel %vm1449_vm5, %v2112_v34, 0.0 }
 0x540   :  { %1559 = vadd.xlane.f32.xlu1 %v1558_v36 }
 0x544   :  { %684 = vadd.xlane.f32.xlu1 %v683_v38 }
 0x548   :  { %1468 = vadd.xlane.f32.xlu1 %v1467_v42 }
 0x54c   :  { %1566 = vadd.xlane.f32.xlu1 %v1565_v44 }
 0x564   :  { %v672_v24 = vpop.xlane.xlu1 %671 }
 0x565   :  { %2113 = vlog2.f32 %v672_v24 }
 0x566   :  { %2115 = vlog2.f32 %v1458_v41 }
 0x56f   :  { %v2114_v45 = vpop.eup %2113 }
 0x570   :  { %v674_v46 = vmul.f32 0.6931472, %v2114_v45  ;;  %v2116_v47 = vpop.eup %2115 }
 0x571   :  { %v1460_v48 = vmul.f32 0.6931472, %v2116_v47 }
 0x572   :  { %v675_v49 = vadd.f32 %v674_v46, %v666_v14 }
 0x573   :  { %v1461_v52 = vadd.f32 %v1460_v48, %v1452_v15 }
 0x5cd   :  { %v1560_v39 = vpop.xlane.xlu1 %1559 }
 0x5ce   :  { %2117 = vlog2.f32 %v1560_v39 }
 0x5d1   :  { %v685_v50 = vpop.xlane.xlu1 %684 }
 0x5d2   :  { %v686_v51 = vsub.f32 %v675_v49, %v685_v50 }
 0x5d4   :  { %688 = vst.msk [vmem:[%s2729_s19] sm:$0x3] %vm687_vm8, %v686_v51 }
 0x5d5   :  { %v1469_v53 = vpop.xlane.xlu1 %1468 }
 0x5d6   :  { %v1470_v54 = vsub.f32 %v1461_v52, %v1469_v53 }
 0x5d8   :  { %v2118_v55 = vpop.eup %2117  ;;  %1472 = vst.msk [vmem:[%s2730_s22] sm:$0xff] %vm1471_vm9, %v1470_v54 }
 0x5d9   :  { %v1562_v56 = vmul.f32 0.6931472, %v2118_v55  ;;  %v1567_v58 = vpop.xlane.xlu1 %1566 }
 0x5db   :  { %v1563_v57 = vadd.f32 %v1562_v56, %v1554_v29 }
 0x5dd   :  { %v1568_v59 = vsub.f32 %v1563_v57, %v1567_v58 }
 0x5df   :  { %1569 = vst.msk [vmem:[%s2731_s23] sm:$0xff] %vm1471_vm9, %v1568_v59 }

</bundles_post_ra>
